<compile_context>
chip_gen: v6e
topology: v6e:2x2x1
jax: 0.10.0
libtpu: 0.0.40
codegen_flags: <defaults>
</compile_context>

<pallas_src>
import functools

import jax
import jax.numpy as jnp
import numpy as np
from jax.experimental import pallas as pl
from jax.experimental.pallas import tpu as pltpu

# ----------------------------- config -----------------------------
HIDDEN = 48                 # args.hidden_dim
EMB = HIDDEN // 3           # per-categorical embedding dim
N_LAYERS = 2                # args.n_layers
N_CONT = 4                  # args.n_cont
BATCH = 2
SEQ = 8
N_TEST, N_QUESTIONS, N_TAG, N_HEAD, N_HOUR, N_DOW = 10, 20, 7, 5, 23, 6
CONT_COLS = ["cont0", "cont1", "cont2", "cont3"]
EPS = 1e-5                  # nn.LayerNorm default eps


# --------------- fused kernel: projections + LSTM + fc + sigmoid ---------------
def fused_lstm_kernel(cate_ref, cont_ref,
                      w_cate_ref, b_cate_ref, g1_ref, beta1_ref,
                      w_cont_ref, b_cont_ref, g2_ref, beta2_ref,
                      w_comb_ref, b_comb_ref, g3_ref, beta3_ref,
                      w_ih_ref, w_hh_ref, b_ref, w_fc_ref, b_fc_ref,
                      out_ref, *, batch, seq):
    def layernorm(x, g, b):
        mu = jnp.mean(x, axis=-1, keepdims=True)
        var = jnp.mean(jnp.square(x - mu), axis=-1, keepdims=True)
        return (x - mu) * jax.lax.rsqrt(var + EPS) * g + b

    # ---- feature projections over all S*B rows at once (time-major rows) ----
    cate = jnp.dot(cate_ref[...], w_cate_ref[...],
                   preferred_element_type=jnp.float32) + b_cate_ref[...]
    cate = layernorm(cate, g1_ref[...], beta1_ref[...])

    cont = jnp.dot(cont_ref[...], w_cont_ref[...],
                   preferred_element_type=jnp.float32) + b_cont_ref[...]
    cont = layernorm(cont, g2_ref[...], beta2_ref[...])

    # comb_proj: ReLU(concat([cate, cont])) @ W + b, done as a split matmul
    # (sublane-aligned slices of W) to avoid a lane-dim concat.
    w_comb = w_comb_ref[...]
    comb = (jnp.dot(jax.nn.relu(cate), w_comb[:HIDDEN, :],
                    preferred_element_type=jnp.float32)
            + jnp.dot(jax.nn.relu(cont), w_comb[HIDDEN:, :],
                      preferred_element_type=jnp.float32)
            + b_comb_ref[...])
    x2d = layernorm(comb, g3_ref[...], beta3_ref[...])        # (S*B, H)

    # ------------------- stacked LSTM recurrence (unrolled) -------------------
    def cell(gates, c_prev):
        i_g = jax.nn.sigmoid(gates[:, 0 * HIDDEN:1 * HIDDEN])
        f_g = jax.nn.sigmoid(gates[:, 1 * HIDDEN:2 * HIDDEN])
        g_g = jnp.tanh(gates[:, 2 * HIDDEN:3 * HIDDEN])
        o_g = jax.nn.sigmoid(gates[:, 3 * HIDDEN:4 * HIDDEN])
        c_new = f_g * c_prev + i_g * g_g
        h_new = o_g * jnp.tanh(c_new)
        return h_new, c_new

    # hoist loop-invariant weight loads once
    w_ih = [w_ih_ref[l] for l in range(N_LAYERS)]             # (H, 4H) each
    w_hh = [w_hh_ref[l] for l in range(N_LAYERS)]             # (H, 4H) each
    bias = [b_ref[l] for l in range(N_LAYERS)]                # (1, 4H) each

    # layer-0 input-gate contributions for all timesteps in one MXU pass
    xg0 = jnp.dot(x2d, w_ih[0], preferred_element_type=jnp.float32) + bias[0]

    h = [jnp.zeros((batch, HIDDEN), jnp.float32) for _ in range(N_LAYERS)]
    c = [jnp.zeros((batch, HIDDEN), jnp.float32) for _ in range(N_LAYERS)]

    w_fc_row = w_fc_ref[...]                                  # (1, H)
    b_fc = b_fc_ref[...]                                      # (1, 1)

    for t in range(seq):
        gates0 = (xg0[t * batch:(t + 1) * batch, :]
                  + jnp.dot(h[0], w_hh[0], preferred_element_type=jnp.float32))
        h[0], c[0] = cell(gates0, c[0])
        x = h[0]
        for l in range(1, N_LAYERS):
            gates = (jnp.dot(x, w_ih[l], preferred_element_type=jnp.float32)
                     + jnp.dot(h[l], w_hh[l], preferred_element_type=jnp.float32)
                     + bias[l])
            h[l], c[l] = cell(gates, c[l])
            x = h[l]

        # fc + sigmoid as broadcast-multiply + lane row-sum (no MXU, no HBM DMA)
        logit_t = jnp.sum(x * w_fc_row, axis=-1, keepdims=True) + b_fc   # (B, 1)
        out_ref[:, t:t + 1] = jax.nn.sigmoid(logit_t)

    # NOTE: out_ref is a single (B, S) VMEM block; it is written back to HBM
    # exactly once after the kernel body (no per-timestep output DMA).


# ----------------------------- wrapper -----------------------------
def lstm_forward(inputs, params):
    B, S = inputs["interaction"].shape
    tm = lambda a: jnp.transpose(a, (1, 0))                   # (B,S) -> (S,B)

    # embedding lookups (glue, plain JAX gathers), gathered time-major
    embeds = [
        jnp.take(params["emb_interaction"], tm(inputs["interaction"]), axis=0),
        jnp.take(params["emb_test"], tm(inputs["testId"]), axis=0),
        jnp.take(params["emb_question"], tm(inputs["assessmentItemID"]), axis=0),
        jnp.take(params["emb_tag"], tm(inputs["KnowledgeTag"]), axis=0),
        jnp.take(params["emb_head"], tm(inputs["i_head"]), axis=0),
        jnp.take(params["emb_hour"], tm(inputs["hour"]), axis=0),
        jnp.take(params["emb_dow"], tm(inputs["dow"]), axis=0),
    ]
    embed_cate = jnp.concatenate(embeds, axis=-1)             # (S, B, 7*EMB)
    cont = jnp.stack([tm(inputs[c]) for c in CONT_COLS], axis=-1)   # (S, B, N_CONT)

    cate2d = embed_cate.reshape(S * B, 7 * EMB).astype(jnp.float32)
    cont2d = cont.reshape(S * B, N_CONT).astype(jnp.float32)

    # Pack PyTorch LSTM weights (L, 4H, H) -> (L, H, 4H) so gates = x @ W;
    # gate column blocks stay in PyTorch order i, f, g, o.
    w_ih_p = jnp.transpose(params["w_ih"], (0, 2, 1))
    w_hh_p = jnp.transpose(params["w_hh"], (0, 2, 1))
    b_p = (params["b_ih"] + params["b_hh"]).reshape(N_LAYERS, 1, 4 * HIDDEN)

    row = lambda v: v.reshape(1, -1)
    kernel = functools.partial(fused_lstm_kernel, batch=B, seq=S)

    return pl.pallas_call(
        kernel,
        out_shape=jax.ShapeDtypeStruct((B, S), jnp.float32),
    )(cate2d, cont2d,
      params["w_cate"], row(params["b_cate"]), row(params["g1"]), row(params["beta1"]),
      params["w_cont"], row(params["b_cont"]), row(params["g2"]), row(params["beta2"]),
      params["w_comb"], row(params["b_comb"]), row(params["g3"]), row(params["beta3"]),
      w_ih_p, w_hh_p, b_p,
      params["w_fc"].reshape(1, HIDDEN), params["b_fc"].reshape(1, 1))


# ----------------------- pure-JAX reference -----------------------
def reference_forward(inputs, params):
    B, S = inputs["interaction"].shape

    def layernorm(x, g, b):
        mu = jnp.mean(x, axis=-1, keepdims=True)
        var = jnp.mean(jnp.square(x - mu), axis=-1, keepdims=True)
        return (x - mu) * jax.lax.rsqrt(var + EPS) * g + b

    embeds = [
        jnp.take(params["emb_interaction"], inputs["interaction"], axis=0),
        jnp.take(params["emb_test"], inputs["testId"], axis=0),
        jnp.take(params["emb_question"], inputs["assessmentItemID"], axis=0),
        jnp.take(params["emb_tag"], inputs["KnowledgeTag"], axis=0),
        jnp.take(params["emb_head"], inputs["i_head"], axis=0),
        jnp.take(params["emb_hour"], inputs["hour"], axis=0),
        jnp.take(params["emb_dow"], inputs["dow"], axis=0),
    ]
    embed_cate = jnp.concatenate(embeds, axis=-1)
    cont = jnp.stack([inputs[c] for c in CONT_COLS], axis=-1)

    cate = layernorm(embed_cate @ params["w_cate"] + params["b_cate"],
                     params["g1"], params["beta1"])
    cont_e = layernorm(cont @ params["w_cont"] + params["b_cont"],
                       params["g2"], params["beta2"])
    comb_in = jax.nn.relu(jnp.concatenate([cate, cont_e], axis=-1))
    X = layernorm(comb_in @ params["w_comb"] + params["b_comb"],
                  params["g3"], params["beta3"])                      # (B, S, H)

    h = jnp.zeros((N_LAYERS, B, HIDDEN), jnp.float32)
    c = jnp.zeros((N_LAYERS, B, HIDDEN), jnp.float32)
    outs = []
    for t in range(S):
        x = X[:, t]
        for layer in range(N_LAYERS):
            gates = (x @ params["w_ih"][layer].T
                     + h[layer] @ params["w_hh"][layer].T
                     + params["b_ih"][layer] + params["b_hh"][layer])
            i_g = jax.nn.sigmoid(gates[:, :HIDDEN])
            f_g = jax.nn.sigmoid(gates[:, HIDDEN:2 * HIDDEN])
            g_g = jnp.tanh(gates[:, 2 * HIDDEN:3 * HIDDEN])
            o_g = jax.nn.sigmoid(gates[:, 3 * HIDDEN:])
            c_new = f_g * c[layer] + i_g * g_g
            h_new = o_g * jnp.tanh(c_new)
            h = h.at[layer].set(h_new)
            c = c.at[layer].set(c_new)
            x = h_new
        outs.append(x)
    out = jnp.stack(outs, axis=1)                                     # (B, S, H)
    logits = out @ params["w_fc"] + params["b_fc"]
    return jax.nn.sigmoid(logits)[..., 0]


# ------------------------- deterministic init -------------------------
def init_params(key):
    keys = jax.random.split(key, 24)
    it = iter(keys)

    def rnd(shape, scale=0.1):
        return jax.random.normal(next(it), shape, jnp.float32) * scale

    p = {
        "emb_interaction": rnd((3, EMB)),
        "emb_test": rnd((N_TEST + 1, EMB)),
        "emb_question": rnd((N_QUESTIONS + 1, EMB)),
        "emb_tag": rnd((N_TAG + 1, EMB)),
        "emb_head": rnd((N_HEAD + 1, EMB)),
        "emb_hour": rnd((N_HOUR + 1, EMB)),
        "emb_dow": rnd((N_DOW + 1, EMB)),
        "w_cate": rnd((7 * EMB, HIDDEN)), "b_cate": rnd((HIDDEN,)),
        "g1": jnp.ones((HIDDEN,), jnp.float32), "beta1": jnp.zeros((HIDDEN,), jnp.float32),
        "w_cont": rnd((N_CONT, HIDDEN)), "b_cont": rnd((HIDDEN,)),
        "g2": jnp.ones((HIDDEN,), jnp.float32), "beta2": jnp.zeros((HIDDEN,), jnp.float32),
        "w_comb": rnd((2 * HIDDEN, HIDDEN)), "b_comb": rnd((HIDDEN,)),
        "g3": jnp.ones((HIDDEN,), jnp.float32), "beta3": jnp.zeros((HIDDEN,), jnp.float32),
        "w_ih": rnd((N_LAYERS, 4 * HIDDEN, HIDDEN)),
        "w_hh": rnd((N_LAYERS, 4 * HIDDEN, HIDDEN)),
        "b_ih": rnd((N_LAYERS, 4 * HIDDEN)),
        "b_hh": rnd((N_LAYERS, 4 * HIDDEN)),
        "w_fc": rnd((HIDDEN, 1)), "b_fc": rnd((1,)),
    }
    return p


if __name__ == "__main__":
    key = jax.random.PRNGKey(0)
    pkey, ikey = jax.random.split(key)
    params = init_params(pkey)

    ks = jax.random.split(ikey, 7 + N_CONT)
    inputs = {
        "interaction": jax.random.randint(ks[0], (BATCH, SEQ), 0, 3),
        "testId": jax.random.randint(ks[1], (BATCH, SEQ), 0, N_TEST + 1),
        "assessmentItemID": jax.random.randint(ks[2], (BATCH, SEQ), 0, N_QUESTIONS + 1),
        "KnowledgeTag": jax.random.randint(ks[3], (BATCH, SEQ), 0, N_TAG + 1),
        "i_head": jax.random.randint(ks[4], (BATCH, SEQ), 0, N_HEAD + 1),
        "hour": jax.random.randint(ks[5], (BATCH, SEQ), 0, N_HOUR + 1),
        "dow": jax.random.randint(ks[6], (BATCH, SEQ), 0, N_DOW + 1),
    }
    for i, col in enumerate(CONT_COLS):
        inputs[col] = jax.random.uniform(ks[7 + i], (BATCH, SEQ), jnp.float32)

    preds = jax.block_until_ready(lstm_forward(inputs, params))
    ref = jax.block_until_ready(reference_forward(inputs, params))

    assert preds.shape == (BATCH, SEQ)
    np.testing.assert_allclose(np.asarray(preds), np.asarray(ref),
                               rtol=2e-3, atol=2e-3)
    print("KERNEL_OK")
</pallas_src>

<mosaic_0001>
module attributes {stable_mosaic.version = 11 : i64} {
  func.func @fused_lstm_kernel(%arg0: memref<16x112xf32, #tpu.memory_space<vmem>>, %arg1: memref<16x4xf32, #tpu.memory_space<vmem>>, %arg2: memref<112x48xf32, #tpu.memory_space<vmem>>, %arg3: memref<1x48xf32, #tpu.memory_space<vmem>>, %arg4: memref<1x48xf32, #tpu.memory_space<vmem>>, %arg5: memref<1x48xf32, #tpu.memory_space<vmem>>, %arg6: memref<4x48xf32, #tpu.memory_space<vmem>>, %arg7: memref<1x48xf32, #tpu.memory_space<vmem>>, %arg8: memref<1x48xf32, #tpu.memory_space<vmem>>, %arg9: memref<1x48xf32, #tpu.memory_space<vmem>>, %arg10: memref<96x48xf32, #tpu.memory_space<vmem>>, %arg11: memref<1x48xf32, #tpu.memory_space<vmem>>, %arg12: memref<1x48xf32, #tpu.memory_space<vmem>>, %arg13: memref<1x48xf32, #tpu.memory_space<vmem>>, %arg14: memref<2x48x192xf32, #tpu.memory_space<vmem>>, %arg15: memref<2x48x192xf32, #tpu.memory_space<vmem>>, %arg16: memref<2x1x192xf32, #tpu.memory_space<vmem>>, %arg17: memref<1x48xf32, #tpu.memory_space<vmem>>, %arg18: memref<1x1xf32, #tpu.memory_space<vmem>>, %arg19: memref<2x8xf32, #tpu.memory_space<vmem>>) attributes {dimension_semantics = [], scalar_prefetch = 0 : i64, scratch_operands = 0 : i64, tpu.core_type = #tpu.core_type<tc>} {
    %c0 = arith.constant 0 : index
    %c0_0 = arith.constant 0 : index
    %0 = vector.load %arg0[%c0, %c0_0] : memref<16x112xf32, #tpu.memory_space<vmem>>, vector<16x112xf32>
    %c0_1 = arith.constant 0 : index
    %c0_2 = arith.constant 0 : index
    %1 = vector.load %arg2[%c0_1, %c0_2] : memref<112x48xf32, #tpu.memory_space<vmem>>, vector<112x48xf32>
    %cst = arith.constant dense<0.000000e+00> : vector<16x48xf32>
    %2 = tpu.matmul %0, %1, %cst {dimension_numbers = #tpu.dot_dimension_numbers<[1], [0], [0], [1], [0, 0, 1, 1], [], []>} : vector<16x112xf32>, vector<112x48xf32>, vector<16x48xf32> -> vector<16x48xf32>
    %c0_3 = arith.constant 0 : index
    %c0_4 = arith.constant 0 : index
    %3 = vector.load %arg3[%c0_3, %c0_4] : memref<1x48xf32, #tpu.memory_space<vmem>>, vector<1x48xf32>
    %4 = vector.broadcast %3 : vector<1x48xf32> to vector<16x48xf32>
    %5 = arith.addf %2, %4 : vector<16x48xf32>
    %c0_5 = arith.constant 0 : index
    %c0_6 = arith.constant 0 : index
    %6 = vector.load %arg4[%c0_5, %c0_6] : memref<1x48xf32, #tpu.memory_space<vmem>>, vector<1x48xf32>
    %c0_7 = arith.constant 0 : index
    %c0_8 = arith.constant 0 : index
    %7 = vector.load %arg5[%c0_7, %c0_8] : memref<1x48xf32, #tpu.memory_space<vmem>>, vector<1x48xf32>
    %cst_9 = arith.constant dense<0.000000e+00> : vector<16xf32>
    %8 = vector.multi_reduction <add>, %5, %cst_9 [1] : vector<16x48xf32> to vector<16xf32>
    %9 = vector.shape_cast %8 : vector<16xf32> to vector<16x1xf32>
    %cst_10 = arith.constant 4.800000e+01 : f32
    %10 = vector.broadcast %cst_10 : f32 to vector<16x1xf32>
    %11 = arith.divf %9, %10 : vector<16x1xf32>
    %12 = vector.broadcast %11 : vector<16x1xf32> to vector<16x48xf32>
    %13 = arith.subf %5, %12 : vector<16x48xf32>
    %14 = arith.mulf %13, %13 : vector<16x48xf32>
    %cst_11 = arith.constant dense<0.000000e+00> : vector<16xf32>
    %15 = vector.multi_reduction <add>, %14, %cst_11 [1] : vector<16x48xf32> to vector<16xf32>
    %16 = vector.shape_cast %15 : vector<16xf32> to vector<16x1xf32>
    %cst_12 = arith.constant 4.800000e+01 : f32
    %17 = vector.broadcast %cst_12 : f32 to vector<16x1xf32>
    %18 = arith.divf %16, %17 : vector<16x1xf32>
    %19 = vector.broadcast %11 : vector<16x1xf32> to vector<16x48xf32>
    %20 = arith.subf %5, %19 : vector<16x48xf32>
    %cst_13 = arith.constant 9.99999974E-6 : f32
    %21 = vector.broadcast %cst_13 : f32 to vector<16x1xf32>
    %22 = arith.addf %18, %21 : vector<16x1xf32>
    %23 = math.rsqrt %22 : vector<16x1xf32>
    %24 = vector.broadcast %23 : vector<16x1xf32> to vector<16x48xf32>
    %25 = arith.mulf %20, %24 : vector<16x48xf32>
    %26 = vector.broadcast %6 : vector<1x48xf32> to vector<16x48xf32>
    %27 = arith.mulf %25, %26 : vector<16x48xf32>
    %28 = vector.broadcast %7 : vector<1x48xf32> to vector<16x48xf32>
    %29 = arith.addf %27, %28 : vector<16x48xf32>
    %c0_14 = arith.constant 0 : index
    %c0_15 = arith.constant 0 : index
    %30 = vector.load %arg1[%c0_14, %c0_15] : memref<16x4xf32, #tpu.memory_space<vmem>>, vector<16x4xf32>
    %c0_16 = arith.constant 0 : index
    %c0_17 = arith.constant 0 : index
    %31 = vector.load %arg6[%c0_16, %c0_17] : memref<4x48xf32, #tpu.memory_space<vmem>>, vector<4x48xf32>
    %cst_18 = arith.constant dense<0.000000e+00> : vector<16x48xf32>
    %32 = tpu.matmul %30, %31, %cst_18 {dimension_numbers = #tpu.dot_dimension_numbers<[1], [0], [0], [1], [0, 0, 1, 1], [], []>} : vector<16x4xf32>, vector<4x48xf32>, vector<16x48xf32> -> vector<16x48xf32>
    %c0_19 = arith.constant 0 : index
    %c0_20 = arith.constant 0 : index
    %33 = vector.load %arg7[%c0_19, %c0_20] : memref<1x48xf32, #tpu.memory_space<vmem>>, vector<1x48xf32>
    %34 = vector.broadcast %33 : vector<1x48xf32> to vector<16x48xf32>
    %35 = arith.addf %32, %34 : vector<16x48xf32>
    %c0_21 = arith.constant 0 : index
    %c0_22 = arith.constant 0 : index
    %36 = vector.load %arg8[%c0_21, %c0_22] : memref<1x48xf32, #tpu.memory_space<vmem>>, vector<1x48xf32>
    %c0_23 = arith.constant 0 : index
    %c0_24 = arith.constant 0 : index
    %37 = vector.load %arg9[%c0_23, %c0_24] : memref<1x48xf32, #tpu.memory_space<vmem>>, vector<1x48xf32>
    %cst_25 = arith.constant dense<0.000000e+00> : vector<16xf32>
    %38 = vector.multi_reduction <add>, %35, %cst_25 [1] : vector<16x48xf32> to vector<16xf32>
    %39 = vector.shape_cast %38 : vector<16xf32> to vector<16x1xf32>
    %cst_26 = arith.constant 4.800000e+01 : f32
    %40 = vector.broadcast %cst_26 : f32 to vector<16x1xf32>
    %41 = arith.divf %39, %40 : vector<16x1xf32>
    %42 = vector.broadcast %41 : vector<16x1xf32> to vector<16x48xf32>
    %43 = arith.subf %35, %42 : vector<16x48xf32>
    %44 = arith.mulf %43, %43 : vector<16x48xf32>
    %cst_27 = arith.constant dense<0.000000e+00> : vector<16xf32>
    %45 = vector.multi_reduction <add>, %44, %cst_27 [1] : vector<16x48xf32> to vector<16xf32>
    %46 = vector.shape_cast %45 : vector<16xf32> to vector<16x1xf32>
    %cst_28 = arith.constant 4.800000e+01 : f32
    %47 = vector.broadcast %cst_28 : f32 to vector<16x1xf32>
    %48 = arith.divf %46, %47 : vector<16x1xf32>
    %49 = vector.broadcast %41 : vector<16x1xf32> to vector<16x48xf32>
    %50 = arith.subf %35, %49 : vector<16x48xf32>
    %cst_29 = arith.constant 9.99999974E-6 : f32
    %51 = vector.broadcast %cst_29 : f32 to vector<16x1xf32>
    %52 = arith.addf %48, %51 : vector<16x1xf32>
    %53 = math.rsqrt %52 : vector<16x1xf32>
    %54 = vector.broadcast %53 : vector<16x1xf32> to vector<16x48xf32>
    %55 = arith.mulf %50, %54 : vector<16x48xf32>
    %56 = vector.broadcast %36 : vector<1x48xf32> to vector<16x48xf32>
    %57 = arith.mulf %55, %56 : vector<16x48xf32>
    %58 = vector.broadcast %37 : vector<1x48xf32> to vector<16x48xf32>
    %59 = arith.addf %57, %58 : vector<16x48xf32>
    %c0_30 = arith.constant 0 : index
    %c0_31 = arith.constant 0 : index
    %60 = vector.load %arg10[%c0_30, %c0_31] : memref<96x48xf32, #tpu.memory_space<vmem>>, vector<96x48xf32>
    %cst_32 = arith.constant 0.000000e+00 : f32
    %61 = vector.broadcast %cst_32 : f32 to vector<16x48xf32>
    %62 = arith.maximumf %29, %61 : vector<16x48xf32>
    %63 = vector.extract_strided_slice %60 {offsets = [0, 0], sizes = [48, 48], strides = [1, 1]} : vector<96x48xf32> to vector<48x48xf32>
    %cst_33 = arith.constant dense<0.000000e+00> : vector<16x48xf32>
    %64 = tpu.matmul %62, %63, %cst_33 {dimension_numbers = #tpu.dot_dimension_numbers<[1], [0], [0], [1], [0, 0, 1, 1], [], []>} : vector<16x48xf32>, vector<48x48xf32>, vector<16x48xf32> -> vector<16x48xf32>
    %cst_34 = arith.constant 0.000000e+00 : f32
    %65 = vector.broadcast %cst_34 : f32 to vector<16x48xf32>
    %66 = arith.maximumf %59, %65 : vector<16x48xf32>
    %67 = vector.extract_strided_slice %60 {offsets = [48, 0], sizes = [48, 48], strides = [1, 1]} : vector<96x48xf32> to vector<48x48xf32>
    %cst_35 = arith.constant dense<0.000000e+00> : vector<16x48xf32>
    %68 = tpu.matmul %66, %67, %cst_35 {dimension_numbers = #tpu.dot_dimension_numbers<[1], [0], [0], [1], [0, 0, 1, 1], [], []>} : vector<16x48xf32>, vector<48x48xf32>, vector<16x48xf32> -> vector<16x48xf32>
    %69 = arith.addf %64, %68 : vector<16x48xf32>
    %c0_36 = arith.constant 0 : index
    %c0_37 = arith.constant 0 : index
    %70 = vector.load %arg11[%c0_36, %c0_37] : memref<1x48xf32, #tpu.memory_space<vmem>>, vector<1x48xf32>
    %71 = vector.broadcast %70 : vector<1x48xf32> to vector<16x48xf32>
    %72 = arith.addf %69, %71 : vector<16x48xf32>
    %c0_38 = arith.constant 0 : index
    %c0_39 = arith.constant 0 : index
    %73 = vector.load %arg12[%c0_38, %c0_39] : memref<1x48xf32, #tpu.memory_space<vmem>>, vector<1x48xf32>
    %c0_40 = arith.constant 0 : index
    %c0_41 = arith.constant 0 : index
    %74 = vector.load %arg13[%c0_40, %c0_41] : memref<1x48xf32, #tpu.memory_space<vmem>>, vector<1x48xf32>
    %cst_42 = arith.constant dense<0.000000e+00> : vector<16xf32>
    %75 = vector.multi_reduction <add>, %72, %cst_42 [1] : vector<16x48xf32> to vector<16xf32>
    %76 = vector.shape_cast %75 : vector<16xf32> to vector<16x1xf32>
    %cst_43 = arith.constant 4.800000e+01 : f32
    %77 = vector.broadcast %cst_43 : f32 to vector<16x1xf32>
    %78 = arith.divf %76, %77 : vector<16x1xf32>
    %79 = vector.broadcast %78 : vector<16x1xf32> to vector<16x48xf32>
    %80 = arith.subf %72, %79 : vector<16x48xf32>
    %81 = arith.mulf %80, %80 : vector<16x48xf32>
    %cst_44 = arith.constant dense<0.000000e+00> : vector<16xf32>
    %82 = vector.multi_reduction <add>, %81, %cst_44 [1] : vector<16x48xf32> to vector<16xf32>
    %83 = vector.shape_cast %82 : vector<16xf32> to vector<16x1xf32>
    %cst_45 = arith.constant 4.800000e+01 : f32
    %84 = vector.broadcast %cst_45 : f32 to vector<16x1xf32>
    %85 = arith.divf %83, %84 : vector<16x1xf32>
    %86 = vector.broadcast %78 : vector<16x1xf32> to vector<16x48xf32>
    %87 = arith.subf %72, %86 : vector<16x48xf32>
    %cst_46 = arith.constant 9.99999974E-6 : f32
    %88 = vector.broadcast %cst_46 : f32 to vector<16x1xf32>
    %89 = arith.addf %85, %88 : vector<16x1xf32>
    %90 = math.rsqrt %89 : vector<16x1xf32>
    %91 = vector.broadcast %90 : vector<16x1xf32> to vector<16x48xf32>
    %92 = arith.mulf %87, %91 : vector<16x48xf32>
    %93 = vector.broadcast %73 : vector<1x48xf32> to vector<16x48xf32>
    %94 = arith.mulf %92, %93 : vector<16x48xf32>
    %95 = vector.broadcast %74 : vector<1x48xf32> to vector<16x48xf32>
    %96 = arith.addf %94, %95 : vector<16x48xf32>
    %c0_47 = arith.constant 0 : index
    %c0_48 = arith.constant 0 : index
    %c0_49 = arith.constant 0 : index
    %97 = vector.load %arg14[%c0_47, %c0_48, %c0_49] : memref<2x48x192xf32, #tpu.memory_space<vmem>>, vector<1x48x192xf32>
    %98 = vector.shape_cast %97 : vector<1x48x192xf32> to vector<48x192xf32>
    %c1 = arith.constant 1 : index
    %c0_50 = arith.constant 0 : index
    %c0_51 = arith.constant 0 : index
    %99 = vector.load %arg14[%c1, %c0_50, %c0_51] : memref<2x48x192xf32, #tpu.memory_space<vmem>>, vector<1x48x192xf32>
    %100 = vector.shape_cast %99 : vector<1x48x192xf32> to vector<48x192xf32>
    %c0_52 = arith.constant 0 : index
    %c0_53 = arith.constant 0 : index
    %c0_54 = arith.constant 0 : index
    %101 = vector.load %arg15[%c0_52, %c0_53, %c0_54] : memref<2x48x192xf32, #tpu.memory_space<vmem>>, vector<1x48x192xf32>
    %102 = vector.shape_cast %101 : vector<1x48x192xf32> to vector<48x192xf32>
    %c1_55 = arith.constant 1 : index
    %c0_56 = arith.constant 0 : index
    %c0_57 = arith.constant 0 : index
    %103 = vector.load %arg15[%c1_55, %c0_56, %c0_57] : memref<2x48x192xf32, #tpu.memory_space<vmem>>, vector<1x48x192xf32>
    %104 = vector.shape_cast %103 : vector<1x48x192xf32> to vector<48x192xf32>
    %c0_58 = arith.constant 0 : index
    %c0_59 = arith.constant 0 : index
    %c0_60 = arith.constant 0 : index
    %105 = vector.load %arg16[%c0_58, %c0_59, %c0_60] : memref<2x1x192xf32, #tpu.memory_space<vmem>>, vector<1x1x192xf32>
    %106 = vector.shape_cast %105 : vector<1x1x192xf32> to vector<1x192xf32>
    %c1_61 = arith.constant 1 : index
    %c0_62 = arith.constant 0 : index
    %c0_63 = arith.constant 0 : index
    %107 = vector.load %arg16[%c1_61, %c0_62, %c0_63] : memref<2x1x192xf32, #tpu.memory_space<vmem>>, vector<1x1x192xf32>
    %108 = vector.shape_cast %107 : vector<1x1x192xf32> to vector<1x192xf32>
    %cst_64 = arith.constant dense<0.000000e+00> : vector<16x192xf32>
    %109 = tpu.matmul %96, %98, %cst_64 {dimension_numbers = #tpu.dot_dimension_numbers<[1], [0], [0], [1], [0, 0, 1, 1], [], []>} : vector<16x48xf32>, vector<48x192xf32>, vector<16x192xf32> -> vector<16x192xf32>
    %110 = vector.broadcast %106 : vector<1x192xf32> to vector<16x192xf32>
    %111 = arith.addf %109, %110 : vector<16x192xf32>
    %cst_65 = arith.constant 0.000000e+00 : f32
    %112 = vector.broadcast %cst_65 : f32 to vector<2x48xf32>
    %cst_66 = arith.constant 0.000000e+00 : f32
    %113 = vector.broadcast %cst_66 : f32 to vector<2x48xf32>
    %cst_67 = arith.constant 0.000000e+00 : f32
    %114 = vector.broadcast %cst_67 : f32 to vector<2x48xf32>
    %cst_68 = arith.constant 0.000000e+00 : f32
    %115 = vector.broadcast %cst_68 : f32 to vector<2x48xf32>
    %c0_69 = arith.constant 0 : index
    %c0_70 = arith.constant 0 : index
    %116 = vector.load %arg17[%c0_69, %c0_70] : memref<1x48xf32, #tpu.memory_space<vmem>>, vector<1x48xf32>
    %c0_71 = arith.constant 0 : index
    %c0_72 = arith.constant 0 : index
    %117 = vector.load %arg18[%c0_71, %c0_72] : memref<1x1xf32, #tpu.memory_space<vmem>>, vector<1x1xf32>
    %118 = vector.extract_strided_slice %111 {offsets = [0, 0], sizes = [2, 192], strides = [1, 1]} : vector<16x192xf32> to vector<2x192xf32>
    %cst_73 = arith.constant dense<0.000000e+00> : vector<2x192xf32>
    %119 = tpu.matmul %112, %102, %cst_73 {dimension_numbers = #tpu.dot_dimension_numbers<[1], [0], [0], [1], [0, 0, 1, 1], [], []>} : vector<2x48xf32>, vector<48x192xf32>, vector<2x192xf32> -> vector<2x192xf32>
    %120 = arith.addf %118, %119 : vector<2x192xf32>
    %121 = vector.extract_strided_slice %120 {offsets = [0, 0], sizes = [2, 48], strides = [1, 1]} : vector<2x192xf32> to vector<2x48xf32>
    %122 = arith.negf %121 : vector<2x48xf32>
    %123 = math.exp %122 : vector<2x48xf32>
    %cst_74 = arith.constant 1.000000e+00 : f32
    %124 = vector.broadcast %cst_74 : f32 to vector<2x48xf32>
    %125 = arith.addf %124, %123 : vector<2x48xf32>
    %126 = arith.divf %124, %125 : vector<2x48xf32>
    %127 = vector.extract_strided_slice %120 {offsets = [0, 48], sizes = [2, 48], strides = [1, 1]} : vector<2x192xf32> to vector<2x48xf32>
    %128 = arith.negf %127 : vector<2x48xf32>
    %129 = math.exp %128 : vector<2x48xf32>
    %cst_75 = arith.constant 1.000000e+00 : f32
    %130 = vector.broadcast %cst_75 : f32 to vector<2x48xf32>
    %131 = arith.addf %130, %129 : vector<2x48xf32>
    %132 = arith.divf %130, %131 : vector<2x48xf32>
    %133 = vector.extract_strided_slice %120 {offsets = [0, 96], sizes = [2, 48], strides = [1, 1]} : vector<2x192xf32> to vector<2x48xf32>
    %134 = math.tanh %133 : vector<2x48xf32>
    %135 = vector.extract_strided_slice %120 {offsets = [0, 144], sizes = [2, 48], strides = [1, 1]} : vector<2x192xf32> to vector<2x48xf32>
    %136 = arith.negf %135 : vector<2x48xf32>
    %137 = math.exp %136 : vector<2x48xf32>
    %cst_76 = arith.constant 1.000000e+00 : f32
    %138 = vector.broadcast %cst_76 : f32 to vector<2x48xf32>
    %139 = arith.addf %138, %137 : vector<2x48xf32>
    %140 = arith.divf %138, %139 : vector<2x48xf32>
    %141 = arith.mulf %132, %114 : vector<2x48xf32>
    %142 = arith.mulf %126, %134 : vector<2x48xf32>
    %143 = arith.addf %141, %142 : vector<2x48xf32>
    %144 = math.tanh %143 : vector<2x48xf32>
    %145 = arith.mulf %140, %144 : vector<2x48xf32>
    %cst_77 = arith.constant dense<0.000000e+00> : vector<2x192xf32>
    %146 = tpu.matmul %145, %100, %cst_77 {dimension_numbers = #tpu.dot_dimension_numbers<[1], [0], [0], [1], [0, 0, 1, 1], [], []>} : vector<2x48xf32>, vector<48x192xf32>, vector<2x192xf32> -> vector<2x192xf32>
    %cst_78 = arith.constant dense<0.000000e+00> : vector<2x192xf32>
    %147 = tpu.matmul %113, %104, %cst_78 {dimension_numbers = #tpu.dot_dimension_numbers<[1], [0], [0], [1], [0, 0, 1, 1], [], []>} : vector<2x48xf32>, vector<48x192xf32>, vector<2x192xf32> -> vector<2x192xf32>
    %148 = arith.addf %146, %147 : vector<2x192xf32>
    %149 = vector.broadcast %108 : vector<1x192xf32> to vector<2x192xf32>
    %150 = arith.addf %148, %149 : vector<2x192xf32>
    %151 = vector.extract_strided_slice %150 {offsets = [0, 0], sizes = [2, 48], strides = [1, 1]} : vector<2x192xf32> to vector<2x48xf32>
    %152 = arith.negf %151 : vector<2x48xf32>
    %153 = math.exp %152 : vector<2x48xf32>
    %cst_79 = arith.constant 1.000000e+00 : f32
    %154 = vector.broadcast %cst_79 : f32 to vector<2x48xf32>
    %155 = arith.addf %154, %153 : vector<2x48xf32>
    %156 = arith.divf %154, %155 : vector<2x48xf32>
    %157 = vector.extract_strided_slice %150 {offsets = [0, 48], sizes = [2, 48], strides = [1, 1]} : vector<2x192xf32> to vector<2x48xf32>
    %158 = arith.negf %157 : vector<2x48xf32>
    %159 = math.exp %158 : vector<2x48xf32>
    %cst_80 = arith.constant 1.000000e+00 : f32
    %160 = vector.broadcast %cst_80 : f32 to vector<2x48xf32>
    %161 = arith.addf %160, %159 : vector<2x48xf32>
    %162 = arith.divf %160, %161 : vector<2x48xf32>
    %163 = vector.extract_strided_slice %150 {offsets = [0, 96], sizes = [2, 48], strides = [1, 1]} : vector<2x192xf32> to vector<2x48xf32>
    %164 = math.tanh %163 : vector<2x48xf32>
    %165 = vector.extract_strided_slice %150 {offsets = [0, 144], sizes = [2, 48], strides = [1, 1]} : vector<2x192xf32> to vector<2x48xf32>
    %166 = arith.negf %165 : vector<2x48xf32>
    %167 = math.exp %166 : vector<2x48xf32>
    %cst_81 = arith.constant 1.000000e+00 : f32
    %168 = vector.broadcast %cst_81 : f32 to vector<2x48xf32>
    %169 = arith.addf %168, %167 : vector<2x48xf32>
    %170 = arith.divf %168, %169 : vector<2x48xf32>
    %171 = arith.mulf %162, %115 : vector<2x48xf32>
    %172 = arith.mulf %156, %164 : vector<2x48xf32>
    %173 = arith.addf %171, %172 : vector<2x48xf32>
    %174 = math.tanh %173 : vector<2x48xf32>
    %175 = arith.mulf %170, %174 : vector<2x48xf32>
    %176 = vector.broadcast %116 : vector<1x48xf32> to vector<2x48xf32>
    %177 = arith.mulf %175, %176 : vector<2x48xf32>
    %cst_82 = arith.constant dense<0.000000e+00> : vector<2xf32>
    %178 = vector.multi_reduction <add>, %177, %cst_82 [1] : vector<2x48xf32> to vector<2xf32>
    %179 = vector.shape_cast %178 : vector<2xf32> to vector<2x1xf32>
    %180 = vector.broadcast %117 : vector<1x1xf32> to vector<2x1xf32>
    %181 = arith.addf %179, %180 : vector<2x1xf32>
    %182 = arith.negf %181 : vector<2x1xf32>
    %183 = math.exp %182 : vector<2x1xf32>
    %cst_83 = arith.constant 1.000000e+00 : f32
    %184 = vector.broadcast %cst_83 : f32 to vector<2x1xf32>
    %185 = arith.addf %184, %183 : vector<2x1xf32>
    %186 = arith.divf %184, %185 : vector<2x1xf32>
    %c0_84 = arith.constant 0 : index
    %c0_85 = arith.constant 0 : index
    %187 = vector.load %arg19[%c0_84, %c0_85] : memref<2x8xf32, #tpu.memory_space<vmem>>, vector<2x1xf32>
    tpu.vector_store %arg19[%c0_84, %c0_85], %186 {strides = array<i32>} : memref<2x8xf32, #tpu.memory_space<vmem>>, vector<2x1xf32>,
    %188 = vector.extract_strided_slice %111 {offsets = [2, 0], sizes = [2, 192], strides = [1, 1]} : vector<16x192xf32> to vector<2x192xf32>
    %cst_86 = arith.constant dense<0.000000e+00> : vector<2x192xf32>
    %189 = tpu.matmul %145, %102, %cst_86 {dimension_numbers = #tpu.dot_dimension_numbers<[1], [0], [0], [1], [0, 0, 1, 1], [], []>} : vector<2x48xf32>, vector<48x192xf32>, vector<2x192xf32> -> vector<2x192xf32>
    %190 = arith.addf %188, %189 : vector<2x192xf32>
    %191 = vector.extract_strided_slice %190 {offsets = [0, 0], sizes = [2, 48], strides = [1, 1]} : vector<2x192xf32> to vector<2x48xf32>
    %192 = arith.negf %191 : vector<2x48xf32>
    %193 = math.exp %192 : vector<2x48xf32>
    %cst_87 = arith.constant 1.000000e+00 : f32
    %194 = vector.broadcast %cst_87 : f32 to vector<2x48xf32>
    %195 = arith.addf %194, %193 : vector<2x48xf32>
    %196 = arith.divf %194, %195 : vector<2x48xf32>
    %197 = vector.extract_strided_slice %190 {offsets = [0, 48], sizes = [2, 48], strides = [1, 1]} : vector<2x192xf32> to vector<2x48xf32>
    %198 = arith.negf %197 : vector<2x48xf32>
    %199 = math.exp %198 : vector<2x48xf32>
    %cst_88 = arith.constant 1.000000e+00 : f32
    %200 = vector.broadcast %cst_88 : f32 to vector<2x48xf32>
    %201 = arith.addf %200, %199 : vector<2x48xf32>
    %202 = arith.divf %200, %201 : vector<2x48xf32>
    %203 = vector.extract_strided_slice %190 {offsets = [0, 96], sizes = [2, 48], strides = [1, 1]} : vector<2x192xf32> to vector<2x48xf32>
    %204 = math.tanh %203 : vector<2x48xf32>
    %205 = vector.extract_strided_slice %190 {offsets = [0, 144], sizes = [2, 48], strides = [1, 1]} : vector<2x192xf32> to vector<2x48xf32>
    %206 = arith.negf %205 : vector<2x48xf32>
    %207 = math.exp %206 : vector<2x48xf32>
    %cst_89 = arith.constant 1.000000e+00 : f32
    %208 = vector.broadcast %cst_89 : f32 to vector<2x48xf32>
    %209 = arith.addf %208, %207 : vector<2x48xf32>
    %210 = arith.divf %208, %209 : vector<2x48xf32>
    %211 = arith.mulf %202, %143 : vector<2x48xf32>
    %212 = arith.mulf %196, %204 : vector<2x48xf32>
    %213 = arith.addf %211, %212 : vector<2x48xf32>
    %214 = math.tanh %213 : vector<2x48xf32>
    %215 = arith.mulf %210, %214 : vector<2x48xf32>
    %cst_90 = arith.constant dense<0.000000e+00> : vector<2x192xf32>
    %216 = tpu.matmul %215, %100, %cst_90 {dimension_numbers = #tpu.dot_dimension_numbers<[1], [0], [0], [1], [0, 0, 1, 1], [], []>} : vector<2x48xf32>, vector<48x192xf32>, vector<2x192xf32> -> vector<2x192xf32>
    %cst_91 = arith.constant dense<0.000000e+00> : vector<2x192xf32>
    %217 = tpu.matmul %175, %104, %cst_91 {dimension_numbers = #tpu.dot_dimension_numbers<[1], [0], [0], [1], [0, 0, 1, 1], [], []>} : vector<2x48xf32>, vector<48x192xf32>, vector<2x192xf32> -> vector<2x192xf32>
    %218 = arith.addf %216, %217 : vector<2x192xf32>
    %219 = vector.broadcast %108 : vector<1x192xf32> to vector<2x192xf32>
    %220 = arith.addf %218, %219 : vector<2x192xf32>
    %221 = vector.extract_strided_slice %220 {offsets = [0, 0], sizes = [2, 48], strides = [1, 1]} : vector<2x192xf32> to vector<2x48xf32>
    %222 = arith.negf %221 : vector<2x48xf32>
    %223 = math.exp %222 : vector<2x48xf32>
    %cst_92 = arith.constant 1.000000e+00 : f32
    %224 = vector.broadcast %cst_92 : f32 to vector<2x48xf32>
    %225 = arith.addf %224, %223 : vector<2x48xf32>
    %226 = arith.divf %224, %225 : vector<2x48xf32>
    %227 = vector.extract_strided_slice %220 {offsets = [0, 48], sizes = [2, 48], strides = [1, 1]} : vector<2x192xf32> to vector<2x48xf32>
    %228 = arith.negf %227 : vector<2x48xf32>
    %229 = math.exp %228 : vector<2x48xf32>
    %cst_93 = arith.constant 1.000000e+00 : f32
    %230 = vector.broadcast %cst_93 : f32 to vector<2x48xf32>
    %231 = arith.addf %230, %229 : vector<2x48xf32>
    %232 = arith.divf %230, %231 : vector<2x48xf32>
    %233 = vector.extract_strided_slice %220 {offsets = [0, 96], sizes = [2, 48], strides = [1, 1]} : vector<2x192xf32> to vector<2x48xf32>
    %234 = math.tanh %233 : vector<2x48xf32>
    %235 = vector.extract_strided_slice %220 {offsets = [0, 144], sizes = [2, 48], strides = [1, 1]} : vector<2x192xf32> to vector<2x48xf32>
    %236 = arith.negf %235 : vector<2x48xf32>
    %237 = math.exp %236 : vector<2x48xf32>
    %cst_94 = arith.constant 1.000000e+00 : f32
    %238 = vector.broadcast %cst_94 : f32 to vector<2x48xf32>
    %239 = arith.addf %238, %237 : vector<2x48xf32>
    %240 = arith.divf %238, %239 : vector<2x48xf32>
    %241 = arith.mulf %232, %173 : vector<2x48xf32>
    %242 = arith.mulf %226, %234 : vector<2x48xf32>
    %243 = arith.addf %241, %242 : vector<2x48xf32>
    %244 = math.tanh %243 : vector<2x48xf32>
    %245 = arith.mulf %240, %244 : vector<2x48xf32>
    %246 = vector.broadcast %116 : vector<1x48xf32> to vector<2x48xf32>
    %247 = arith.mulf %245, %246 : vector<2x48xf32>
    %cst_95 = arith.constant dense<0.000000e+00> : vector<2xf32>
    %248 = vector.multi_reduction <add>, %247, %cst_95 [1] : vector<2x48xf32> to vector<2xf32>
    %249 = vector.shape_cast %248 : vector<2xf32> to vector<2x1xf32>
    %250 = vector.broadcast %117 : vector<1x1xf32> to vector<2x1xf32>
    %251 = arith.addf %249, %250 : vector<2x1xf32>
    %252 = arith.negf %251 : vector<2x1xf32>
    %253 = math.exp %252 : vector<2x1xf32>
    %cst_96 = arith.constant 1.000000e+00 : f32
    %254 = vector.broadcast %cst_96 : f32 to vector<2x1xf32>
    %255 = arith.addf %254, %253 : vector<2x1xf32>
    %256 = arith.divf %254, %255 : vector<2x1xf32>
    %c0_97 = arith.constant 0 : index
    %c1_98 = arith.constant 1 : index
    %257 = vector.load %arg19[%c0_97, %c1_98] : memref<2x8xf32, #tpu.memory_space<vmem>>, vector<2x1xf32>
    tpu.vector_store %arg19[%c0_97, %c1_98], %256 {strides = array<i32>} : memref<2x8xf32, #tpu.memory_space<vmem>>, vector<2x1xf32>,
    %258 = vector.extract_strided_slice %111 {offsets = [4, 0], sizes = [2, 192], strides = [1, 1]} : vector<16x192xf32> to vector<2x192xf32>
    %cst_99 = arith.constant dense<0.000000e+00> : vector<2x192xf32>
    %259 = tpu.matmul %215, %102, %cst_99 {dimension_numbers = #tpu.dot_dimension_numbers<[1], [0], [0], [1], [0, 0, 1, 1], [], []>} : vector<2x48xf32>, vector<48x192xf32>, vector<2x192xf32> -> vector<2x192xf32>
    %260 = arith.addf %258, %259 : vector<2x192xf32>
    %261 = vector.extract_strided_slice %260 {offsets = [0, 0], sizes = [2, 48], strides = [1, 1]} : vector<2x192xf32> to vector<2x48xf32>
    %262 = arith.negf %261 : vector<2x48xf32>
    %263 = math.exp %262 : vector<2x48xf32>
    %cst_100 = arith.constant 1.000000e+00 : f32
    %264 = vector.broadcast %cst_100 : f32 to vector<2x48xf32>
    %265 = arith.addf %264, %263 : vector<2x48xf32>
    %266 = arith.divf %264, %265 : vector<2x48xf32>
    %267 = vector.extract_strided_slice %260 {offsets = [0, 48], sizes = [2, 48], strides = [1, 1]} : vector<2x192xf32> to vector<2x48xf32>
    %268 = arith.negf %267 : vector<2x48xf32>
    %269 = math.exp %268 : vector<2x48xf32>
    %cst_101 = arith.constant 1.000000e+00 : f32
    %270 = vector.broadcast %cst_101 : f32 to vector<2x48xf32>
    %271 = arith.addf %270, %269 : vector<2x48xf32>
    %272 = arith.divf %270, %271 : vector<2x48xf32>
    %273 = vector.extract_strided_slice %260 {offsets = [0, 96], sizes = [2, 48], strides = [1, 1]} : vector<2x192xf32> to vector<2x48xf32>
    %274 = math.tanh %273 : vector<2x48xf32>
    %275 = vector.extract_strided_slice %260 {offsets = [0, 144], sizes = [2, 48], strides = [1, 1]} : vector<2x192xf32> to vector<2x48xf32>
    %276 = arith.negf %275 : vector<2x48xf32>
    %277 = math.exp %276 : vector<2x48xf32>
    %cst_102 = arith.constant 1.000000e+00 : f32
    %278 = vector.broadcast %cst_102 : f32 to vector<2x48xf32>
    %279 = arith.addf %278, %277 : vector<2x48xf32>
    %280 = arith.divf %278, %279 : vector<2x48xf32>
    %281 = arith.mulf %272, %213 : vector<2x48xf32>
    %282 = arith.mulf %266, %274 : vector<2x48xf32>
    %283 = arith.addf %281, %282 : vector<2x48xf32>
    %284 = math.tanh %283 : vector<2x48xf32>
    %285 = arith.mulf %280, %284 : vector<2x48xf32>
    %cst_103 = arith.constant dense<0.000000e+00> : vector<2x192xf32>
    %286 = tpu.matmul %285, %100, %cst_103 {dimension_numbers = #tpu.dot_dimension_numbers<[1], [0], [0], [1], [0, 0, 1, 1], [], []>} : vector<2x48xf32>, vector<48x192xf32>, vector<2x192xf32> -> vector<2x192xf32>
    %cst_104 = arith.constant dense<0.000000e+00> : vector<2x192xf32>
    %287 = tpu.matmul %245, %104, %cst_104 {dimension_numbers = #tpu.dot_dimension_numbers<[1], [0], [0], [1], [0, 0, 1, 1], [], []>} : vector<2x48xf32>, vector<48x192xf32>, vector<2x192xf32> -> vector<2x192xf32>
    %288 = arith.addf %286, %287 : vector<2x192xf32>
    %289 = vector.broadcast %108 : vector<1x192xf32> to vector<2x192xf32>
    %290 = arith.addf %288, %289 : vector<2x192xf32>
    %291 = vector.extract_strided_slice %290 {offsets = [0, 0], sizes = [2, 48], strides = [1, 1]} : vector<2x192xf32> to vector<2x48xf32>
    %292 = arith.negf %291 : vector<2x48xf32>
    %293 = math.exp %292 : vector<2x48xf32>
    %cst_105 = arith.constant 1.000000e+00 : f32
    %294 = vector.broadcast %cst_105 : f32 to vector<2x48xf32>
    %295 = arith.addf %294, %293 : vector<2x48xf32>
    %296 = arith.divf %294, %295 : vector<2x48xf32>
    %297 = vector.extract_strided_slice %290 {offsets = [0, 48], sizes = [2, 48], strides = [1, 1]} : vector<2x192xf32> to vector<2x48xf32>
    %298 = arith.negf %297 : vector<2x48xf32>
    %299 = math.exp %298 : vector<2x48xf32>
    %cst_106 = arith.constant 1.000000e+00 : f32
    %300 = vector.broadcast %cst_106 : f32 to vector<2x48xf32>
    %301 = arith.addf %300, %299 : vector<2x48xf32>
    %302 = arith.divf %300, %301 : vector<2x48xf32>
    %303 = vector.extract_strided_slice %290 {offsets = [0, 96], sizes = [2, 48], strides = [1, 1]} : vector<2x192xf32> to vector<2x48xf32>
    %304 = math.tanh %303 : vector<2x48xf32>
    %305 = vector.extract_strided_slice %290 {offsets = [0, 144], sizes = [2, 48], strides = [1, 1]} : vector<2x192xf32> to vector<2x48xf32>
    %306 = arith.negf %305 : vector<2x48xf32>
    %307 = math.exp %306 : vector<2x48xf32>
    %cst_107 = arith.constant 1.000000e+00 : f32
    %308 = vector.broadcast %cst_107 : f32 to vector<2x48xf32>
    %309 = arith.addf %308, %307 : vector<2x48xf32>
    %310 = arith.divf %308, %309 : vector<2x48xf32>
    %311 = arith.mulf %302, %243 : vector<2x48xf32>
    %312 = arith.mulf %296, %304 : vector<2x48xf32>
    %313 = arith.addf %311, %312 : vector<2x48xf32>
    %314 = math.tanh %313 : vector<2x48xf32>
    %315 = arith.mulf %310, %314 : vector<2x48xf32>
    %316 = vector.broadcast %116 : vector<1x48xf32> to vector<2x48xf32>
    %317 = arith.mulf %315, %316 : vector<2x48xf32>
    %cst_108 = arith.constant dense<0.000000e+00> : vector<2xf32>
    %318 = vector.multi_reduction <add>, %317, %cst_108 [1] : vector<2x48xf32> to vector<2xf32>
    %319 = vector.shape_cast %318 : vector<2xf32> to vector<2x1xf32>
    %320 = vector.broadcast %117 : vector<1x1xf32> to vector<2x1xf32>
    %321 = arith.addf %319, %320 : vector<2x1xf32>
    %322 = arith.negf %321 : vector<2x1xf32>
    %323 = math.exp %322 : vector<2x1xf32>
    %cst_109 = arith.constant 1.000000e+00 : f32
    %324 = vector.broadcast %cst_109 : f32 to vector<2x1xf32>
    %325 = arith.addf %324, %323 : vector<2x1xf32>
    %326 = arith.divf %324, %325 : vector<2x1xf32>
    %c0_110 = arith.constant 0 : index
    %c2 = arith.constant 2 : index
    %327 = vector.load %arg19[%c0_110, %c2] : memref<2x8xf32, #tpu.memory_space<vmem>>, vector<2x1xf32>
    tpu.vector_store %arg19[%c0_110, %c2], %326 {strides = array<i32>} : memref<2x8xf32, #tpu.memory_space<vmem>>, vector<2x1xf32>,
    %328 = vector.extract_strided_slice %111 {offsets = [6, 0], sizes = [2, 192], strides = [1, 1]} : vector<16x192xf32> to vector<2x192xf32>
    %cst_111 = arith.constant dense<0.000000e+00> : vector<2x192xf32>
    %329 = tpu.matmul %285, %102, %cst_111 {dimension_numbers = #tpu.dot_dimension_numbers<[1], [0], [0], [1], [0, 0, 1, 1], [], []>} : vector<2x48xf32>, vector<48x192xf32>, vector<2x192xf32> -> vector<2x192xf32>
    %330 = arith.addf %328, %329 : vector<2x192xf32>
    %331 = vector.extract_strided_slice %330 {offsets = [0, 0], sizes = [2, 48], strides = [1, 1]} : vector<2x192xf32> to vector<2x48xf32>
    %332 = arith.negf %331 : vector<2x48xf32>
    %333 = math.exp %332 : vector<2x48xf32>
    %cst_112 = arith.constant 1.000000e+00 : f32
    %334 = vector.broadcast %cst_112 : f32 to vector<2x48xf32>
    %335 = arith.addf %334, %333 : vector<2x48xf32>
    %336 = arith.divf %334, %335 : vector<2x48xf32>
    %337 = vector.extract_strided_slice %330 {offsets = [0, 48], sizes = [2, 48], strides = [1, 1]} : vector<2x192xf32> to vector<2x48xf32>
    %338 = arith.negf %337 : vector<2x48xf32>
    %339 = math.exp %338 : vector<2x48xf32>
    %cst_113 = arith.constant 1.000000e+00 : f32
    %340 = vector.broadcast %cst_113 : f32 to vector<2x48xf32>
    %341 = arith.addf %340, %339 : vector<2x48xf32>
    %342 = arith.divf %340, %341 : vector<2x48xf32>
    %343 = vector.extract_strided_slice %330 {offsets = [0, 96], sizes = [2, 48], strides = [1, 1]} : vector<2x192xf32> to vector<2x48xf32>
    %344 = math.tanh %343 : vector<2x48xf32>
    %345 = vector.extract_strided_slice %330 {offsets = [0, 144], sizes = [2, 48], strides = [1, 1]} : vector<2x192xf32> to vector<2x48xf32>
    %346 = arith.negf %345 : vector<2x48xf32>
    %347 = math.exp %346 : vector<2x48xf32>
    %cst_114 = arith.constant 1.000000e+00 : f32
    %348 = vector.broadcast %cst_114 : f32 to vector<2x48xf32>
    %349 = arith.addf %348, %347 : vector<2x48xf32>
    %350 = arith.divf %348, %349 : vector<2x48xf32>
    %351 = arith.mulf %342, %283 : vector<2x48xf32>
    %352 = arith.mulf %336, %344 : vector<2x48xf32>
    %353 = arith.addf %351, %352 : vector<2x48xf32>
    %354 = math.tanh %353 : vector<2x48xf32>
    %355 = arith.mulf %350, %354 : vector<2x48xf32>
    %cst_115 = arith.constant dense<0.000000e+00> : vector<2x192xf32>
    %356 = tpu.matmul %355, %100, %cst_115 {dimension_numbers = #tpu.dot_dimension_numbers<[1], [0], [0], [1], [0, 0, 1, 1], [], []>} : vector<2x48xf32>, vector<48x192xf32>, vector<2x192xf32> -> vector<2x192xf32>
    %cst_116 = arith.constant dense<0.000000e+00> : vector<2x192xf32>
    %357 = tpu.matmul %315, %104, %cst_116 {dimension_numbers = #tpu.dot_dimension_numbers<[1], [0], [0], [1], [0, 0, 1, 1], [], []>} : vector<2x48xf32>, vector<48x192xf32>, vector<2x192xf32> -> vector<2x192xf32>
    %358 = arith.addf %356, %357 : vector<2x192xf32>
    %359 = vector.broadcast %108 : vector<1x192xf32> to vector<2x192xf32>
    %360 = arith.addf %358, %359 : vector<2x192xf32>
    %361 = vector.extract_strided_slice %360 {offsets = [0, 0], sizes = [2, 48], strides = [1, 1]} : vector<2x192xf32> to vector<2x48xf32>
    %362 = arith.negf %361 : vector<2x48xf32>
    %363 = math.exp %362 : vector<2x48xf32>
    %cst_117 = arith.constant 1.000000e+00 : f32
    %364 = vector.broadcast %cst_117 : f32 to vector<2x48xf32>
    %365 = arith.addf %364, %363 : vector<2x48xf32>
    %366 = arith.divf %364, %365 : vector<2x48xf32>
    %367 = vector.extract_strided_slice %360 {offsets = [0, 48], sizes = [2, 48], strides = [1, 1]} : vector<2x192xf32> to vector<2x48xf32>
    %368 = arith.negf %367 : vector<2x48xf32>
    %369 = math.exp %368 : vector<2x48xf32>
    %cst_118 = arith.constant 1.000000e+00 : f32
    %370 = vector.broadcast %cst_118 : f32 to vector<2x48xf32>
    %371 = arith.addf %370, %369 : vector<2x48xf32>
    %372 = arith.divf %370, %371 : vector<2x48xf32>
    %373 = vector.extract_strided_slice %360 {offsets = [0, 96], sizes = [2, 48], strides = [1, 1]} : vector<2x192xf32> to vector<2x48xf32>
    %374 = math.tanh %373 : vector<2x48xf32>
    %375 = vector.extract_strided_slice %360 {offsets = [0, 144], sizes = [2, 48], strides = [1, 1]} : vector<2x192xf32> to vector<2x48xf32>
    %376 = arith.negf %375 : vector<2x48xf32>
    %377 = math.exp %376 : vector<2x48xf32>
    %cst_119 = arith.constant 1.000000e+00 : f32
    %378 = vector.broadcast %cst_119 : f32 to vector<2x48xf32>
    %379 = arith.addf %378, %377 : vector<2x48xf32>
    %380 = arith.divf %378, %379 : vector<2x48xf32>
    %381 = arith.mulf %372, %313 : vector<2x48xf32>
    %382 = arith.mulf %366, %374 : vector<2x48xf32>
    %383 = arith.addf %381, %382 : vector<2x48xf32>
    %384 = math.tanh %383 : vector<2x48xf32>
    %385 = arith.mulf %380, %384 : vector<2x48xf32>
    %386 = vector.broadcast %116 : vector<1x48xf32> to vector<2x48xf32>
    %387 = arith.mulf %385, %386 : vector<2x48xf32>
    %cst_120 = arith.constant dense<0.000000e+00> : vector<2xf32>
    %388 = vector.multi_reduction <add>, %387, %cst_120 [1] : vector<2x48xf32> to vector<2xf32>
    %389 = vector.shape_cast %388 : vector<2xf32> to vector<2x1xf32>
    %390 = vector.broadcast %117 : vector<1x1xf32> to vector<2x1xf32>
    %391 = arith.addf %389, %390 : vector<2x1xf32>
    %392 = arith.negf %391 : vector<2x1xf32>
    %393 = math.exp %392 : vector<2x1xf32>
    %cst_121 = arith.constant 1.000000e+00 : f32
    %394 = vector.broadcast %cst_121 : f32 to vector<2x1xf32>
    %395 = arith.addf %394, %393 : vector<2x1xf32>
    %396 = arith.divf %394, %395 : vector<2x1xf32>
    %c0_122 = arith.constant 0 : index
    %c3 = arith.constant 3 : index
    %397 = vector.load %arg19[%c0_122, %c3] : memref<2x8xf32, #tpu.memory_space<vmem>>, vector<2x1xf32>
    tpu.vector_store %arg19[%c0_122, %c3], %396 {strides = array<i32>} : memref<2x8xf32, #tpu.memory_space<vmem>>, vector<2x1xf32>,
    %398 = vector.extract_strided_slice %111 {offsets = [8, 0], sizes = [2, 192], strides = [1, 1]} : vector<16x192xf32> to vector<2x192xf32>
    %cst_123 = arith.constant dense<0.000000e+00> : vector<2x192xf32>
    %399 = tpu.matmul %355, %102, %cst_123 {dimension_numbers = #tpu.dot_dimension_numbers<[1], [0], [0], [1], [0, 0, 1, 1], [], []>} : vector<2x48xf32>, vector<48x192xf32>, vector<2x192xf32> -> vector<2x192xf32>
    %400 = arith.addf %398, %399 : vector<2x192xf32>
    %401 = vector.extract_strided_slice %400 {offsets = [0, 0], sizes = [2, 48], strides = [1, 1]} : vector<2x192xf32> to vector<2x48xf32>
    %402 = arith.negf %401 : vector<2x48xf32>
    %403 = math.exp %402 : vector<2x48xf32>
    %cst_124 = arith.constant 1.000000e+00 : f32
    %404 = vector.broadcast %cst_124 : f32 to vector<2x48xf32>
    %405 = arith.addf %404, %403 : vector<2x48xf32>
    %406 = arith.divf %404, %405 : vector<2x48xf32>
    %407 = vector.extract_strided_slice %400 {offsets = [0, 48], sizes = [2, 48], strides = [1, 1]} : vector<2x192xf32> to vector<2x48xf32>
    %408 = arith.negf %407 : vector<2x48xf32>
    %409 = math.exp %408 : vector<2x48xf32>
    %cst_125 = arith.constant 1.000000e+00 : f32
    %410 = vector.broadcast %cst_125 : f32 to vector<2x48xf32>
    %411 = arith.addf %410, %409 : vector<2x48xf32>
    %412 = arith.divf %410, %411 : vector<2x48xf32>
    %413 = vector.extract_strided_slice %400 {offsets = [0, 96], sizes = [2, 48], strides = [1, 1]} : vector<2x192xf32> to vector<2x48xf32>
    %414 = math.tanh %413 : vector<2x48xf32>
    %415 = vector.extract_strided_slice %400 {offsets = [0, 144], sizes = [2, 48], strides = [1, 1]} : vector<2x192xf32> to vector<2x48xf32>
    %416 = arith.negf %415 : vector<2x48xf32>
    %417 = math.exp %416 : vector<2x48xf32>
    %cst_126 = arith.constant 1.000000e+00 : f32
    %418 = vector.broadcast %cst_126 : f32 to vector<2x48xf32>
    %419 = arith.addf %418, %417 : vector<2x48xf32>
    %420 = arith.divf %418, %419 : vector<2x48xf32>
    %421 = arith.mulf %412, %353 : vector<2x48xf32>
    %422 = arith.mulf %406, %414 : vector<2x48xf32>
    %423 = arith.addf %421, %422 : vector<2x48xf32>
    %424 = math.tanh %423 : vector<2x48xf32>
    %425 = arith.mulf %420, %424 : vector<2x48xf32>
    %cst_127 = arith.constant dense<0.000000e+00> : vector<2x192xf32>
    %426 = tpu.matmul %425, %100, %cst_127 {dimension_numbers = #tpu.dot_dimension_numbers<[1], [0], [0], [1], [0, 0, 1, 1], [], []>} : vector<2x48xf32>, vector<48x192xf32>, vector<2x192xf32> -> vector<2x192xf32>
    %cst_128 = arith.constant dense<0.000000e+00> : vector<2x192xf32>
    %427 = tpu.matmul %385, %104, %cst_128 {dimension_numbers = #tpu.dot_dimension_numbers<[1], [0], [0], [1], [0, 0, 1, 1], [], []>} : vector<2x48xf32>, vector<48x192xf32>, vector<2x192xf32> -> vector<2x192xf32>
    %428 = arith.addf %426, %427 : vector<2x192xf32>
    %429 = vector.broadcast %108 : vector<1x192xf32> to vector<2x192xf32>
    %430 = arith.addf %428, %429 : vector<2x192xf32>
    %431 = vector.extract_strided_slice %430 {offsets = [0, 0], sizes = [2, 48], strides = [1, 1]} : vector<2x192xf32> to vector<2x48xf32>
    %432 = arith.negf %431 : vector<2x48xf32>
    %433 = math.exp %432 : vector<2x48xf32>
    %cst_129 = arith.constant 1.000000e+00 : f32
    %434 = vector.broadcast %cst_129 : f32 to vector<2x48xf32>
    %435 = arith.addf %434, %433 : vector<2x48xf32>
    %436 = arith.divf %434, %435 : vector<2x48xf32>
    %437 = vector.extract_strided_slice %430 {offsets = [0, 48], sizes = [2, 48], strides = [1, 1]} : vector<2x192xf32> to vector<2x48xf32>
    %438 = arith.negf %437 : vector<2x48xf32>
    %439 = math.exp %438 : vector<2x48xf32>
    %cst_130 = arith.constant 1.000000e+00 : f32
    %440 = vector.broadcast %cst_130 : f32 to vector<2x48xf32>
    %441 = arith.addf %440, %439 : vector<2x48xf32>
    %442 = arith.divf %440, %441 : vector<2x48xf32>
    %443 = vector.extract_strided_slice %430 {offsets = [0, 96], sizes = [2, 48], strides = [1, 1]} : vector<2x192xf32> to vector<2x48xf32>
    %444 = math.tanh %443 : vector<2x48xf32>
    %445 = vector.extract_strided_slice %430 {offsets = [0, 144], sizes = [2, 48], strides = [1, 1]} : vector<2x192xf32> to vector<2x48xf32>
    %446 = arith.negf %445 : vector<2x48xf32>
    %447 = math.exp %446 : vector<2x48xf32>
    %cst_131 = arith.constant 1.000000e+00 : f32
    %448 = vector.broadcast %cst_131 : f32 to vector<2x48xf32>
    %449 = arith.addf %448, %447 : vector<2x48xf32>
    %450 = arith.divf %448, %449 : vector<2x48xf32>
    %451 = arith.mulf %442, %383 : vector<2x48xf32>
    %452 = arith.mulf %436, %444 : vector<2x48xf32>
    %453 = arith.addf %451, %452 : vector<2x48xf32>
    %454 = math.tanh %453 : vector<2x48xf32>
    %455 = arith.mulf %450, %454 : vector<2x48xf32>
    %456 = vector.broadcast %116 : vector<1x48xf32> to vector<2x48xf32>
    %457 = arith.mulf %455, %456 : vector<2x48xf32>
    %cst_132 = arith.constant dense<0.000000e+00> : vector<2xf32>
    %458 = vector.multi_reduction <add>, %457, %cst_132 [1] : vector<2x48xf32> to vector<2xf32>
    %459 = vector.shape_cast %458 : vector<2xf32> to vector<2x1xf32>
    %460 = vector.broadcast %117 : vector<1x1xf32> to vector<2x1xf32>
    %461 = arith.addf %459, %460 : vector<2x1xf32>
    %462 = arith.negf %461 : vector<2x1xf32>
    %463 = math.exp %462 : vector<2x1xf32>
    %cst_133 = arith.constant 1.000000e+00 : f32
    %464 = vector.broadcast %cst_133 : f32 to vector<2x1xf32>
    %465 = arith.addf %464, %463 : vector<2x1xf32>
    %466 = arith.divf %464, %465 : vector<2x1xf32>
    %c0_134 = arith.constant 0 : index
    %c4 = arith.constant 4 : index
    %467 = vector.load %arg19[%c0_134, %c4] : memref<2x8xf32, #tpu.memory_space<vmem>>, vector<2x1xf32>
    tpu.vector_store %arg19[%c0_134, %c4], %466 {strides = array<i32>} : memref<2x8xf32, #tpu.memory_space<vmem>>, vector<2x1xf32>,
    %468 = vector.extract_strided_slice %111 {offsets = [10, 0], sizes = [2, 192], strides = [1, 1]} : vector<16x192xf32> to vector<2x192xf32>
    %cst_135 = arith.constant dense<0.000000e+00> : vector<2x192xf32>
    %469 = tpu.matmul %425, %102, %cst_135 {dimension_numbers = #tpu.dot_dimension_numbers<[1], [0], [0], [1], [0, 0, 1, 1], [], []>} : vector<2x48xf32>, vector<48x192xf32>, vector<2x192xf32> -> vector<2x192xf32>
    %470 = arith.addf %468, %469 : vector<2x192xf32>
    %471 = vector.extract_strided_slice %470 {offsets = [0, 0], sizes = [2, 48], strides = [1, 1]} : vector<2x192xf32> to vector<2x48xf32>
    %472 = arith.negf %471 : vector<2x48xf32>
    %473 = math.exp %472 : vector<2x48xf32>
    %cst_136 = arith.constant 1.000000e+00 : f32
    %474 = vector.broadcast %cst_136 : f32 to vector<2x48xf32>
    %475 = arith.addf %474, %473 : vector<2x48xf32>
    %476 = arith.divf %474, %475 : vector<2x48xf32>
    %477 = vector.extract_strided_slice %470 {offsets = [0, 48], sizes = [2, 48], strides = [1, 1]} : vector<2x192xf32> to vector<2x48xf32>
    %478 = arith.negf %477 : vector<2x48xf32>
    %479 = math.exp %478 : vector<2x48xf32>
    %cst_137 = arith.constant 1.000000e+00 : f32
    %480 = vector.broadcast %cst_137 : f32 to vector<2x48xf32>
    %481 = arith.addf %480, %479 : vector<2x48xf32>
    %482 = arith.divf %480, %481 : vector<2x48xf32>
    %483 = vector.extract_strided_slice %470 {offsets = [0, 96], sizes = [2, 48], strides = [1, 1]} : vector<2x192xf32> to vector<2x48xf32>
    %484 = math.tanh %483 : vector<2x48xf32>
    %485 = vector.extract_strided_slice %470 {offsets = [0, 144], sizes = [2, 48], strides = [1, 1]} : vector<2x192xf32> to vector<2x48xf32>
    %486 = arith.negf %485 : vector<2x48xf32>
    %487 = math.exp %486 : vector<2x48xf32>
    %cst_138 = arith.constant 1.000000e+00 : f32
    %488 = vector.broadcast %cst_138 : f32 to vector<2x48xf32>
    %489 = arith.addf %488, %487 : vector<2x48xf32>
    %490 = arith.divf %488, %489 : vector<2x48xf32>
    %491 = arith.mulf %482, %423 : vector<2x48xf32>
    %492 = arith.mulf %476, %484 : vector<2x48xf32>
    %493 = arith.addf %491, %492 : vector<2x48xf32>
    %494 = math.tanh %493 : vector<2x48xf32>
    %495 = arith.mulf %490, %494 : vector<2x48xf32>
    %cst_139 = arith.constant dense<0.000000e+00> : vector<2x192xf32>
    %496 = tpu.matmul %495, %100, %cst_139 {dimension_numbers = #tpu.dot_dimension_numbers<[1], [0], [0], [1], [0, 0, 1, 1], [], []>} : vector<2x48xf32>, vector<48x192xf32>, vector<2x192xf32> -> vector<2x192xf32>
    %cst_140 = arith.constant dense<0.000000e+00> : vector<2x192xf32>
    %497 = tpu.matmul %455, %104, %cst_140 {dimension_numbers = #tpu.dot_dimension_numbers<[1], [0], [0], [1], [0, 0, 1, 1], [], []>} : vector<2x48xf32>, vector<48x192xf32>, vector<2x192xf32> -> vector<2x192xf32>
    %498 = arith.addf %496, %497 : vector<2x192xf32>
    %499 = vector.broadcast %108 : vector<1x192xf32> to vector<2x192xf32>
    %500 = arith.addf %498, %499 : vector<2x192xf32>
    %501 = vector.extract_strided_slice %500 {offsets = [0, 0], sizes = [2, 48], strides = [1, 1]} : vector<2x192xf32> to vector<2x48xf32>
    %502 = arith.negf %501 : vector<2x48xf32>
    %503 = math.exp %502 : vector<2x48xf32>
    %cst_141 = arith.constant 1.000000e+00 : f32
    %504 = vector.broadcast %cst_141 : f32 to vector<2x48xf32>
    %505 = arith.addf %504, %503 : vector<2x48xf32>
    %506 = arith.divf %504, %505 : vector<2x48xf32>
    %507 = vector.extract_strided_slice %500 {offsets = [0, 48], sizes = [2, 48], strides = [1, 1]} : vector<2x192xf32> to vector<2x48xf32>
    %508 = arith.negf %507 : vector<2x48xf32>
    %509 = math.exp %508 : vector<2x48xf32>
    %cst_142 = arith.constant 1.000000e+00 : f32
    %510 = vector.broadcast %cst_142 : f32 to vector<2x48xf32>
    %511 = arith.addf %510, %509 : vector<2x48xf32>
    %512 = arith.divf %510, %511 : vector<2x48xf32>
    %513 = vector.extract_strided_slice %500 {offsets = [0, 96], sizes = [2, 48], strides = [1, 1]} : vector<2x192xf32> to vector<2x48xf32>
    %514 = math.tanh %513 : vector<2x48xf32>
    %515 = vector.extract_strided_slice %500 {offsets = [0, 144], sizes = [2, 48], strides = [1, 1]} : vector<2x192xf32> to vector<2x48xf32>
    %516 = arith.negf %515 : vector<2x48xf32>
    %517 = math.exp %516 : vector<2x48xf32>
    %cst_143 = arith.constant 1.000000e+00 : f32
    %518 = vector.broadcast %cst_143 : f32 to vector<2x48xf32>
    %519 = arith.addf %518, %517 : vector<2x48xf32>
    %520 = arith.divf %518, %519 : vector<2x48xf32>
    %521 = arith.mulf %512, %453 : vector<2x48xf32>
    %522 = arith.mulf %506, %514 : vector<2x48xf32>
    %523 = arith.addf %521, %522 : vector<2x48xf32>
    %524 = math.tanh %523 : vector<2x48xf32>
    %525 = arith.mulf %520, %524 : vector<2x48xf32>
    %526 = vector.broadcast %116 : vector<1x48xf32> to vector<2x48xf32>
    %527 = arith.mulf %525, %526 : vector<2x48xf32>
    %cst_144 = arith.constant dense<0.000000e+00> : vector<2xf32>
    %528 = vector.multi_reduction <add>, %527, %cst_144 [1] : vector<2x48xf32> to vector<2xf32>
    %529 = vector.shape_cast %528 : vector<2xf32> to vector<2x1xf32>
    %530 = vector.broadcast %117 : vector<1x1xf32> to vector<2x1xf32>
    %531 = arith.addf %529, %530 : vector<2x1xf32>
    %532 = arith.negf %531 : vector<2x1xf32>
    %533 = math.exp %532 : vector<2x1xf32>
    %cst_145 = arith.constant 1.000000e+00 : f32
    %534 = vector.broadcast %cst_145 : f32 to vector<2x1xf32>
    %535 = arith.addf %534, %533 : vector<2x1xf32>
    %536 = arith.divf %534, %535 : vector<2x1xf32>
    %c0_146 = arith.constant 0 : index
    %c5 = arith.constant 5 : index
    %537 = vector.load %arg19[%c0_146, %c5] : memref<2x8xf32, #tpu.memory_space<vmem>>, vector<2x1xf32>
    tpu.vector_store %arg19[%c0_146, %c5], %536 {strides = array<i32>} : memref<2x8xf32, #tpu.memory_space<vmem>>, vector<2x1xf32>,
    %538 = vector.extract_strided_slice %111 {offsets = [12, 0], sizes = [2, 192], strides = [1, 1]} : vector<16x192xf32> to vector<2x192xf32>
    %cst_147 = arith.constant dense<0.000000e+00> : vector<2x192xf32>
    %539 = tpu.matmul %495, %102, %cst_147 {dimension_numbers = #tpu.dot_dimension_numbers<[1], [0], [0], [1], [0, 0, 1, 1], [], []>} : vector<2x48xf32>, vector<48x192xf32>, vector<2x192xf32> -> vector<2x192xf32>
    %540 = arith.addf %538, %539 : vector<2x192xf32>
    %541 = vector.extract_strided_slice %540 {offsets = [0, 0], sizes = [2, 48], strides = [1, 1]} : vector<2x192xf32> to vector<2x48xf32>
    %542 = arith.negf %541 : vector<2x48xf32>
    %543 = math.exp %542 : vector<2x48xf32>
    %cst_148 = arith.constant 1.000000e+00 : f32
    %544 = vector.broadcast %cst_148 : f32 to vector<2x48xf32>
    %545 = arith.addf %544, %543 : vector<2x48xf32>
    %546 = arith.divf %544, %545 : vector<2x48xf32>
    %547 = vector.extract_strided_slice %540 {offsets = [0, 48], sizes = [2, 48], strides = [1, 1]} : vector<2x192xf32> to vector<2x48xf32>
    %548 = arith.negf %547 : vector<2x48xf32>
    %549 = math.exp %548 : vector<2x48xf32>
    %cst_149 = arith.constant 1.000000e+00 : f32
    %550 = vector.broadcast %cst_149 : f32 to vector<2x48xf32>
    %551 = arith.addf %550, %549 : vector<2x48xf32>
    %552 = arith.divf %550, %551 : vector<2x48xf32>
    %553 = vector.extract_strided_slice %540 {offsets = [0, 96], sizes = [2, 48], strides = [1, 1]} : vector<2x192xf32> to vector<2x48xf32>
    %554 = math.tanh %553 : vector<2x48xf32>
    %555 = vector.extract_strided_slice %540 {offsets = [0, 144], sizes = [2, 48], strides = [1, 1]} : vector<2x192xf32> to vector<2x48xf32>
    %556 = arith.negf %555 : vector<2x48xf32>
    %557 = math.exp %556 : vector<2x48xf32>
    %cst_150 = arith.constant 1.000000e+00 : f32
    %558 = vector.broadcast %cst_150 : f32 to vector<2x48xf32>
    %559 = arith.addf %558, %557 : vector<2x48xf32>
    %560 = arith.divf %558, %559 : vector<2x48xf32>
    %561 = arith.mulf %552, %493 : vector<2x48xf32>
    %562 = arith.mulf %546, %554 : vector<2x48xf32>
    %563 = arith.addf %561, %562 : vector<2x48xf32>
    %564 = math.tanh %563 : vector<2x48xf32>
    %565 = arith.mulf %560, %564 : vector<2x48xf32>
    %cst_151 = arith.constant dense<0.000000e+00> : vector<2x192xf32>
    %566 = tpu.matmul %565, %100, %cst_151 {dimension_numbers = #tpu.dot_dimension_numbers<[1], [0], [0], [1], [0, 0, 1, 1], [], []>} : vector<2x48xf32>, vector<48x192xf32>, vector<2x192xf32> -> vector<2x192xf32>
    %cst_152 = arith.constant dense<0.000000e+00> : vector<2x192xf32>
    %567 = tpu.matmul %525, %104, %cst_152 {dimension_numbers = #tpu.dot_dimension_numbers<[1], [0], [0], [1], [0, 0, 1, 1], [], []>} : vector<2x48xf32>, vector<48x192xf32>, vector<2x192xf32> -> vector<2x192xf32>
    %568 = arith.addf %566, %567 : vector<2x192xf32>
    %569 = vector.broadcast %108 : vector<1x192xf32> to vector<2x192xf32>
    %570 = arith.addf %568, %569 : vector<2x192xf32>
    %571 = vector.extract_strided_slice %570 {offsets = [0, 0], sizes = [2, 48], strides = [1, 1]} : vector<2x192xf32> to vector<2x48xf32>
    %572 = arith.negf %571 : vector<2x48xf32>
    %573 = math.exp %572 : vector<2x48xf32>
    %cst_153 = arith.constant 1.000000e+00 : f32
    %574 = vector.broadcast %cst_153 : f32 to vector<2x48xf32>
    %575 = arith.addf %574, %573 : vector<2x48xf32>
    %576 = arith.divf %574, %575 : vector<2x48xf32>
    %577 = vector.extract_strided_slice %570 {offsets = [0, 48], sizes = [2, 48], strides = [1, 1]} : vector<2x192xf32> to vector<2x48xf32>
    %578 = arith.negf %577 : vector<2x48xf32>
    %579 = math.exp %578 : vector<2x48xf32>
    %cst_154 = arith.constant 1.000000e+00 : f32
    %580 = vector.broadcast %cst_154 : f32 to vector<2x48xf32>
    %581 = arith.addf %580, %579 : vector<2x48xf32>
    %582 = arith.divf %580, %581 : vector<2x48xf32>
    %583 = vector.extract_strided_slice %570 {offsets = [0, 96], sizes = [2, 48], strides = [1, 1]} : vector<2x192xf32> to vector<2x48xf32>
    %584 = math.tanh %583 : vector<2x48xf32>
    %585 = vector.extract_strided_slice %570 {offsets = [0, 144], sizes = [2, 48], strides = [1, 1]} : vector<2x192xf32> to vector<2x48xf32>
    %586 = arith.negf %585 : vector<2x48xf32>
    %587 = math.exp %586 : vector<2x48xf32>
    %cst_155 = arith.constant 1.000000e+00 : f32
    %588 = vector.broadcast %cst_155 : f32 to vector<2x48xf32>
    %589 = arith.addf %588, %587 : vector<2x48xf32>
    %590 = arith.divf %588, %589 : vector<2x48xf32>
    %591 = arith.mulf %582, %523 : vector<2x48xf32>
    %592 = arith.mulf %576, %584 : vector<2x48xf32>
    %593 = arith.addf %591, %592 : vector<2x48xf32>
    %594 = math.tanh %593 : vector<2x48xf32>
    %595 = arith.mulf %590, %594 : vector<2x48xf32>
    %596 = vector.broadcast %116 : vector<1x48xf32> to vector<2x48xf32>
    %597 = arith.mulf %595, %596 : vector<2x48xf32>
    %cst_156 = arith.constant dense<0.000000e+00> : vector<2xf32>
    %598 = vector.multi_reduction <add>, %597, %cst_156 [1] : vector<2x48xf32> to vector<2xf32>
    %599 = vector.shape_cast %598 : vector<2xf32> to vector<2x1xf32>
    %600 = vector.broadcast %117 : vector<1x1xf32> to vector<2x1xf32>
    %601 = arith.addf %599, %600 : vector<2x1xf32>
    %602 = arith.negf %601 : vector<2x1xf32>
    %603 = math.exp %602 : vector<2x1xf32>
    %cst_157 = arith.constant 1.000000e+00 : f32
    %604 = vector.broadcast %cst_157 : f32 to vector<2x1xf32>
    %605 = arith.addf %604, %603 : vector<2x1xf32>
    %606 = arith.divf %604, %605 : vector<2x1xf32>
    %c0_158 = arith.constant 0 : index
    %c6 = arith.constant 6 : index
    %607 = vector.load %arg19[%c0_158, %c6] : memref<2x8xf32, #tpu.memory_space<vmem>>, vector<2x1xf32>
    tpu.vector_store %arg19[%c0_158, %c6], %606 {strides = array<i32>} : memref<2x8xf32, #tpu.memory_space<vmem>>, vector<2x1xf32>,
    %608 = vector.extract_strided_slice %111 {offsets = [14, 0], sizes = [2, 192], strides = [1, 1]} : vector<16x192xf32> to vector<2x192xf32>
    %cst_159 = arith.constant dense<0.000000e+00> : vector<2x192xf32>
    %609 = tpu.matmul %565, %102, %cst_159 {dimension_numbers = #tpu.dot_dimension_numbers<[1], [0], [0], [1], [0, 0, 1, 1], [], []>} : vector<2x48xf32>, vector<48x192xf32>, vector<2x192xf32> -> vector<2x192xf32>
    %610 = arith.addf %608, %609 : vector<2x192xf32>
    %611 = vector.extract_strided_slice %610 {offsets = [0, 0], sizes = [2, 48], strides = [1, 1]} : vector<2x192xf32> to vector<2x48xf32>
    %612 = arith.negf %611 : vector<2x48xf32>
    %613 = math.exp %612 : vector<2x48xf32>
    %cst_160 = arith.constant 1.000000e+00 : f32
    %614 = vector.broadcast %cst_160 : f32 to vector<2x48xf32>
    %615 = arith.addf %614, %613 : vector<2x48xf32>
    %616 = arith.divf %614, %615 : vector<2x48xf32>
    %617 = vector.extract_strided_slice %610 {offsets = [0, 48], sizes = [2, 48], strides = [1, 1]} : vector<2x192xf32> to vector<2x48xf32>
    %618 = arith.negf %617 : vector<2x48xf32>
    %619 = math.exp %618 : vector<2x48xf32>
    %cst_161 = arith.constant 1.000000e+00 : f32
    %620 = vector.broadcast %cst_161 : f32 to vector<2x48xf32>
    %621 = arith.addf %620, %619 : vector<2x48xf32>
    %622 = arith.divf %620, %621 : vector<2x48xf32>
    %623 = vector.extract_strided_slice %610 {offsets = [0, 96], sizes = [2, 48], strides = [1, 1]} : vector<2x192xf32> to vector<2x48xf32>
    %624 = math.tanh %623 : vector<2x48xf32>
    %625 = vector.extract_strided_slice %610 {offsets = [0, 144], sizes = [2, 48], strides = [1, 1]} : vector<2x192xf32> to vector<2x48xf32>
    %626 = arith.negf %625 : vector<2x48xf32>
    %627 = math.exp %626 : vector<2x48xf32>
    %cst_162 = arith.constant 1.000000e+00 : f32
    %628 = vector.broadcast %cst_162 : f32 to vector<2x48xf32>
    %629 = arith.addf %628, %627 : vector<2x48xf32>
    %630 = arith.divf %628, %629 : vector<2x48xf32>
    %631 = arith.mulf %622, %563 : vector<2x48xf32>
    %632 = arith.mulf %616, %624 : vector<2x48xf32>
    %633 = arith.addf %631, %632 : vector<2x48xf32>
    %634 = math.tanh %633 : vector<2x48xf32>
    %635 = arith.mulf %630, %634 : vector<2x48xf32>
    %cst_163 = arith.constant dense<0.000000e+00> : vector<2x192xf32>
    %636 = tpu.matmul %635, %100, %cst_163 {dimension_numbers = #tpu.dot_dimension_numbers<[1], [0], [0], [1], [0, 0, 1, 1], [], []>} : vector<2x48xf32>, vector<48x192xf32>, vector<2x192xf32> -> vector<2x192xf32>
    %cst_164 = arith.constant dense<0.000000e+00> : vector<2x192xf32>
    %637 = tpu.matmul %595, %104, %cst_164 {dimension_numbers = #tpu.dot_dimension_numbers<[1], [0], [0], [1], [0, 0, 1, 1], [], []>} : vector<2x48xf32>, vector<48x192xf32>, vector<2x192xf32> -> vector<2x192xf32>
    %638 = arith.addf %636, %637 : vector<2x192xf32>
    %639 = vector.broadcast %108 : vector<1x192xf32> to vector<2x192xf32>
    %640 = arith.addf %638, %639 : vector<2x192xf32>
    %641 = vector.extract_strided_slice %640 {offsets = [0, 0], sizes = [2, 48], strides = [1, 1]} : vector<2x192xf32> to vector<2x48xf32>
    %642 = arith.negf %641 : vector<2x48xf32>
    %643 = math.exp %642 : vector<2x48xf32>
    %cst_165 = arith.constant 1.000000e+00 : f32
    %644 = vector.broadcast %cst_165 : f32 to vector<2x48xf32>
    %645 = arith.addf %644, %643 : vector<2x48xf32>
    %646 = arith.divf %644, %645 : vector<2x48xf32>
    %647 = vector.extract_strided_slice %640 {offsets = [0, 48], sizes = [2, 48], strides = [1, 1]} : vector<2x192xf32> to vector<2x48xf32>
    %648 = arith.negf %647 : vector<2x48xf32>
    %649 = math.exp %648 : vector<2x48xf32>
    %cst_166 = arith.constant 1.000000e+00 : f32
    %650 = vector.broadcast %cst_166 : f32 to vector<2x48xf32>
    %651 = arith.addf %650, %649 : vector<2x48xf32>
    %652 = arith.divf %650, %651 : vector<2x48xf32>
    %653 = vector.extract_strided_slice %640 {offsets = [0, 96], sizes = [2, 48], strides = [1, 1]} : vector<2x192xf32> to vector<2x48xf32>
    %654 = math.tanh %653 : vector<2x48xf32>
    %655 = vector.extract_strided_slice %640 {offsets = [0, 144], sizes = [2, 48], strides = [1, 1]} : vector<2x192xf32> to vector<2x48xf32>
    %656 = arith.negf %655 : vector<2x48xf32>
    %657 = math.exp %656 : vector<2x48xf32>
    %cst_167 = arith.constant 1.000000e+00 : f32
    %658 = vector.broadcast %cst_167 : f32 to vector<2x48xf32>
    %659 = arith.addf %658, %657 : vector<2x48xf32>
    %660 = arith.divf %658, %659 : vector<2x48xf32>
    %661 = arith.mulf %652, %593 : vector<2x48xf32>
    %662 = arith.mulf %646, %654 : vector<2x48xf32>
    %663 = arith.addf %661, %662 : vector<2x48xf32>
    %664 = math.tanh %663 : vector<2x48xf32>
    %665 = arith.mulf %660, %664 : vector<2x48xf32>
    %666 = vector.broadcast %116 : vector<1x48xf32> to vector<2x48xf32>
    %667 = arith.mulf %665, %666 : vector<2x48xf32>
    %cst_168 = arith.constant dense<0.000000e+00> : vector<2xf32>
    %668 = vector.multi_reduction <add>, %667, %cst_168 [1] : vector<2x48xf32> to vector<2xf32>
    %669 = vector.shape_cast %668 : vector<2xf32> to vector<2x1xf32>
    %670 = vector.broadcast %117 : vector<1x1xf32> to vector<2x1xf32>
    %671 = arith.addf %669, %670 : vector<2x1xf32>
    %672 = arith.negf %671 : vector<2x1xf32>
    %673 = math.exp %672 : vector<2x1xf32>
    %cst_169 = arith.constant 1.000000e+00 : f32
    %674 = vector.broadcast %cst_169 : f32 to vector<2x1xf32>
    %675 = arith.addf %674, %673 : vector<2x1xf32>
    %676 = arith.divf %674, %675 : vector<2x1xf32>
    %c0_170 = arith.constant 0 : index
    %c7 = arith.constant 7 : index
    %677 = vector.load %arg19[%c0_170, %c7] : memref<2x8xf32, #tpu.memory_space<vmem>>, vector<2x1xf32>
    tpu.vector_store %arg19[%c0_170, %c7], %676 {strides = array<i32>} : memref<2x8xf32, #tpu.memory_space<vmem>>, vector<2x1xf32>,
    return
  }
}

</mosaic_0001>

<bundles_post_ra>
// kernel: tpu_custom_call.1
= control target key start
LH: loop header
LB: loop body
LE: loop exit
PB: predicated region body
PF: predicated region fallthrough
CT: control target
= control target key end

     0   :  { %s5124_s0 = inlined_call_operand.vmem [shape: f32[16,112], index: 0, kind: input, shape index: {}]   ;;  %s5125_s1 = inlined_call_operand.vmem [shape: f32[16,4], index: 1, kind: input, shape index: {}]   ;;  %s5126_s2 = inlined_call_operand.vmem [shape: f32[112,48], index: 2, kind: input, shape index: {}]   ;;  %s5127_s3 = inlined_call_operand.vmem [shape: f32[1,48], index: 3, kind: input, shape index: {}]   ;;  %s5128_s4 = inlined_call_operand.vmem [shape: f32[1,48], index: 4, kind: input, shape index: {}]   ;;  %s5129_s5 = inlined_call_operand.vmem [shape: f32[1,48], index: 5, kind: input, shape index: {}]   ;;  %s5130_s6 = inlined_call_operand.vmem [shape: f32[4,48], index: 6, kind: input, shape index: {}]   ;;  %s5131_s7 = inlined_call_operand.vmem [shape: f32[1,48], index: 7, kind: input, shape index: {}]   ;;  %s5132_s8 = inlined_call_operand.vmem [shape: f32[1,48], index: 8, kind: input, shape index: {}]   ;;  %s5133_s9 = inlined_call_operand.vmem [shape: f32[1,48], index: 9, kind: input, shape index: {}]   ;;  %s5134_s10 = inlined_call_operand.vmem [shape: f32[96,48], index: 10, kind: input, shape index: {}]   ;;  %s5135_s11 = inlined_call_operand.vmem [shape: f32[1,48], index: 11, kind: input, shape index: {}]   ;;  %s5136_s12 = inlined_call_operand.vmem [shape: f32[1,48], index: 12, kind: input, shape index: {}]   ;;  %s5137_s13 = inlined_call_operand.vmem [shape: f32[1,48], index: 13, kind: input, shape index: {}]   ;;  %s5138_s14 = inlined_call_operand.vmem [shape: f32[2,48,192], index: 14, kind: input, shape index: {}]   ;;  %s5139_s15 = inlined_call_operand.hbm [shape: f32[2,48,192], index: 15, kind: input, shape index: {}]   ;;  %s5140_s16 = inlined_call_operand.vmem [shape: f32[2,1,192], index: 16, kind: input, shape index: {}]   ;;  %s5141_s17 = inlined_call_operand.vmem [shape: f32[1,48], index: 17, kind: input, shape index: {}]   ;;  %s5142_s18 = inlined_call_operand.<no memory space> [shape: f32[1,1], index: 18, kind: input, shape index: {}]   ;;  %s5143_s19 = inlined_call_operand.hbm [shape: f32[2,8], index: 19, kind: output, shape index: {}]  }
   0x1   :  { %5150 = sst [smem:[#allocation10_spill]] %s5124_s0  ;;  %v24_v0 = vstv %s5142_s18 }
   0x2   :  { %5151 = sst [smem:[#allocation11_spill]] %s5125_s1  ;;  %25 = vst [vmem:[#allocation2] sm:$0x1] %v24_v0 }
   0x3   :  { %5152 = sst [smem:[#allocation12_spill]] %s5126_s2 }
   0x4   :  { %5153 = sst [smem:[#allocation13_spill]] %s5127_s3 }
   0x5   :  { %26 = vsyncpa [#allocation4], 0 }
   0x6   :  { %27 = vsyncpa [#allocation5], 0  ;;  %s3955_s20 = smov [#allocation3]  }
   0x7   :  { %s63_s21 = sshll.u32 %s3955_s20, 4  ;;  %s64_s21 = int_to_ptr.vmem [resolvable:$true] %s63_s21 }
   0x8   :  { %s3919_s1 = scalar_lea.vmem %s64_s21, 3072  ;;  %p3924_p1 = scmp.lt.s32.totalorder %s64_s21, %s64_s21 }
   0x9   :  { %p3920_p0 = scmp.ne.s32.totalorder %s64_s21, %s3919_s1  ;;  %p3925_p2 = scmp.lt.s32.totalorder %s3919_s1, %s3919_s1 }
   0xb   :  { %p3926_p3 = por %p3925_p2, %p3924_p1 }
   0xd   :  { %p3927_p4 = pnand %p3926_p3, %p3920_p0 }
   0xf   :  { %3930 = shalt.err (!%p3927_p4)
}
  0x10   :  { %s3956_s22 = smov 256   ;;  %s3957_s2 = smov 16  }
  0x11   :  { %69 = dma.hbm_to_vmem [thread:$0]  %s5139_s15, 3072, %s64_s21, [#allocation4], %s3956_s22, %s3956_s22, %s3957_s2  }
  0x12   :  { %3951 = dma.done.wait [#allocation4], 3072  }
  0x13   :  { %3952 = vsyncadd [#allocation4], 4294964224  ;;  %s5154_s3 = sld [smem:[#allocation12_spill]]  ;;  %vm102_vm0 = vcmask 916480   ;;  %v232_v17 = vld [vmem:[%s5130_s6] sm:$0xf] }
  0x14   :  { %s5155_s21 = sld [smem:[#allocation10_spill]]  ;;  %vm247_vm1 = vcmask 1043456   ;;  %vm240_vm2 = vcmask 31744   ;;  %vm186_vm3 = vcmask 392192   ;;  %v3398_v27 = vld [vmem:[%s5131_s7] ss:$0 sm:$0xff] }
  0x15   :  { %s5156_s30 = sld [smem:[#allocation11_spill]]  ;;  %v381_v54 = vld [vmem:[%s5134_s10 + $0x58] sm:$0xff]  ;;  %v380_v55 = vld [vmem:[%s5134_s10 + $0x50] sm:$0xff]  ;;  %v379_v56 = vld [vmem:[%s5134_s10 + $0x48] sm:$0xff]  ;;  %vm847_vm4 = vcmask 261120   ;;  %s3961_s22 = smov 96  }
  0x16   :  { %s5157_s1 = sld [smem:[#allocation13_spill]]  ;;  %3561 = vmatprep.subr.mxu1 %v381_v54  ;;  %v378_v57 = vld [vmem:[%s5134_s10 + $0x40] sm:$0xff]  ;;  %v377_v58 = vld [vmem:[%s5134_s10 + $0x38] sm:$0xff]  ;;  %v376_v59 = vld [vmem:[%s5134_s10 + $0x30] sm:$0xff]  ;;  %s3962_s7 = smov 112   ;;  %vm1070_vm5 = vcmask 386048  }
  0x17   :  { %3562 = vmatpush3.msra.mxu1 %v381_v54  ;;  %v375_v60 = vld [vmem:[%s5134_s10 + $0x28] sm:$0xff]  ;;  %v611_v54 = vld [vmem:[%s5138_s14 + $0x50] sm:$0xff]  ;;  %vm1087_vm6 = vcmask 1024   ;;  %vm1415_vm7 = vcmask 9224   ;;  %vm1743_vm8 = vcmask 17424   ;;  %vm2071_vm9 = vcmask 25624  }
  0x18   :  { %3563 = vmatprep.subr.mxu1 %v380_v55  ;;  %vm2392_vm10 = vcmask 33824   ;;  %vm2720_vm11 = vcmask 42024   ;;  %vm3048_vm12 = vcmask 50224   ;;  %vm3376_vm13 = vcmask 58424  }
  0x19   :  { %v94_v1 = vld [vmem:[%s5154_s3 + $0x68] sm:$0xff]  ;;  %v93_v2 = vld [vmem:[%s5154_s3 + $0x60] sm:$0xff]  ;;  %v92_v3 = vld [vmem:[%s5154_s3 + $0x58] sm:$0xff]  ;;  %3564 = vmatpush3.msra.mxu1 %v380_v55 }
  0x1a   :  { %3525 = vmatprep.subr.mxu0 %v94_v1  ;;  %v91_v4 = vld [vmem:[%s5154_s3 + $0x50] sm:$0xff]  ;;  %v79_v5 = vld [vmem:[%s5155_s21] sm:$0xff]  ;;  %v90_v6 = vld [vmem:[%s5154_s3 + $0x48] sm:$0xff]  ;;  %3565 = vmatprep.subr.mxu1 %v379_v56 }
  0x1b   :  { %3526 = vmatpush3.msra.mxu0 %v94_v1  ;;  %3553 = vmatprep.mubr.msk.f32.mxu0 %vm102_vm0, %v79_v5  ;;  %v89_v7 = vld [vmem:[%s5154_s3 + $0x40] sm:$0xff]  ;;  %v88_v8 = vld [vmem:[%s5154_s3 + $0x38] sm:$0xff]  ;;  %v87_v9 = vld [vmem:[%s5154_s3 + $0x30] sm:$0xff] }
  0x1c   :  { %3527 = vmatprep.subr.mxu0 %v93_v2  ;;  %v86_v10 = vld [vmem:[%s5154_s3 + $0x28] sm:$0xff]  ;;  %v85_v11 = vld [vmem:[%s5154_s3 + $0x20] sm:$0xff]  ;;  %v84_v12 = vld [vmem:[%s5154_s3 + $0x18] sm:$0xff]  ;;  %3566 = vmatpush3.msra.mxu1 %v379_v56 }
  0x1d   :  { %3528 = vmatpush3.msra.mxu0 %v93_v2  ;;  %v83_v13 = vld [vmem:[%s5154_s3 + $0x10] sm:$0xff]  ;;  %v82_v14 = vld [vmem:[%s5154_s3 + $0x8] sm:$0xff]  ;;  %v81_v15 = vld [vmem:[%s5154_s3] sm:$0xff]  ;;  %3567 = vmatprep.subr.mxu1 %v378_v57 }
  0x1e   :  { %3529 = vmatprep.subr.mxu0 %v92_v3  ;;  %v80_v16 = vld [vmem:[%s5155_s21 + $0x8] sm:$0xff]  ;;  %v230_v18 = vld [vmem:[%s5156_s30] sm:$0xff]  ;;  %3568 = vmatpush3.msra.mxu1 %v378_v57  ;;  %v4236_v57 = vld [vmem:[#allocation3 + $0x50] sm:$0xff] }
  0x1f   :  { %3530 = vmatpush3.msra.mxu0 %v92_v3  ;;  %v231_v19 = vld [vmem:[%s5156_s30 + $0x8] sm:$0xff]  ;;  %v3393_v21 = vld [vmem:[%s5157_s1] ss:$0 sm:$0xff]  ;;  %3569 = vmatprep.subr.mxu1 %v377_v58  ;;  %s3960_s1 = smov 48  }
  0x20   :  { %3531 = vmatprep.subr.mxu0 %v91_v4  ;;  %3570 = vmatpush3.msra.mxu1 %v377_v58  ;;  %v4230_v55 = vld [vmem:[#allocation3 + $0x58] sm:$0xff]  ;;  %v610_v56 = vld [vmem:[%s5138_s14 + $0x48] sm:$0xff] }
  0x21   :  { %3532 = vmatpush3.msra.mxu0 %v91_v4  ;;  %3571 = vmatprep.subr.mxu1 %v376_v59  ;;  %v609_v58 = vld [vmem:[%s5138_s14 + $0x40] sm:$0xff] }
  0x22   :  { %3533 = vmatprep.subr.mxu0 %v90_v6  ;;  %3572 = vmatpush3.msra.mxu1 %v376_v59  ;;  %v4242_v59 = vld [vmem:[#allocation3 + $0x48] sm:$0xff] }
  0x23   :  { %3534 = vmatpush3.msra.mxu0 %v90_v6  ;;  %3576 = vmatprep.subr.mxu1 %v375_v60 }
  0x24   :  { %3535 = vmatprep.subr.mxu0 %v89_v7 }
  0x25   :  { %3536 = vmatpush3.msra.mxu0 %v89_v7 }
  0x26   :  { %3537 = vmatprep.subr.mxu0 %v88_v8 }
  0x27   :  { %3538 = vmatpush3.msra.mxu0 %v88_v8 }
  0x28   :  { %3539 = vmatprep.subr.mxu0 %v87_v9 }
  0x29   :  { %3540 = vmatpush3.msra.mxu0 %v87_v9 }
  0x2a   :  { %3541 = vmatprep.subr.mxu0 %v86_v10 }
  0x2b   :  { %3542 = vmatpush3.msra.mxu0 %v86_v10  ;;  %v3402_v10 = vld [vmem:[%s5132_s8] ss:$0 sm:$0xff]  ;;  %s3970_s8 = smov [#allocation6]  }
  0x2c   :  { %3543 = vmatprep.subr.mxu0 %v85_v11 }
  0x2d   :  { %3544 = vmatpush3.msra.mxu0 %v85_v11 }
  0x2e   :  { %3545 = vmatprep.subr.mxu0 %v84_v12 }
  0x2f   :  { %3546 = vmatpush3.msra.mxu0 %v84_v12  ;;  %v3403_v12 = vld [vmem:[%s5133_s9] ss:$0 sm:$0xff] }
  0x30   :  { %3547 = vmatprep.subr.mxu0 %v83_v13 }
  0x31   :  { %3548 = vmatpush3.msra.mxu0 %v83_v13 }
  0x32   :  { %3549 = vmatprep.subr.mxu0 %v82_v14 }
  0x33   :  { %3550 = vmatpush3.msra.mxu0 %v82_v14 }
  0x34   :  { %3551 = vmatprep.subr.mxu0 %v81_v15 }
  0x35   :  { %3552 = vmatpush3.msra.mxu0 %v81_v15  ;;  %v3396_v15 = vld [vmem:[%s5128_s4] ss:$0 sm:$0xff]  ;;  %s3969_s4 = smov 7  }
  0x36   :  { %3554 = vmatmul.mubr.msk.f32.vlgmr.msra.gmra.mxu0 %vm102_vm0, %v80_v16  ;;  %3556 = vmatprep.subr.msk.mxu0 %vm247_vm1, %v232_v17 }
  0x37   :  { %3557 = vmatpush3.msk.msra.mxu0 %vm247_vm1, %v232_v17  ;;  %3558 = vmatprep.mubr.msk.f32.mxu0 %vm240_vm2, %v230_v18 }
  0x38   :  { %773 = vmatprep.subr.mxu0 %v4230_v55 }
  0x3a   :  { %3559 = vmatmul.mubr.msk.f32.vlgmr.msra.gmra.mxu0 %vm240_vm2, %v231_v19 }
  0x3b   :  { %774 = vmatpush1.msra.mxu0 %v4236_v57 }
  0x3c   :  { %775 = vmatprep.subr.mxu0 %v4242_v59 }
  0xf6   :  { %v3555_v20 = vpop.f32.mrf.mxu0 }
  0xf7   :  { %v181_v25 = vadd.f32 %v3555_v20, %v3393_v21  ;;  %v3397_v20 = vld [vmem:[%s5129_s5] ss:$0 sm:$0xff]  ;;  %s3384_s5 = sshll.u32 %s3970_s8, 4  ;;  %s3385_s5 = int_to_ptr.vmem [resolvable:$true] %s3384_s5 }
  0xf8   :  { %v175_v22 = vpop.f32.mrf.mxu0  ;;  %s3931_s9 = scalar_lea.vmem %s3385_s5, 32  ;;  %p3936_p6 = scmp.lt.s32.totalorder %s3385_s5, %s3385_s5 }
  0xf9   :  { %v176_v23 = vadd.f32 %v3393_v21, %v175_v22  ;;  %v190_v32 = vsel %vm186_vm3, %v181_v25, 0.0  ;;  %p3932_p5 = scmp.ne.s32.totalorder %s3385_s5, %s3931_s9  ;;  %p3937_p7 = scmp.lt.s32.totalorder %s3931_s9, %s3931_s9 }
  0xfa   :  { %v3560_v24 = vpop.f32.mrf.mxu0 }
  0xfb   :  { %v187_v26 = vsel %vm186_vm3, %v176_v23, 0.0  ;;  %v323_v30 = vadd.f32 %v3560_v24, %v3398_v27  ;;  %p3938_p8 = por %p3937_p7, %p3936_p6 }
  0xfc   :  { %v317_v28 = vpop.f32.mrf.mxu0  ;;  %188 = vadd.xlane.f32.xlu1 %v187_v26 }
  0xfd   :  { %v318_v29 = vadd.f32 %v3398_v27, %v317_v28  ;;  %v331_v33 = vsel %vm186_vm3, %v323_v30, 0.0  ;;  %p3939_p9 = pnand %p3938_p8, %p3932_p5 }
  0xff   :  { %v328_v31 = vsel %vm186_vm3, %v318_v29, 0.0 }
 0x100   :  { %329 = vadd.xlane.f32.xlu0 %v328_v31  ;;  %191 = vadd.xlane.f32.xlu1 %v190_v32  ;;  %v373_v31 = vld [vmem:[%s5134_s10 + $0x18] sm:$0xff] }
 0x104   :  { %332 = vadd.xlane.f32.xlu0 %v331_v33  ;;  %v372_v33 = vld [vmem:[%s5134_s10 + $0x10] sm:$0xff] }
 0x185   :  { %v189_v34 = vpop.xlane.xlu1 %188 }
 0x186   :  { %v194_v35 = vmul.f32 0.020833334, %v189_v34  ;;  %v371_v34 = vld [vmem:[%s5134_s10 + $0x8] sm:$0xff] }
 0x188   :  { %v4147_v39 = vsub.f32 %v176_v23, %v194_v35 }
 0x189   :  { %v330_v36 = vpop.xlane.xlu0 %329  ;;  %v192_v37 = vpop.xlane.xlu1 %191 }
 0x18a   :  { %v334_v38 = vmul.f32 0.020833334, %v330_v36  ;;  %v195_v41 = vmul.f32 0.020833334, %v192_v37  ;;  %v198_v48 = vmul.f32 %v4147_v39, %v4147_v39  ;;  %v370_v36 = vld [vmem:[%s5134_s10] sm:$0xff] }
 0x18c   :  { %v336_v40 = vsub.f32 %v318_v29, %v334_v38  ;;  %v4149_v45 = vsub.f32 %v181_v25, %v195_v41  ;;  %v200_v51 = vsel %vm186_vm3, %v198_v48, 0.0  ;;  %v3408_v41 = vld [vmem:[%s5135_s11] ss:$0 sm:$0xff] }
 0x18d   :  { %v333_v42 = vpop.xlane.xlu0 %332 }
 0x18e   :  { %v335_v43 = vmul.f32 0.020833334, %v333_v42  ;;  %v338_v44 = vmul.f32 %v336_v40, %v336_v40  ;;  %v199_v52 = vmul.f32 %v4149_v45, %v4149_v45 }
 0x190   :  { %v337_v46 = vsub.f32 %v323_v30, %v335_v43  ;;  %v340_v47 = vsel %vm186_vm3, %v338_v44, 0.0  ;;  %v203_v53 = vsel %vm186_vm3, %v199_v52, 0.0  ;;  %v374_v30 = vld [vmem:[%s5134_s10 + $0x20] sm:$0xff] }
 0x191   :  { %341 = vadd.xlane.f32.xlu0 %v340_v47 }
 0x192   :  { %v339_v49 = vmul.f32 %v337_v46, %v337_v46 }
 0x194   :  { %v343_v50 = vsel %vm186_vm3, %v339_v49, 0.0 }
 0x195   :  { %344 = vadd.xlane.f32.xlu1 %v343_v50  ;;  %201 = vadd.xlane.f32.xlu0 %v200_v51 }
 0x199   :  { %204 = vadd.xlane.f32.xlu1 %v203_v53  ;;  %v612_v53 = vld [vmem:[%s5138_s14 + $0x58] sm:$0xff] }
 0x21a   :  { %v342_v61 = vpop.xlane.xlu0 %341 }
 0x21b   :  { %v346_v62 = vmul.f32 0.020833334, %v342_v61  ;;  %v4247_v61 = vld [vmem:[#allocation3 + $0x40] sm:$0xff] }
 0x21c   :  { %776 = vmatpush1.msra.mxu0 %v4247_v61 }
 0x21d   :  { %v348_v63 = vadd.f32 1e-05, %v346_v62  ;;  %v607_v62 = vld [vmem:[%s5138_s14 + $0x30] sm:$0xff] }
 0x21e   :  { %v202_v0 = vpop.xlane.xlu0 %201  ;;  %v345_v1 = vpop.xlane.xlu1 %344 }
 0x21f   :  { %3607 = vrsqrt.f32 %v348_v63  ;;  %v206_v2 = vmul.f32 0.020833334, %v202_v0  ;;  %v347_v3 = vmul.f32 0.020833334, %v345_v1  ;;  %v4253_v63 = vld [vmem:[#allocation3 + $0x38] sm:$0xff]  ;;  %v606_v0 = vld [vmem:[%s5138_s14 + $0x28] sm:$0xff] }
 0x220   :  { %v4259_v1 = vld [vmem:[#allocation3 + $0x30] sm:$0xff]  ;;  %777 = vmatprep.subr.mxu0 %v4253_v63 }
 0x221   :  { %v208_v4 = vadd.f32 1e-05, %v206_v2  ;;  %v349_v5 = vadd.f32 1e-05, %v347_v3  ;;  %v4261_v2 = vld [vmem:[#allocation3 + $0x28] sm:$0xff]  ;;  %v605_v3 = vld [vmem:[%s5138_s14 + $0x20] sm:$0xff]  ;;  %778 = vmatpush1.msra.mxu0 %v4259_v1 }
 0x222   :  { %v205_v6 = vpop.xlane.xlu1 %204  ;;  %779 = vmatprep.subr.mxu0 %v4261_v2 }
 0x223   :  { %3609 = vrsqrt.f32 %v208_v4  ;;  %v207_v7 = vmul.f32 0.020833334, %v205_v6  ;;  %v4267_v4 = vld [vmem:[#allocation3 + $0x20] sm:$0xff]  ;;  %v4273_v6 = vld [vmem:[#allocation3 + $0x18] sm:$0xff] }
 0x224   :  { %3611 = vrsqrt.f32 %v349_v5  ;;  %v604_v5 = vld [vmem:[%s5138_s14 + $0x18] sm:$0xff]  ;;  %780 = vmatpush1.msra.mxu0 %v4267_v4 }
 0x225   :  { %v209_v8 = vadd.f32 1e-05, %v207_v7  ;;  %v603_v7 = vld [vmem:[%s5138_s14 + $0x10] sm:$0xff]  ;;  %781 = vmatprep.subr.mxu0 %v4273_v6 }
 0x227   :  { %3613 = vrsqrt.f32 %v209_v8  ;;  %v4279_v8 = vld [vmem:[#allocation3 + $0x10] sm:$0xff] }
 0x228   :  { %782 = vmatpush1.msra.mxu0 %v4279_v8 }
 0x22c   :  { %v3608_v9 = vpop.eup %3607 }
 0x22d   :  { %v352_v11 = vmul.f32 %v3608_v9, %v336_v40  ;;  %v602_v9 = vld [vmem:[%s5138_s14 + $0x8] sm:$0xff] }
 0x22f   :  { %v360_v13 = vmul.f32 %v3402_v10, %v352_v11  ;;  %v4289_v11 = vld [vmem:[#allocation3 + $0x8] sm:$0xff] }
 0x230   :  { %v3610_v14 = vpop.eup %3609  ;;  %783 = vmatprep.subr.mxu0 %v4289_v11 }
 0x231   :  { %v3612_v16 = vpop.eup %3611  ;;  %v368_v17 = vadd.f32 %v3403_v12, %v360_v13  ;;  %v212_v18 = vmul.f32 %v3610_v14, %v4147_v39  ;;  %v4295_v13 = vld [vmem:[#allocation3] sm:$0xff] }
 0x232   :  { %v353_v19 = vmul.f32 %v3612_v16, %v337_v46  ;;  %784 = vmatpush1.msra.mxu0 %v4295_v13 }
 0x233   :  { %v384_v21 = vmax.f32 %v368_v17, 0.0  ;;  %v220_v22 = vmul.f32 %v3396_v15, %v212_v18  ;;  %v4303_v18 = vld [vmem:[%s5136_s12] ss:$0 sm:$0xff] }
 0x234   :  { %v361_v23 = vmul.f32 %v3402_v10, %v353_v19  ;;  %v3614_v24 = vpop.eup %3613  ;;  %v601_v10 = vld [vmem:[%s5138_s14] sm:$0xff] }
 0x235   :  { %3573 = vmatprep.mubr.msk.f32.mxu1 %vm186_vm3, %v384_v21  ;;  %v228_v25 = vadd.f32 %v3397_v20, %v220_v22  ;;  %v213_v29 = vmul.f32 %v3614_v24, %v4149_v45 }
 0x236   :  { %v369_v26 = vadd.f32 %v3403_v12, %v361_v23  ;;  %v5147_v12 = vmov 0.0   ;;  %v655_v23 = vlaneseq }
 0x237   :  { %v382_v27 = vmax.f32 %v228_v25, 0.0  ;;  %v221_v32 = vmul.f32 %v3396_v15, %v213_v29  ;;  %817 = vmatprep.mubr.f32.mxu0 %v5147_v12 }
 0x238   :  { %v385_v28 = vmax.f32 %v369_v26, 0.0  ;;  %818 = vmatmul.mubr.f32.vlgmr.msra.gmra.mxu0 %v5147_v12  ;;  %v4315_v24 = vshrl.u32 %v655_v23, 7  ;;  %v651_v26 = vld [vmem:[%s5140_s16] sm:$0x3]  ;;  %v4396_v23 = vld [vmem:[%s5138_s14 + $0xb0] sm:$0xff] }
 0x239   :  { %v229_v35 = vadd.f32 %v3397_v20, %v221_v32  ;;  %1002 = vmatprep.mubr.f32.mxu0 %v5147_v12  ;;  %v4309_v20 = vld [vmem:[%s5137_s13] ss:$0 sm:$0xff]  ;;  %s3959_s13 = smov 32  }
 0x23a   :  { %3574 = vmatmul.mubr.msk.f32.vlgmr.msra.gmra.mxu1 %vm186_vm3, %v385_v28  ;;  %v657_v25 = vsub.s32 0, %v4315_v24 }
 0x23b   :  { %3577 = vmatpush3.msra.mxu1 %v375_v60  ;;  %3588 = vmatprep.mubr.msk.f32.mxu1 %vm186_vm3, %v382_v27  ;;  %v383_v37 = vmax.f32 %v229_v35, 0.0  ;;  %v608_v60 = vld [vmem:[%s5138_s14 + $0x38] sm:$0xff]  ;;  %v661_v27 = vsub.s32 1, %v4315_v24 }
 0x23c   :  { %3578 = vmatprep.subr.mxu1 %v374_v30  ;;  %v4324_v28 = vrot.slane %v651_v26, %v657_v25 }
 0x23d   :  { %3579 = vmatpush3.msra.mxu1 %v374_v30  ;;  %v4328_v29 = vrot.slane %v651_v26, %v661_v27  ;;  %v4403_v26 = vld [vmem:[%s5138_s14 + $0xa8] sm:$0xff] }
 0x23e   :  { %3580 = vmatprep.subr.mxu1 %v373_v31 }
 0x23f   :  { %3581 = vmatpush3.msra.mxu1 %v373_v31 }
 0x240   :  { %3582 = vmatprep.subr.mxu1 %v372_v33 }
 0x241   :  { %3583 = vmatpush3.msra.mxu1 %v372_v33 }
 0x242   :  { %3584 = vmatprep.subr.mxu1 %v371_v34 }
 0x243   :  { %3585 = vmatpush3.msra.mxu1 %v371_v34 }
 0x244   :  { %3586 = vmatprep.subr.mxu1 %v370_v36 }
 0x245   :  { %3587 = vmatpush3.msra.mxu1 %v370_v36 }
 0x246   :  { %3589 = vmatmul.mubr.msk.f32.vlgmr.msra.gmra.mxu1 %vm186_vm3, %v383_v37  ;;  %691 = vmatprep.subr.mxu1 %v612_v53 }
 0x247   :  { %692 = vmatpush1.msra.mxu1 %v611_v54  ;;  %735 = vmatprep.mubr.f32.mxu1 %v5147_v12 }
 0x248   :  { %693 = vmatprep.subr.mxu1 %v610_v56 }
 0x249   :  { %694 = vmatpush1.msra.mxu1 %v609_v58 }
 0x24a   :  { %695 = vmatprep.subr.mxu1 %v608_v60 }
 0x24b   :  { %696 = vmatpush1.msra.mxu1 %v607_v62 }
 0x24c   :  { %697 = vmatprep.subr.mxu1 %v606_v0  ;;  %v4354_v0 = vld [vmem:[#allocation3 + $0xb8] sm:$0xff] }
 0x24d   :  { %698 = vmatpush1.msra.mxu1 %v605_v3  ;;  %v4356_v3 = vld [vmem:[#allocation3 + $0xb0] sm:$0xff] }
 0x24e   :  { %699 = vmatprep.subr.mxu1 %v604_v5  ;;  %v4358_v5 = vld [vmem:[#allocation3 + $0xa8] sm:$0xff] }
 0x24f   :  { %700 = vmatpush1.msra.mxu1 %v603_v7  ;;  %v4361_v7 = vld [vmem:[#allocation3 + $0xa0] sm:$0xff] }
 0x250   :  { %701 = vmatprep.subr.mxu1 %v602_v9  ;;  %v4366_v9 = vld [vmem:[#allocation3 + $0x98] sm:$0xff] }
 0x251   :  { %702 = vmatpush1.msra.mxu1 %v601_v10  ;;  %v4369_v10 = vld [vmem:[#allocation3 + $0x90] sm:$0xff] }
 0x252   :  { %882 = vmatprep.subr.mxu1 %v4354_v0 }
 0x2f8   :  { %v819_v31 = vpop.f32.mrf.mxu0 }
 0x2fa   :  { %v3575_v38 = vpop.f32.mrf.mxu1  ;;  %v821_v36 = vpop.f32.mrf.mxu0 }
 0x2fc   :  { %v458_v39 = vpop.f32.mrf.mxu1 }
 0x306   :  { %v3590_v40 = vpop.f32.mrf.mxu1 }
 0x307   :  { %v545_v42 = vadd.f32 %v3590_v40, %v3575_v38 }
 0x308   :  { %v539_v43 = vpop.f32.mrf.mxu1 }
 0x309   :  { %v540_v44 = vadd.f32 %v539_v43, %v458_v39  ;;  %v4216_v45 = vadd.f32 %v3408_v41, %v545_v42 }
 0x30b   :  { %v555_v46 = vadd.f32 %v3408_v41, %v540_v44 }
 0x30d   :  { %v559_v47 = vsel %vm186_vm3, %v555_v46, 0.0 }
 0x30e   :  { %560 = vadd.xlane.f32.xlu0 %v559_v47 }
 0x397   :  { %v561_v48 = vpop.xlane.xlu0 %560 }
 0x398   :  { %v565_v49 = vmul.f32 0.020833334, %v561_v48 }
 0x39a   :  { %v4219_v50 = vsub.f32 %v555_v46, %v565_v49  ;;  %v562_v49 = vsel %vm186_vm3, %v4216_v45, 0.0 }
 0x39c   :  { %v569_v51 = vmul.f32 %v4219_v50, %v4219_v50 }
 0x39e   :  { %v571_v52 = vsel %vm186_vm3, %v569_v51, 0.0 }
 0x39f   :  { %572 = vadd.xlane.f32.xlu1 %v571_v52 }
 0x428   :  { %v573_v14 = vpop.xlane.xlu1 %572 }
 0x429   :  { %v577_v15 = vmul.f32 0.020833334, %v573_v14  ;;  %v4371_v14 = vld [vmem:[#allocation3 + $0x88] sm:$0xff] }
 0x42b   :  { %v579_v16 = vadd.f32 1e-05, %v577_v15  ;;  %v4373_v15 = vld [vmem:[#allocation3 + $0x80] sm:$0xff] }
 0x42d   :  { %3615 = vrsqrt.f32 %v579_v16  ;;  %v4376_v16 = vld [vmem:[#allocation3 + $0x78] sm:$0xff] }
 0x43a   :  { %v3616_v17 = vpop.eup %3615 }
 0x43b   :  { %v583_v19 = vmul.f32 %v3616_v17, %v4219_v50  ;;  %v4379_v17 = vld [vmem:[#allocation3 + $0x70] sm:$0xff] }
 0x43d   :  { %v591_v21 = vmul.f32 %v4303_v18, %v583_v19  ;;  %v4384_v19 = vld [vmem:[%s5138_s14 + $0xb8] sm:$0xff] }
 0x43e   :  { %958 = vmatprep.subr.mxu0 %v4384_v19 }
 0x43f   :  { %v599_v22 = vadd.f32 %v4309_v20, %v591_v21  ;;  %v4387_v21 = vld [vmem:[#allocation3 + $0x68] sm:$0xff]  ;;  %959 = vmatpush1.msra.mxu0 %v4396_v23 }
 0x440   :  { %960 = vmatprep.subr.mxu0 %v4403_v26 }
 0x441   :  { %3424 = vmatmul.mubr.msk.f32.vlgmr.msra.gmra.mxu1 %vm186_vm3, %v599_v22  ;;  %v4391_v22 = vld [vmem:[#allocation3 + $0x60] sm:$0xff] }
 0x442   :  { %741 = vmatprep.mubr.f32.mxu1 %v5147_v12  ;;  %883 = vmatpush1.msra.mxu1 %v4356_v3 }
 0x443   :  { %884 = vmatprep.subr.mxu1 %v4358_v5 }
 0x444   :  { %885 = vmatpush1.msra.mxu1 %v4361_v7 }
 0x445   :  { %886 = vmatprep.subr.mxu1 %v4366_v9 }
 0x446   :  { %887 = vmatpush1.msra.mxu1 %v4369_v10 }
 0x447   :  { %888 = vmatprep.subr.mxu1 %v4371_v14 }
 0x448   :  { %889 = vmatpush1.msra.mxu1 %v4373_v15 }
 0x449   :  { %890 = vmatprep.subr.mxu1 %v4376_v16 }
 0x44a   :  { %891 = vmatpush1.msra.mxu1 %v4379_v17 }
 0x44b   :  { %892 = vmatprep.subr.mxu1 %v4387_v21 }
 0x44c   :  { %893 = vmatpush1.msra.mxu1 %v4391_v22 }
 0x44d   :  { %1109 = vmatprep.subr.mxu1 %v4230_v55 }
 0x501   :  { %v737_v30 = vpop.f32.mrf.mxu1 }
 0x502   :  { %v4331_v32 = vadd.f32 %v737_v30, %v4324_v28  ;;  %v4410_v30 = vld [vmem:[%s5138_s14 + $0xa0] sm:$0xff] }
 0x503   :  { %v739_v33 = vpop.f32.mrf.mxu1  ;;  %961 = vmatpush1.msra.mxu0 %v4410_v30 }
 0x504   :  { %v824_v34 = vadd.f32 %v819_v31, %v4331_v32  ;;  %v4335_v35 = vadd.f32 %v739_v33, %v4328_v29  ;;  %v4417_v31 = vld [vmem:[%s5138_s14 + $0x98] sm:$0xff]  ;;  %v4424_v33 = vld [vmem:[%s5138_s14 + $0x90] sm:$0xff] }
 0x505   :  { %962 = vmatprep.subr.mxu0 %v4417_v31 }
 0x506   :  { %3617 = vtanh.f32 %v824_v34  ;;  %v825_v37 = vadd.f32 %v821_v36, %v4335_v35  ;;  %v3426_v40 = vmul.f32 -1.442695, %v824_v34  ;;  %963 = vmatpush1.msra.mxu0 %v4424_v33  ;;  %v4430_v34 = vld [vmem:[%s5138_s14 + $0x88] sm:$0xff] }
 0x507   :  { %964 = vmatprep.subr.mxu0 %v4430_v34 }
 0x508   :  { %3619 = vtanh.f32 %v825_v37 }
 0x509   :  { %3621 = vpow2.f32 %v3426_v40 }
 0x513   :  { %v3618_v38 = vpop.eup %3617 }
 0x514   :  { %843 = vrot.lane.b32.xlu0 %v3618_v38, %s3959_s13  ;;  %v4442_v38 = vld [vmem:[%s5138_s14 + $0x78] sm:$0xff] }
 0x515   :  { %v3620_v39 = vpop.eup %3619 }
 0x516   :  { %845 = vrot.lane.b32.xlu1 %v3620_v39, %s3959_s13  ;;  %v3622_v41 = vpop.eup %3621  ;;  %v4448_v39 = vld [vmem:[%s5138_s14 + $0x70] sm:$0xff] }
 0x517   :  { %v829_v42 = vadd.f32 1.0, %v3622_v41  ;;  %v4454_v41 = vld [vmem:[%s5138_s14 + $0x68] sm:$0xff] }
 0x519   :  { %3623 = vrcp.f32 %v829_v42  ;;  %v4460_v42 = vld [vmem:[%s5138_s14 + $0x60] sm:$0xff] }
 0x526   :  { %v3624_v46 = vpop.eup %3623 }
 0x527   :  { %v840_v50 = vmul.f32 0.0, %v3624_v46 }
 0x586   :  { %v844_v43 = vpop.permute.xlu0 %843 }
 0x588   :  { %v846_v44 = vpop.permute.xlu1 %845 }
 0x589   :  { %v848_v47 = vsel %vm847_vm4, %v844_v43, %v846_v44 }
 0x58a   :  { %v850_v48 = vmul.f32 %v3624_v46, %v848_v47 }
 0x58c   :  { %852 = vrot.lane.b32.xlu1 %v850_v48, %s3960_s1 }
 0x5b0   :  { %563 = vadd.xlane.f32.xlu1 %v562_v49 }
 0x5fe   :  { %v853_v51 = vpop.permute.xlu1 %852 }
 0x5ff   :  { %v4344_v52 = vadd.f32 %v853_v51, %v840_v50 }
 0x601   :  { %3625 = vtanh.f32 %v4344_v52 }
 0x60e   :  { %v3626_v53 = vpop.eup %3625 }
 0x60f   :  { %858 = vrot.lane.b32.xlu0 %v3626_v53, %s3961_s22 }
 0x639   :  { %v564_v54 = vpop.xlane.xlu1 %563 }
 0x63a   :  { %v566_v56 = vmul.f32 0.020833334, %v564_v54 }
 0x63c   :  { %v4349_v58 = vsub.f32 %v4216_v45, %v566_v56  ;;  %v3427_v45 = vmul.f32 -1.442695, %v825_v37  ;;  %v4436_v37 = vld [vmem:[%s5138_s14 + $0x80] sm:$0xff] }
 0x63d   :  { %965 = vmatpush1.msra.mxu0 %v4436_v37 }
 0x63e   :  { %v570_v60 = vmul.f32 %v4349_v58, %v4349_v58  ;;  %3627 = vpow2.f32 %v3427_v45  ;;  %966 = vmatprep.subr.mxu0 %v4442_v38 }
 0x63f   :  { %967 = vmatpush1.msra.mxu0 %v4448_v39 }
 0x640   :  { %v574_v62 = vsel %vm186_vm3, %v570_v60, 0.0  ;;  %968 = vmatprep.subr.mxu0 %v4454_v41  ;;  %v3423_v60 = vld [vmem:[%s5140_s16 + $0x2] sm:$0x3] }
 0x641   :  { %575 = vadd.xlane.f32.xlu0 %v574_v62  ;;  %969 = vmatpush1.msra.mxu0 %v4460_v42  ;;  %v4521_v45 = vrot.slane %v3423_v60, %v657_v25 }
 0x642   :  { %1231 = vmatprep.subr.mxu0 %v4354_v0 }
 0x64b   :  { %v3628_v36 = vpop.eup %3627 }
 0x64c   :  { %v837_v40 = vadd.f32 1.0, %v3628_v36 }
 0x64e   :  { %3629 = vrcp.f32 %v837_v40 }
 0x65b   :  { %v3630_v43 = vpop.eup %3629 }
 0x681   :  { %v859_v44 = vpop.permute.xlu0 %858 }
 0x682   :  { %v861_v46 = vmul.f32 %v3630_v43, %v859_v44  ;;  %v4525_v43 = vrot.slane %v3423_v60, %v661_v27 }
 0x684   :  { %934 = vrot.lane.b32.xlu0 %v861_v46, %s3962_s7 }
 0x6ca   :  { %v576_v47 = vpop.xlane.xlu0 %575 }
 0x6cb   :  { %v578_v48 = vmul.f32 0.020833334, %v576_v47 }
 0x6cd   :  { %v580_v49 = vadd.f32 1e-05, %v578_v48 }
 0x6cf   :  { %3631 = vrsqrt.f32 %v580_v49 }
 0x6dc   :  { %v3632_v50 = vpop.eup %3631 }
 0x6dd   :  { %v584_v51 = vmul.f32 %v3632_v50, %v4349_v58 }
 0x6df   :  { %v592_v53 = vmul.f32 %v4303_v18, %v584_v51 }
 0x6e1   :  { %v600_v54 = vadd.f32 %v4309_v20, %v592_v53 }
 0x6e3   :  { %3425 = vmatmul.mubr.msk.f32.gmra.mxu1 %vm186_vm3, %v600_v54 }
 0x6e4   :  { %926 = vmatprep.mubr.f32.mxu1 %v5147_v12 }
 0x6e7   :  { %927 = vmatmul.mubr.f32.vlgmr.msra.gmra.mxu1 %v5147_v12 }
 0x6e8   :  { %1110 = vmatpush1.msra.mxu1 %v4236_v57  ;;  %1153 = vmatprep.mubr.f32.mxu1 %v5147_v12 }
 0x6e9   :  { %1111 = vmatprep.subr.mxu1 %v4242_v59 }
 0x6ea   :  { %1112 = vmatpush1.msra.mxu1 %v4247_v61 }
 0x6eb   :  { %1113 = vmatprep.subr.mxu1 %v4253_v63 }
 0x6ec   :  { %1114 = vmatpush1.msra.mxu1 %v4259_v1 }
 0x6ed   :  { %1115 = vmatprep.subr.mxu1 %v4261_v2 }
 0x6ee   :  { %1116 = vmatpush1.msra.mxu1 %v4267_v4 }
 0x6ef   :  { %1117 = vmatprep.subr.mxu1 %v4273_v6 }
 0x6f0   :  { %1118 = vmatpush1.msra.mxu1 %v4279_v8 }
 0x6f1   :  { %1119 = vmatprep.subr.mxu1 %v4289_v11 }
 0x6f2   :  { %1120 = vmatpush1.msra.mxu1 %v4295_v13 }
 0x6f3   :  { %1308 = vmatprep.subr.mxu1 %v4384_v19 }
 0x6f6   :  { %v935_v18 = vpop.permute.xlu0 %934 }
 0x6f7   :  { %3428 = vmatmul.mubr.msk.f32.vlgmr.msra.gmra.mxu0 %vm186_vm3, %v935_v18  ;;  %3434 = vmatmul.mubr.msk.f32.vlgmr.msra.gmra.mxu1 %vm186_vm3, %v935_v18 }
 0x6f8   :  { %1232 = vmatpush1.msra.mxu0 %v4356_v3  ;;  %1309 = vmatpush1.msra.mxu1 %v4396_v23 }
 0x6f9   :  { %1233 = vmatprep.subr.mxu0 %v4358_v5  ;;  %1310 = vmatprep.subr.mxu1 %v4403_v26 }
 0x6fa   :  { %1234 = vmatpush1.msra.mxu0 %v4361_v7  ;;  %1311 = vmatpush1.msra.mxu1 %v4410_v30 }
 0x6fb   :  { %1235 = vmatprep.subr.mxu0 %v4366_v9  ;;  %1312 = vmatprep.subr.mxu1 %v4417_v31 }
 0x6fc   :  { %1236 = vmatpush1.msra.mxu0 %v4369_v10  ;;  %1275 = vmatprep.mubr.f32.mxu0 %v5147_v12 }
 0x6fd   :  { %1237 = vmatprep.subr.mxu0 %v4371_v14  ;;  %1313 = vmatpush1.msra.mxu1 %v4424_v33 }
 0x6fe   :  { %1238 = vmatpush1.msra.mxu0 %v4373_v15  ;;  %1314 = vmatprep.subr.mxu1 %v4430_v34 }
 0x6ff   :  { %1239 = vmatprep.subr.mxu0 %v4376_v16  ;;  %1315 = vmatpush1.msra.mxu1 %v4436_v37 }
 0x700   :  { %1240 = vmatpush1.msra.mxu0 %v4379_v17  ;;  %1316 = vmatprep.subr.mxu1 %v4442_v38 }
 0x701   :  { %1241 = vmatprep.subr.mxu0 %v4387_v21  ;;  %1317 = vmatpush1.msra.mxu1 %v4448_v39 }
 0x702   :  { %1242 = vmatpush1.msra.mxu0 %v4391_v22  ;;  %1318 = vmatprep.subr.mxu1 %v4454_v41 }
 0x703   :  { %1437 = vmatprep.subr.mxu0 %v4230_v55  ;;  %1319 = vmatpush1.msra.mxu1 %v4460_v42 }
 0x704   :  { %1352 = vmatprep.mubr.f32.mxu1 %v5147_v12  ;;  %1559 = vmatprep.subr.mxu1 %v4354_v0 }
 0x7a3   :  { %v4512_v20 = vpop.f32.mrf.mxu1 }
 0x7a5   :  { %v4514_v56 = vpop.f32.mrf.mxu1 }
 0x7a7   :  { %v928_v58 = vpop.f32.mrf.mxu1 }
 0x7a9   :  { %v930_v62 = vpop.f32.mrf.mxu1 }
 0x7b7   :  { %v1004_v36 = vpop.f32.mrf.mxu0  ;;  %v1155_v40 = vpop.f32.mrf.mxu1 }
 0x7b8   :  { %v1005_v44 = vadd.f32 %v1004_v36, %v928_v58  ;;  %v1162_v51 = vrot.slane %v1155_v40, 6 }
 0x7b9   :  { %v1006_v46 = vpop.f32.mrf.mxu0  ;;  %v1157_v47 = vpop.f32.mrf.mxu1 }
 0x7ba   :  { %v1020_v48 = vadd.f32 %v4521_v45, %v1005_v44  ;;  %v1007_v49 = vadd.f32 %v1006_v46, %v930_v62  ;;  %v1163_v50 = vrot.slane %v1157_v47, 6  ;;  %v1166_v54 = vadd.f32 %v1162_v51, %v4331_v32 }
 0x7bc   :  { %3633 = vtanh.f32 %v1020_v48  ;;  %v1021_v53 = vadd.f32 %v4525_v43, %v1007_v49  ;;  %v1167_v25 = vadd.f32 %v1163_v50, %v4335_v35  ;;  %v3429_v60 = vmul.f32 -1.442695, %v1020_v48 }
 0x7bd   :  { %v3435_v62 = vmul.f32 -1.442695, %v1166_v54 }
 0x7be   :  { %3635 = vtanh.f32 %v1021_v53 }
 0x7bf   :  { %3637 = vtanh.f32 %v1167_v25 }
 0x7c0   :  { %3639 = vtanh.f32 %v1166_v54 }
 0x7c1   :  { %3641 = vpow2.f32 %v3429_v60 }
 0x7c2   :  { %3643 = vpow2.f32 %v3435_v62 }
 0x7c9   :  { %v3634_v24 = vpop.eup %3633 }
 0x7ca   :  { %1039 = vrot.lane.b32.xlu1 %v3634_v24, %s3959_s13 }
 0x7cb   :  { %v3636_v27 = vpop.eup %3635 }
 0x7cc   :  { %v3638_v18 = vpop.eup %3637 }
 0x7cd   :  { %1190 = vrot.lane.b32.xlu0 %v3638_v18, %s3959_s13  ;;  %v3640_v58 = vpop.eup %3639 }
 0x7ce   :  { %1041 = vrot.lane.b32.xlu1 %v3636_v27, %s3959_s13  ;;  %v3642_v36 = vpop.eup %3641 }
 0x7cf   :  { %v1025_v40 = vadd.f32 1.0, %v3642_v36  ;;  %v3644_v44 = vpop.eup %3643  ;;  %v1183_v36 = vrot.slane %v4344_v52, 6 }
 0x7d0   :  { %v1171_v46 = vadd.f32 1.0, %v3644_v44 }
 0x7d1   :  { %3645 = vrcp.f32 %v1025_v40 }
 0x7d2   :  { %1188 = vrot.lane.b32.xlu1 %v3640_v58, %s3959_s13  ;;  %3647 = vrcp.f32 %v1171_v46 }
 0x7de   :  { %v3646_v50 = vpop.eup %3645 }
 0x7df   :  { %v3648_v48 = vpop.eup %3647  ;;  %v1036_v60 = vmul.f32 0.0, %v3646_v50 }
 0x7e0   :  { %v1185_v44 = vmul.f32 %v3648_v48, %v1183_v36 }
 0x83c   :  { %v1040_v47 = vpop.permute.xlu1 %1039 }
 0x83f   :  { %v1191_v27 = vpop.permute.xlu0 %1190 }
 0x840   :  { %v1042_v49 = vpop.permute.xlu1 %1041 }
 0x841   :  { %v1043_v51 = vsel %vm847_vm4, %v1040_v47, %v1042_v49 }
 0x842   :  { %v1045_v24 = vmul.f32 %v3646_v50, %v1043_v51  ;;  %v3430_v50 = vmul.f32 -1.442695, %v1021_v53 }
 0x844   :  { %v1189_v18 = vpop.permute.xlu1 %1188  ;;  %1047 = vrot.lane.b32.xlu1 %v1045_v24, %s3960_s1  ;;  %v3436_v24 = vmul.f32 -1.442695, %v1167_v25 }
 0x845   :  { %v1192_v54 = vsel %vm847_vm4, %v1189_v18, %v1191_v27 }
 0x846   :  { %v1194_v58 = vmul.f32 %v3648_v48, %v1192_v54 }
 0x848   :  { %1196 = vrot.lane.b32.xlu0 %v1194_v58, %s3960_s1 }
 0x8b6   :  { %v1048_v62 = vpop.permute.xlu1 %1047 }
 0x8b7   :  { %v4540_v40 = vadd.f32 %v1048_v62, %v1036_v60 }
 0x8b9   :  { %3649 = vtanh.f32 %v4540_v40 }
 0x8ba   :  { %v1197_v46 = vpop.permute.xlu0 %1196 }
 0x8bb   :  { %v4543_v47 = vadd.f32 %v1197_v46, %v1185_v44 }
 0x8bd   :  { %3651 = vtanh.f32 %v4543_v47 }
 0x8be   :  { %3653 = vpow2.f32 %v3430_v50 }
 0x8bf   :  { %3655 = vpow2.f32 %v3436_v24 }
 0x8c6   :  { %v3650_v49 = vpop.eup %3649 }
 0x8c7   :  { %1053 = vrot.lane.b32.xlu1 %v3650_v49, %s3961_s22 }
 0x8ca   :  { %v3652_v51 = vpop.eup %3651 }
 0x8cb   :  { %1202 = vrot.lane.b32.xlu0 %v3652_v51, %s3961_s22  ;;  %v3654_v52 = vpop.eup %3653 }
 0x8cc   :  { %v1033_v27 = vadd.f32 1.0, %v3654_v52  ;;  %v3656_v18 = vpop.eup %3655 }
 0x8cd   :  { %v1179_v48 = vadd.f32 1.0, %v3656_v18 }
 0x8ce   :  { %3657 = vrcp.f32 %v1033_v27 }
 0x8cf   :  { %3659 = vrcp.f32 %v1179_v48 }
 0x8db   :  { %v3658_v54 = vpop.eup %3657 }
 0x8dc   :  { %v3660_v62 = vpop.eup %3659 }
 0x939   :  { %v1054_v58 = vpop.permute.xlu1 %1053 }
 0x93a   :  { %v4548_v60 = vmul.f32 %v3658_v54, %v1054_v58 }
 0x93c   :  { %5158 = vst [vmem:[#allocation9_spill] sm:$0xff] %v4548_v60  ;;  %1207 = vrot.lane.b32.xlu1 %v4548_v60, %s3962_s7 }
 0x93d   :  { %v1203_v36 = vpop.permute.xlu0 %1202 }
 0x93e   :  { %v1205_v44 = vmul.f32 %v3660_v62, %v1203_v36 }
 0x940   :  { %v1283_v53 = vrot.slane %v1205_v44, 2 }
 0x942   :  { %1284 = vrot.lane.b32.xlu0 %v1283_v53, %s3962_s7 }
 0x9ae   :  { %v1208_v25 = vpop.permute.xlu1 %1207 }
 0x9af   :  { %3437 = vmatmul.mubr.msk.f32.vlgmr.msra.gmra.mxu0 %vm186_vm3, %v1208_v25 }
 0x9b0   :  { %1438 = vmatpush1.msra.mxu0 %v4236_v57  ;;  %1481 = vmatprep.mubr.f32.mxu0 %v5147_v12 }
 0x9b1   :  { %1439 = vmatprep.subr.mxu0 %v4242_v59 }
 0x9b2   :  { %1440 = vmatpush1.msra.mxu0 %v4247_v61 }
 0x9b3   :  { %1441 = vmatprep.subr.mxu0 %v4253_v63 }
 0x9b4   :  { %1442 = vmatpush1.msra.mxu0 %v4259_v1  ;;  %v1285_v46 = vpop.permute.xlu0 %1284 }
 0x9b5   :  { %1443 = vmatprep.subr.mxu0 %v4261_v2  ;;  %3438 = vmatmul.mubr.msk.f32.vlgmr.msra.gmra.mxu1 %vm186_vm3, %v1285_v46 }
 0x9b6   :  { %1444 = vmatpush1.msra.mxu0 %v4267_v4  ;;  %1560 = vmatpush1.msra.mxu1 %v4356_v3 }
 0x9b7   :  { %1445 = vmatprep.subr.mxu0 %v4273_v6  ;;  %1561 = vmatprep.subr.mxu1 %v4358_v5 }
 0x9b8   :  { %1446 = vmatpush1.msra.mxu0 %v4279_v8  ;;  %1562 = vmatpush1.msra.mxu1 %v4361_v7 }
 0x9b9   :  { %1447 = vmatprep.subr.mxu0 %v4289_v11  ;;  %1563 = vmatprep.subr.mxu1 %v4366_v9 }
 0x9ba   :  { %1448 = vmatpush1.msra.mxu0 %v4295_v13  ;;  %1564 = vmatpush1.msra.mxu1 %v4369_v10 }
 0x9bb   :  { %3442 = vmatmul.mubr.msk.f32.vlgmr.msra.gmra.mxu0 %vm186_vm3, %v1285_v46  ;;  %1565 = vmatprep.subr.mxu1 %v4371_v14 }
 0x9bc   :  { %1566 = vmatpush1.msra.mxu1 %v4373_v15  ;;  %1636 = vmatprep.subr.mxu0 %v4384_v19 }
 0x9bd   :  { %1567 = vmatprep.subr.mxu1 %v4376_v16  ;;  %1637 = vmatpush1.msra.mxu0 %v4396_v23 }
 0x9be   :  { %1568 = vmatpush1.msra.mxu1 %v4379_v17  ;;  %1638 = vmatprep.subr.mxu0 %v4403_v26 }
 0x9bf   :  { %1569 = vmatprep.subr.mxu1 %v4387_v21  ;;  %1639 = vmatpush1.msra.mxu0 %v4410_v30 }
 0x9c0   :  { %1570 = vmatpush1.msra.mxu1 %v4391_v22  ;;  %1603 = vmatprep.mubr.f32.mxu1 %v5147_v12 }
 0x9c1   :  { %1640 = vmatprep.subr.mxu0 %v4417_v31  ;;  %1765 = vmatprep.subr.mxu1 %v4230_v55 }
 0x9c2   :  { %1641 = vmatpush1.msra.mxu0 %v4424_v33  ;;  %1680 = vmatprep.mubr.f32.mxu0 %v5147_v12 }
 0x9c3   :  { %1642 = vmatprep.subr.mxu0 %v4430_v34 }
 0x9c4   :  { %1643 = vmatpush1.msra.mxu0 %v4436_v37 }
 0x9c5   :  { %1644 = vmatprep.subr.mxu0 %v4442_v38 }
 0x9c6   :  { %1645 = vmatpush1.msra.mxu0 %v4448_v39 }
 0x9c7   :  { %1646 = vmatprep.subr.mxu0 %v4454_v41 }
 0x9c8   :  { %1647 = vmatpush1.msra.mxu0 %v4460_v42 }
 0x9c9   :  { %1887 = vmatprep.subr.mxu0 %v4354_v0 }
 0xa6f   :  { %v1277_v49 = vpop.f32.mrf.mxu0 }
 0xa71   :  { %v1279_v24 = vpop.f32.mrf.mxu0 }
 0xa75   :  { %v1354_v51 = vpop.f32.mrf.mxu1 }
 0xa76   :  { %v1355_v50 = vadd.f32 %v1354_v51, %v1277_v49 }
 0xa77   :  { %v1356_v52 = vpop.f32.mrf.mxu1 }
 0xa78   :  { %v1359_v27 = vadd.f32 %v1355_v50, %v4521_v45  ;;  %v1357_v18 = vadd.f32 %v1356_v52, %v1279_v24 }
 0xa7a   :  { %3661 = vtanh.f32 %v1359_v27  ;;  %v1360_v48 = vadd.f32 %v1357_v18, %v4525_v43  ;;  %v3439_v50 = vmul.f32 -1.442695, %v1359_v27 }
 0xa7b   :  { %v1483_v54 = vpop.f32.mrf.mxu0 }
 0xa7c   :  { %v1490_v58 = vrot.slane %v1483_v54, 4  ;;  %3663 = vtanh.f32 %v1360_v48 }
 0xa7d   :  { %v1485_v62 = vpop.f32.mrf.mxu0 }
 0xa7e   :  { %v1494_v36 = vadd.f32 %v1490_v58, %v4331_v32  ;;  %v1491_v44 = vrot.slane %v1485_v62, 4 }
 0xa80   :  { %3665 = vtanh.f32 %v1494_v36  ;;  %v1495_v53 = vadd.f32 %v1491_v44, %v4335_v35  ;;  %v3443_v24 = vmul.f32 -1.442695, %v1494_v36 }
 0xa82   :  { %3667 = vtanh.f32 %v1495_v53 }
 0xa83   :  { %3669 = vpow2.f32 %v3439_v50 }
 0xa84   :  { %3671 = vpow2.f32 %v3443_v24 }
 0xa87   :  { %v3662_v25 = vpop.eup %3661 }
 0xa88   :  { %1378 = vrot.lane.b32.xlu1 %v3662_v25, %s3959_s13 }
 0xa89   :  { %v3664_v46 = vpop.eup %3663 }
 0xa8a   :  { %1380 = vrot.lane.b32.xlu0 %v3664_v46, %s3959_s13 }
 0xa8d   :  { %v3666_v49 = vpop.eup %3665 }
 0xa8e   :  { %1516 = vrot.lane.b32.xlu1 %v3666_v49, %s3959_s13 }
 0xa8f   :  { %v3668_v51 = vpop.eup %3667 }
 0xa90   :  { %1518 = vrot.lane.b32.xlu0 %v3668_v51, %s3959_s13  ;;  %v3670_v52 = vpop.eup %3669 }
 0xa91   :  { %v1364_v18 = vadd.f32 1.0, %v3670_v52  ;;  %v3672_v54 = vpop.eup %3671 }
 0xa92   :  { %v1499_v58 = vadd.f32 1.0, %v3672_v54  ;;  %v1511_v54 = vrot.slane %v4543_v47, 6 }
 0xa93   :  { %3673 = vrcp.f32 %v1364_v18 }
 0xa94   :  { %3675 = vrcp.f32 %v1499_v58 }
 0xaa0   :  { %v3674_v25 = vpop.eup %3673 }
 0xaa1   :  { %v3676_v27 = vpop.eup %3675  ;;  %v1375_v24 = vmul.f32 %v3674_v25, %v4540_v40  ;;  %v3440_v40 = vmul.f32 -1.442695, %v1360_v48 }
 0xaa2   :  { %v1513_v58 = vmul.f32 %v3676_v27, %v1511_v54 }
 0xafa   :  { %v1379_v62 = vpop.permute.xlu1 %1378 }
 0xafc   :  { %v1381_v44 = vpop.permute.xlu0 %1380 }
 0xafd   :  { %v1382_v46 = vsel %vm847_vm4, %v1379_v62, %v1381_v44 }
 0xafe   :  { %v1384_v12 = vmul.f32 %v3674_v25, %v1382_v46  ;;  %v3444_v25 = vmul.f32 -1.442695, %v1495_v53 }
 0xb00   :  { %1386 = vrot.lane.b32.xlu1 %v1384_v12, %s3960_s1  ;;  %v1517_v49 = vpop.permute.xlu1 %1516 }
 0xb02   :  { %v1519_v51 = vpop.permute.xlu0 %1518 }
 0xb03   :  { %v1520_v36 = vsel %vm847_vm4, %v1517_v49, %v1519_v51 }
 0xb04   :  { %v1522_v50 = vmul.f32 %v3676_v27, %v1520_v36 }
 0xb06   :  { %1524 = vrot.lane.b32.xlu0 %v1522_v50, %s3960_s1 }
 0xb72   :  { %v1387_v52 = vpop.permute.xlu1 %1386 }
 0xb73   :  { %v4608_v18 = vadd.f32 %v1387_v52, %v1375_v24 }
 0xb75   :  { %3677 = vtanh.f32 %v4608_v18 }
 0xb78   :  { %v1525_v62 = vpop.permute.xlu0 %1524 }
 0xb79   :  { %v4612_v12 = vadd.f32 %v1525_v62, %v1513_v58  ;;  %v5159_v62 = vmov 0.0  }
 0xb7b   :  { %3679 = vtanh.f32 %v4612_v12 }
 0xb7c   :  { %3681 = vpow2.f32 %v3440_v40 }
 0xb7d   :  { %3683 = vpow2.f32 %v3444_v25 }
 0xb82   :  { %v3678_v44 = vpop.eup %3677 }
 0xb83   :  { %1392 = vrot.lane.b32.xlu1 %v3678_v44, %s3961_s22 }
 0xb88   :  { %v3680_v46 = vpop.eup %3679 }
 0xb89   :  { %1530 = vrot.lane.b32.xlu0 %v3680_v46, %s3961_s22  ;;  %v3682_v49 = vpop.eup %3681 }
 0xb8a   :  { %v1372_v47 = vadd.f32 1.0, %v3682_v49  ;;  %v3684_v51 = vpop.eup %3683 }
 0xb8b   :  { %v1507_v27 = vadd.f32 1.0, %v3684_v51 }
 0xb8c   :  { %3685 = vrcp.f32 %v1372_v47 }
 0xb8d   :  { %3687 = vrcp.f32 %v1507_v27 }
 0xb99   :  { %v3686_v36 = vpop.eup %3685 }
 0xb9a   :  { %v3688_v52 = vpop.eup %3687 }
 0xbf5   :  { %v1393_v50 = vpop.permute.xlu1 %1392 }
 0xbf6   :  { %v4617_v24 = vmul.f32 %v3686_v36, %v1393_v50 }
 0xbf8   :  { %1535 = vrot.lane.b32.xlu1 %v4617_v24, %s3962_s7 }
 0xbfb   :  { %v1531_v54 = vpop.permute.xlu0 %1530 }
 0xbfc   :  { %v1533_v58 = vmul.f32 %v3688_v52, %v1531_v54 }
 0xbfe   :  { %v1611_v48 = vrot.slane %v1533_v58, 4 }
 0xc00   :  { %1612 = vrot.lane.b32.xlu0 %v1611_v48, %s3962_s7 }
 0xc6a   :  { %v1536_v53 = vpop.permute.xlu1 %1535 }
 0xc6b   :  { %3445 = vmatmul.mubr.msk.f32.vlgmr.msra.gmra.mxu1 %vm186_vm3, %v1536_v53 }
 0xc6c   :  { %1766 = vmatpush1.msra.mxu1 %v4236_v57  ;;  %1809 = vmatprep.mubr.f32.mxu1 %v5159_v62 }
 0xc6d   :  { %1767 = vmatprep.subr.mxu1 %v4242_v59 }
 0xc6e   :  { %1768 = vmatpush1.msra.mxu1 %v4247_v61 }
 0xc6f   :  { %1769 = vmatprep.subr.mxu1 %v4253_v63 }
 0xc70   :  { %1770 = vmatpush1.msra.mxu1 %v4259_v1 }
 0xc71   :  { %1771 = vmatprep.subr.mxu1 %v4261_v2 }
 0xc72   :  { %1772 = vmatpush1.msra.mxu1 %v4267_v4  ;;  %v1613_v44 = vpop.permute.xlu0 %1612 }
 0xc73   :  { %3446 = vmatmul.mubr.msk.f32.vlgmr.msra.gmra.mxu0 %vm186_vm3, %v1613_v44  ;;  %1773 = vmatprep.subr.mxu1 %v4273_v6 }
 0xc74   :  { %1774 = vmatpush1.msra.mxu1 %v4279_v8  ;;  %1888 = vmatpush1.msra.mxu0 %v4356_v3 }
 0xc75   :  { %1775 = vmatprep.subr.mxu1 %v4289_v11  ;;  %1889 = vmatprep.subr.mxu0 %v4358_v5 }
 0xc76   :  { %1776 = vmatpush1.msra.mxu1 %v4295_v13  ;;  %1890 = vmatpush1.msra.mxu0 %v4361_v7 }
 0xc77   :  { %3450 = vmatmul.mubr.msk.f32.vlgmr.msra.gmra.mxu1 %vm186_vm3, %v1613_v44  ;;  %1964 = vmatprep.subr.mxu1 %v4384_v19 }
 0xc78   :  { %1965 = vmatpush1.msra.mxu1 %v4396_v23  ;;  %1891 = vmatprep.subr.mxu0 %v4366_v9 }
 0xc79   :  { %1966 = vmatprep.subr.mxu1 %v4403_v26  ;;  %1892 = vmatpush1.msra.mxu0 %v4369_v10 }
 0xc7a   :  { %1967 = vmatpush1.msra.mxu1 %v4410_v30  ;;  %1893 = vmatprep.subr.mxu0 %v4371_v14 }
 0xc7b   :  { %1968 = vmatprep.subr.mxu1 %v4417_v31  ;;  %1894 = vmatpush1.msra.mxu0 %v4373_v15 }
 0xc7c   :  { %1969 = vmatpush1.msra.mxu1 %v4424_v33  ;;  %1895 = vmatprep.subr.mxu0 %v4376_v16 }
 0xc7d   :  { %1970 = vmatprep.subr.mxu1 %v4430_v34  ;;  %1896 = vmatpush1.msra.mxu0 %v4379_v17 }
 0xc7e   :  { %1971 = vmatpush1.msra.mxu1 %v4436_v37  ;;  %1897 = vmatprep.subr.mxu0 %v4387_v21 }
 0xc7f   :  { %1972 = vmatprep.subr.mxu1 %v4442_v38  ;;  %2008 = vmatprep.mubr.f32.mxu1 %v5159_v62 }
 0xc80   :  { %1973 = vmatpush1.msra.mxu1 %v4448_v39  ;;  %1898 = vmatpush1.msra.mxu0 %v4391_v22 }
 0xc81   :  { %1974 = vmatprep.subr.mxu1 %v4454_v41  ;;  %1931 = vmatprep.mubr.f32.mxu0 %v5159_v62 }
 0xc82   :  { %1975 = vmatpush1.msra.mxu1 %v4460_v42  ;;  %2093 = vmatprep.subr.mxu0 %v4230_v55 }
 0xc83   :  { %2209 = vmatprep.subr.mxu1 %v4354_v0 }
 0xd2b   :  { %v1605_v57 = vpop.f32.mrf.mxu1 }
 0xd2d   :  { %v1607_v61 = vpop.f32.mrf.mxu1 }
 0xd33   :  { %v1682_v59 = vpop.f32.mrf.mxu0 }
 0xd34   :  { %v1683_v4 = vadd.f32 %v1682_v59, %v1605_v57 }
 0xd35   :  { %v1684_v1 = vpop.f32.mrf.mxu0 }
 0xd36   :  { %v1685_v13 = vadd.f32 %v1684_v1, %v1607_v61  ;;  %v1687_v40 = vadd.f32 %v1683_v4, %v4521_v45 }
 0xd37   :  { %v1811_v63 = vpop.f32.mrf.mxu1 }
 0xd38   :  { %v1818_v2 = vrot.slane %v1811_v63, 2  ;;  %v1688_v55 = vadd.f32 %v1685_v13, %v4525_v43  ;;  %v3447_v51 = vmul.f32 -1.442695, %v1687_v40 }
 0xd39   :  { %v1813_v6 = vpop.f32.mrf.mxu1 }
 0xd3a   :  { %v1822_v8 = vadd.f32 %v1818_v2, %v4331_v32  ;;  %v1819_v11 = vrot.slane %v1813_v6, 2  ;;  %v1839_v2 = vrot.slane %v4612_v12, 6 }
 0xd3c   :  { %v1823_v46 = vadd.f32 %v1819_v11, %v4335_v35  ;;  %3689 = vtanh.f32 %v1822_v8  ;;  %v3451_v35 = vmul.f32 -1.442695, %v1822_v8 }
 0xd3e   :  { %3691 = vtanh.f32 %v1823_v46  ;;  %v3452_v12 = vmul.f32 -1.442695, %v1823_v46 }
 0xd3f   :  { %3693 = vtanh.f32 %v1687_v40 }
 0xd40   :  { %3695 = vtanh.f32 %v1688_v55 }
 0xd41   :  { %3697 = vpow2.f32 %v3451_v35 }
 0xd42   :  { %3699 = vpow2.f32 %v3447_v51 }
 0xd49   :  { %v3690_v25 = vpop.eup %3689 }
 0xd4a   :  { %1844 = vrot.lane.b32.xlu1 %v3690_v25, %s3959_s13 }
 0xd4b   :  { %v3692_v49 = vpop.eup %3691 }
 0xd4c   :  { %1846 = vrot.lane.b32.xlu0 %v3692_v49, %s3959_s13  ;;  %v3694_v47 = vpop.eup %3693 }
 0xd4d   :  { %v3696_v32 = vpop.eup %3695 }
 0xd4e   :  { %1706 = vrot.lane.b32.xlu1 %v3694_v47, %s3959_s13  ;;  %v3698_v27 = vpop.eup %3697  ;;  %v3448_v47 = vmul.f32 -1.442695, %v1688_v55 }
 0xd4f   :  { %v1827_v36 = vadd.f32 1.0, %v3698_v27  ;;  %v3700_v50 = vpop.eup %3699 }
 0xd50   :  { %1708 = vrot.lane.b32.xlu0 %v3696_v32, %s3959_s13  ;;  %v1692_v52 = vadd.f32 1.0, %v3700_v50 }
 0xd51   :  { %3701 = vrcp.f32 %v1827_v36 }
 0xd52   :  { %3703 = vrcp.f32 %v1692_v52 }
 0xd5e   :  { %v3702_v48 = vpop.eup %3701 }
 0xd5f   :  { %v3704_v61 = vpop.eup %3703  ;;  %v1841_v4 = vmul.f32 %v3702_v48, %v1839_v2 }
 0xd60   :  { %v1703_v11 = vmul.f32 %v3704_v61, %v4608_v18 }
 0xdbc   :  { %v1845_v54 = vpop.permute.xlu1 %1844 }
 0xdbe   :  { %v1847_v58 = vpop.permute.xlu0 %1846 }
 0xdbf   :  { %v1848_v53 = vsel %vm847_vm4, %v1845_v54, %v1847_v58 }
 0xdc0   :  { %v1850_v44 = vmul.f32 %v3702_v48, %v1848_v53  ;;  %v1707_v57 = vpop.permute.xlu1 %1706  ;;  %v4696_v53 = vld [vmem:[#allocation3 + $0x50] sm:$0xff] }
 0xdc2   :  { %v1709_v59 = vpop.permute.xlu0 %1708  ;;  %1852 = vrot.lane.b32.xlu1 %v1850_v44, %s3960_s1  ;;  %v4700_v44 = vld [vmem:[#allocation3 + $0x48] sm:$0xff] }
 0xdc3   :  { %v1710_v63 = vsel %vm847_vm4, %v1707_v57, %v1709_v59  ;;  %v4704_v57 = vld [vmem:[#allocation3 + $0x40] sm:$0xff]  ;;  %v4716_v59 = vld [vmem:[#allocation3 + $0x28] sm:$0xff] }
 0xdc4   :  { %v1712_v1 = vmul.f32 %v3704_v61, %v1710_v63 }
 0xdc6   :  { %1714 = vrot.lane.b32.xlu0 %v1712_v1, %s3960_s1 }
 0xe34   :  { %v1853_v6 = vpop.permute.xlu1 %1852 }
 0xe35   :  { %v4677_v8 = vadd.f32 %v1853_v6, %v1841_v4 }
 0xe37   :  { %3705 = vtanh.f32 %v4677_v8 }
 0xe38   :  { %v1715_v13 = vpop.permute.xlu0 %1714 }
 0xe39   :  { %v4681_v40 = vadd.f32 %v1715_v13, %v1703_v11 }
 0xe3b   :  { %3707 = vtanh.f32 %v4681_v40 }
 0xe3c   :  { %3709 = vpow2.f32 %v3452_v12 }
 0xe3d   :  { %3711 = vpow2.f32 %v3448_v47 }
 0xe44   :  { %v3706_v25 = vpop.eup %3705 }
 0xe45   :  { %1858 = vrot.lane.b32.xlu1 %v3706_v25, %s3961_s22 }
 0xe48   :  { %v3708_v49 = vpop.eup %3707 }
 0xe49   :  { %1720 = vrot.lane.b32.xlu0 %v3708_v49, %s3961_s22  ;;  %v3710_v32 = vpop.eup %3709 }
 0xe4a   :  { %v1835_v35 = vadd.f32 1.0, %v3710_v32  ;;  %v3712_v51 = vpop.eup %3711 }
 0xe4b   :  { %v1700_v27 = vadd.f32 1.0, %v3712_v51 }
 0xe4c   :  { %3713 = vrcp.f32 %v1835_v35 }
 0xe4d   :  { %3715 = vrcp.f32 %v1700_v27 }
 0xe59   :  { %v3714_v18 = vpop.eup %3713 }
 0xe5a   :  { %v3716_v54 = vpop.eup %3715 }
 0xeb7   :  { %v1859_v36 = vpop.permute.xlu1 %1858 }
 0xeb8   :  { %v1861_v50 = vmul.f32 %v3714_v18, %v1859_v36  ;;  %v2161_v36 = vrot.slane %v4677_v8, 6 }
 0xeba   :  { %v1939_v52 = vrot.slane %v1861_v50, 6 }
 0xebb   :  { %v1721_v58 = vpop.permute.xlu0 %1720 }
 0xebc   :  { %v4686_v48 = vmul.f32 %v3716_v54, %v1721_v58  ;;  %1940 = vrot.lane.b32.xlu0 %v1939_v52, %s3962_s7 }
 0xebe   :  { %1863 = vrot.lane.b32.xlu1 %v4686_v48, %s3962_s7 }
 0xf2e   :  { %v1941_v46 = vpop.permute.xlu0 %1940 }
 0xf2f   :  { %3454 = vmatmul.mubr.msk.f32.vlgmr.msra.gmra.mxu1 %vm186_vm3, %v1941_v46 }
 0xf30   :  { %v1864_v55 = vpop.permute.xlu1 %1863  ;;  %2210 = vmatpush1.msra.mxu1 %v4356_v3  ;;  %2253 = vmatprep.mubr.f32.mxu1 %v5159_v62  ;;  %v4708_v3 = vld [vmem:[#allocation3 + $0x38] sm:$0xff] }
 0xf31   :  { %3453 = vmatmul.mubr.msk.f32.vlgmr.msra.gmra.mxu0 %vm186_vm3, %v1864_v55  ;;  %2211 = vmatprep.subr.mxu1 %v4358_v5  ;;  %v4712_v5 = vld [vmem:[#allocation3 + $0x30] sm:$0xff] }
 0xf32   :  { %2094 = vmatpush1.msra.mxu0 %v4696_v53  ;;  %2137 = vmatprep.mubr.f32.mxu0 %v5159_v62 }
 0xf33   :  { %2095 = vmatprep.subr.mxu0 %v4700_v44  ;;  %2212 = vmatpush1.msra.mxu1 %v4361_v7  ;;  %v4720_v7 = vld [vmem:[#allocation3 + $0x20] sm:$0xff] }
 0xf34   :  { %2096 = vmatpush1.msra.mxu0 %v4704_v57  ;;  %2213 = vmatprep.subr.mxu1 %v4366_v9  ;;  %v4724_v9 = vld [vmem:[#allocation3 + $0x18] sm:$0xff] }
 0xf35   :  { %2097 = vmatprep.subr.mxu0 %v4708_v3  ;;  %2214 = vmatpush1.msra.mxu1 %v4369_v10  ;;  %v4728_v10 = vld [vmem:[#allocation3 + $0x10] sm:$0xff] }
 0xf36   :  { %2098 = vmatpush1.msra.mxu0 %v4712_v5  ;;  %2215 = vmatprep.subr.mxu1 %v4371_v14  ;;  %v4732_v14 = vld [vmem:[#allocation3 + $0x8] sm:$0xff] }
 0xf37   :  { %2099 = vmatprep.subr.mxu0 %v4716_v59  ;;  %2216 = vmatpush1.msra.mxu1 %v4373_v15  ;;  %v4736_v15 = vld [vmem:[#allocation3] sm:$0xff] }
 0xf38   :  { %2100 = vmatpush1.msra.mxu0 %v4720_v7  ;;  %2217 = vmatprep.subr.mxu1 %v4376_v16  ;;  %v4739_v16 = vld [vmem:[#allocation3 + $0x58] sm:$0xff] }
 0xf39   :  { %2101 = vmatprep.subr.mxu0 %v4724_v9  ;;  %2218 = vmatpush1.msra.mxu1 %v4379_v17 }
 0xf3a   :  { %2102 = vmatpush1.msra.mxu0 %v4728_v10  ;;  %2219 = vmatprep.subr.mxu1 %v4387_v21 }
 0xf3b   :  { %2103 = vmatprep.subr.mxu0 %v4732_v14  ;;  %2220 = vmatpush1.msra.mxu1 %v4391_v22 }
 0xf3c   :  { %2104 = vmatpush1.msra.mxu0 %v4736_v15  ;;  %2414 = vmatprep.subr.mxu1 %v4739_v16 }
 0xf3d   :  { %3458 = vmatmul.mubr.msk.f32.vlgmr.msra.gmra.mxu0 %vm186_vm3, %v1941_v46  ;;  %2285 = vmatprep.subr.mxu0 %v4384_v19 }
 0xf3e   :  { %2286 = vmatpush1.msra.mxu0 %v4396_v23  ;;  %2329 = vmatprep.mubr.f32.mxu0 %v5159_v62 }
 0xf3f   :  { %2287 = vmatprep.subr.mxu0 %v4403_v26 }
 0xf40   :  { %2288 = vmatpush1.msra.mxu0 %v4410_v30 }
 0xf41   :  { %2289 = vmatprep.subr.mxu0 %v4417_v31 }
 0xf42   :  { %2290 = vmatpush1.msra.mxu0 %v4424_v33  ;;  %v4761_v33 = vadd.f32 %v4512_v20, %v4324_v28 }
 0xf43   :  { %2291 = vmatprep.subr.mxu0 %v4430_v34 }
 0xf44   :  { %2292 = vmatpush1.msra.mxu0 %v4436_v37 }
 0xf45   :  { %2293 = vmatprep.subr.mxu0 %v4442_v38 }
 0xf46   :  { %2294 = vmatpush1.msra.mxu0 %v4448_v39 }
 0xf47   :  { %2295 = vmatprep.subr.mxu0 %v4454_v41 }
 0xf48   :  { %2296 = vmatpush1.msra.mxu0 %v4460_v42 }
 0xf49   :  { %2536 = vmatprep.subr.mxu0 %v4354_v0  ;;  %v4765_v0 = vadd.f32 %v4514_v56, %v4328_v29 }
 0xfef   :  { %v2010_v17 = vpop.f32.mrf.mxu1 }
 0xff1   :  { %v1933_v19 = vpop.f32.mrf.mxu0  ;;  %v2012_v22 = vpop.f32.mrf.mxu1 }
 0xff2   :  { %v2011_v21 = vadd.f32 %v2010_v17, %v1933_v19 }
 0xff3   :  { %v1935_v23 = vpop.f32.mrf.mxu0 }
 0xff4   :  { %v2015_v26 = vadd.f32 %v2011_v21, %v4521_v45  ;;  %v2013_v30 = vadd.f32 %v2012_v22, %v1935_v23 }
 0xff6   :  { %3717 = vtanh.f32 %v2015_v26  ;;  %v2016_v31 = vadd.f32 %v2013_v30, %v4525_v43  ;;  %v3455_v29 = vmul.f32 -1.442695, %v2015_v26 }
 0xff8   :  { %3719 = vtanh.f32 %v2016_v31 }
 0xffd   :  { %v2139_v34 = vpop.f32.mrf.mxu0 }
 0xffe   :  { %v2144_v37 = vadd.f32 %v2139_v34, %v4761_v33 }
 0xfff   :  { %v2141_v38 = vpop.f32.mrf.mxu0 }
0x1000   :  { %3721 = vtanh.f32 %v2144_v37  ;;  %v2145_v39 = vadd.f32 %v2141_v38, %v4765_v0  ;;  %v3459_v56 = vmul.f32 -1.442695, %v2144_v37 }
0x1002   :  { %3723 = vtanh.f32 %v2145_v39  ;;  %v3460_v55 = vmul.f32 -1.442695, %v2145_v39  ;;  %v4806_v39 = vld [vmem:[#allocation3 + $0xb0] sm:$0xff] }
0x1003   :  { %v3718_v41 = vpop.eup %3717  ;;  %3725 = vpow2.f32 %v3455_v29  ;;  %v4828_v29 = vld [vmem:[%s5138_s14 + $0xb0] sm:$0xff] }
0x1004   :  { %2034 = vrot.lane.b32.xlu1 %v3718_v41, %s3959_s13  ;;  %3727 = vpow2.f32 %v3459_v56  ;;  %v4810_v41 = vld [vmem:[#allocation3 + $0xa8] sm:$0xff]  ;;  %v4831_v56 = vld [vmem:[#allocation3 + $0x90] sm:$0xff] }
0x1005   :  { %v3720_v42 = vpop.eup %3719 }
0x1006   :  { %2036 = vrot.lane.b32.xlu0 %v3720_v42, %s3959_s13  ;;  %v4813_v42 = vld [vmem:[#allocation3 + $0xa0] sm:$0xff] }
0x100d   :  { %v3722_v28 = vpop.eup %3721 }
0x100e   :  { %2166 = vrot.lane.b32.xlu1 %v3722_v28, %s3959_s13  ;;  %v4819_v28 = vld [vmem:[%s5138_s14 + $0xb8] sm:$0xff] }
0x100f   :  { %v3724_v20 = vpop.eup %3723 }
0x1010   :  { %2168 = vrot.lane.b32.xlu0 %v3724_v20, %s3959_s13  ;;  %v3726_v61 = vpop.eup %3725  ;;  %v4822_v20 = vld [vmem:[#allocation3 + $0x98] sm:$0xff] }
0x1011   :  { %v2020_v63 = vadd.f32 1.0, %v3726_v61  ;;  %v3728_v1 = vpop.eup %3727  ;;  %v4837_v61 = vld [vmem:[%s5138_s14 + $0xa8] sm:$0xff] }
0x1012   :  { %v2149_v2 = vadd.f32 1.0, %v3728_v1  ;;  %v4846_v1 = vld [vmem:[%s5138_s14 + $0xa0] sm:$0xff] }
0x1013   :  { %3729 = vrcp.f32 %v2020_v63  ;;  %v4840_v63 = vld [vmem:[#allocation3 + $0x88] sm:$0xff] }
0x1014   :  { %3731 = vrcp.f32 %v2149_v2  ;;  %v4849_v2 = vld [vmem:[#allocation3 + $0x80] sm:$0xff] }
0x1020   :  { %v3730_v11 = vpop.eup %3729 }
0x1021   :  { %v3732_v47 = vpop.eup %3731  ;;  %v2031_v51 = vmul.f32 %v3730_v11, %v4681_v40  ;;  %v3456_v40 = vmul.f32 -1.442695, %v2016_v31 }
0x1022   :  { %v2163_v50 = vmul.f32 %v3732_v47, %v2161_v36  ;;  %v4915_v36 = vld [vmem:[#allocation3 + $0xb8] sm:$0xff] }
0x1076   :  { %v2035_v4 = vpop.permute.xlu1 %2034 }
0x1078   :  { %v2037_v6 = vpop.permute.xlu0 %2036 }
0x1079   :  { %v2038_v13 = vsel %vm847_vm4, %v2035_v4, %v2037_v6  ;;  %v4855_v4 = vld [vmem:[%s5138_s14 + $0x98] sm:$0xff] }
0x107a   :  { %v2040_v25 = vmul.f32 %v3730_v11, %v2038_v13  ;;  %v4858_v6 = vld [vmem:[#allocation3 + $0x78] sm:$0xff]  ;;  %v4862_v11 = vld [vmem:[#allocation3 + $0x70] sm:$0xff] }
0x107b   :  { %v4868_v13 = vld [vmem:[%s5138_s14 + $0x90] sm:$0xff] }
0x107c   :  { %2042 = vrot.lane.b32.xlu1 %v2040_v25, %s3960_s1  ;;  %v4871_v25 = vld [vmem:[#allocation3 + $0x68] sm:$0xff] }
0x1080   :  { %v2167_v49 = vpop.permute.xlu1 %2166 }
0x1082   :  { %v2169_v12 = vpop.permute.xlu0 %2168 }
0x1083   :  { %v2170_v32 = vsel %vm847_vm4, %v2167_v49, %v2169_v12  ;;  %v4877_v49 = vld [vmem:[%s5138_s14 + $0x88] sm:$0xff] }
0x1084   :  { %v2172_v35 = vmul.f32 %v3732_v47, %v2170_v32  ;;  %v4880_v12 = vld [vmem:[#allocation3 + $0x60] sm:$0xff]  ;;  %v4893_v32 = vld [vmem:[%s5138_s14 + $0x78] sm:$0xff] }
0x1085   :  { %v4886_v47 = vld [vmem:[%s5138_s14 + $0x80] sm:$0xff] }
0x1086   :  { %2174 = vrot.lane.b32.xlu0 %v2172_v35, %s3960_s1  ;;  %v4899_v35 = vld [vmem:[%s5138_s14 + $0x70] sm:$0xff] }
0x10ee   :  { %v2043_v27 = vpop.permute.xlu1 %2042 }
0x10ef   :  { %v4778_v18 = vadd.f32 %v2043_v27, %v2031_v51  ;;  %v4906_v51 = vld [vmem:[%s5138_s14 + $0x68] sm:$0xff]  ;;  %v4912_v27 = vld [vmem:[%s5138_s14 + $0x60] sm:$0xff] }
0x10f1   :  { %3733 = vtanh.f32 %v4778_v18 }
0x10f8   :  { %v2175_v52 = vpop.permute.xlu0 %2174 }
0x10f9   :  { %v4782_v54 = vadd.f32 %v2175_v52, %v2163_v50 }
0x10fb   :  { %3735 = vtanh.f32 %v4782_v54 }
0x10fc   :  { %3737 = vpow2.f32 %v3456_v40 }
0x10fd   :  { %3739 = vpow2.f32 %v3460_v55 }
0x10fe   :  { %v3734_v58 = vpop.eup %3733 }
0x10ff   :  { %2048 = vrot.lane.b32.xlu1 %v3734_v58, %s3961_s22 }
0x1108   :  { %v3736_v46 = vpop.eup %3735 }
0x1109   :  { %2180 = vrot.lane.b32.xlu0 %v3736_v46, %s3961_s22  ;;  %v3738_v17 = vpop.eup %3737 }
0x110a   :  { %v2028_v19 = vadd.f32 1.0, %v3738_v17  ;;  %v3740_v8 = vpop.eup %3739 }
0x110b   :  { %v2157_v21 = vadd.f32 1.0, %v3740_v8 }
0x110c   :  { %3741 = vrcp.f32 %v2028_v19 }
0x110d   :  { %3743 = vrcp.f32 %v2157_v21 }
0x1119   :  { %v3742_v22 = vpop.eup %3741 }
0x111a   :  { %v3744_v30 = vpop.eup %3743 }
0x1171   :  { %v2049_v23 = vpop.permute.xlu1 %2048 }
0x1172   :  { %v4787_v26 = vmul.f32 %v3742_v22, %v2049_v23 }
0x1174   :  { %2185 = vrot.lane.b32.xlu1 %v4787_v26, %s3962_s7 }
0x117b   :  { %v2181_v34 = vpop.permute.xlu0 %2180 }
0x117c   :  { %v2183_v37 = vmul.f32 %v3744_v30, %v2181_v34 }
0x117e   :  { %2261 = vrot.lane.b32.xlu0 %v2183_v37, %s3962_s7 }
0x11e6   :  { %v2186_v31 = vpop.permute.xlu1 %2185 }
0x11e7   :  { %3461 = vmatmul.mubr.msk.f32.vlgmr.msra.gmra.mxu1 %vm186_vm3, %v2186_v31 }
0x11e8   :  { %2415 = vmatpush1.msra.mxu1 %v4696_v53  ;;  %2458 = vmatprep.mubr.f32.mxu1 %v5159_v62 }
0x11e9   :  { %2416 = vmatprep.subr.mxu1 %v4700_v44 }
0x11ea   :  { %2417 = vmatpush1.msra.mxu1 %v4704_v57 }
0x11eb   :  { %2418 = vmatprep.subr.mxu1 %v4708_v3 }
0x11ec   :  { %2419 = vmatpush1.msra.mxu1 %v4712_v5 }
0x11ed   :  { %2420 = vmatprep.subr.mxu1 %v4716_v59 }
0x11ee   :  { %2421 = vmatpush1.msra.mxu1 %v4720_v7 }
0x11ef   :  { %2422 = vmatprep.subr.mxu1 %v4724_v9 }
0x11f0   :  { %v2262_v38 = vpop.permute.xlu0 %2261  ;;  %2423 = vmatpush1.msra.mxu1 %v4728_v10 }
0x11f1   :  { %3462 = vmatmul.mubr.msk.f32.vlgmr.msra.gmra.mxu0 %vm186_vm3, %v2262_v38  ;;  %2424 = vmatprep.subr.mxu1 %v4732_v14 }
0x11f2   :  { %2425 = vmatpush1.msra.mxu1 %v4736_v15  ;;  %2537 = vmatpush1.msra.mxu0 %v4806_v39 }
0x11f3   :  { %3466 = vmatmul.mubr.msk.f32.vlgmr.msra.gmra.mxu1 %vm186_vm3, %v2262_v38  ;;  %2538 = vmatprep.subr.mxu0 %v4810_v41 }
0x11f4   :  { %2539 = vmatpush1.msra.mxu0 %v4813_v42  ;;  %2613 = vmatprep.subr.mxu1 %v4819_v28 }
0x11f5   :  { %2540 = vmatprep.subr.mxu0 %v4822_v20  ;;  %2614 = vmatpush1.msra.mxu1 %v4828_v29 }
0x11f6   :  { %2541 = vmatpush1.msra.mxu0 %v4831_v56  ;;  %2615 = vmatprep.subr.mxu1 %v4837_v61 }
0x11f7   :  { %2542 = vmatprep.subr.mxu0 %v4840_v63  ;;  %2616 = vmatpush1.msra.mxu1 %v4846_v1 }
0x11f8   :  { %2543 = vmatpush1.msra.mxu0 %v4849_v2  ;;  %2617 = vmatprep.subr.mxu1 %v4855_v4 }
0x11f9   :  { %2544 = vmatprep.subr.mxu0 %v4858_v6  ;;  %2580 = vmatprep.mubr.f32.mxu0 %v5159_v62 }
0x11fa   :  { %2545 = vmatpush1.msra.mxu0 %v4862_v11  ;;  %2618 = vmatpush1.msra.mxu1 %v4868_v13 }
0x11fb   :  { %2546 = vmatprep.subr.mxu0 %v4871_v25  ;;  %2619 = vmatprep.subr.mxu1 %v4877_v49 }
0x11fc   :  { %2547 = vmatpush1.msra.mxu0 %v4880_v12  ;;  %2620 = vmatpush1.msra.mxu1 %v4886_v47 }
0x11fd   :  { %2742 = vmatprep.subr.mxu0 %v4739_v16  ;;  %2621 = vmatprep.subr.mxu1 %v4893_v32 }
0x11fe   :  { %2622 = vmatpush1.msra.mxu1 %v4899_v35  ;;  %2657 = vmatprep.mubr.f32.mxu1 %v5159_v62 }
0x11ff   :  { %2623 = vmatprep.subr.mxu1 %v4906_v51 }
0x1200   :  { %2624 = vmatpush1.msra.mxu1 %v4912_v27 }
0x1201   :  { %2864 = vmatprep.subr.mxu1 %v4915_v36 }
0x12a7   :  { %v2255_v50 = vpop.f32.mrf.mxu1 }
0x12a9   :  { %v2257_v52 = vpop.f32.mrf.mxu1 }
0x12b1   :  { %v2331_v58 = vpop.f32.mrf.mxu0 }
0x12b2   :  { %v2332_v46 = vadd.f32 %v2331_v58, %v2255_v50 }
0x12b3   :  { %v2333_v40 = vpop.f32.mrf.mxu0  ;;  %v2460_v55 = vpop.f32.mrf.mxu1 }
0x12b4   :  { %v2336_v17 = vadd.f32 %v2332_v46, %v4521_v45  ;;  %v2334_v19 = vadd.f32 %v2333_v40, %v2257_v52  ;;  %v2467_v8 = vrot.slane %v2460_v55, 6 }
0x12b5   :  { %v2462_v21 = vpop.f32.mrf.mxu1 }
0x12b6   :  { %3745 = vtanh.f32 %v2336_v17  ;;  %v2337_v22 = vadd.f32 %v2334_v19, %v4525_v43  ;;  %v2468_v23 = vrot.slane %v2462_v21, 6  ;;  %v2471_v30 = vadd.f32 %v2467_v8, %v4761_v33 }
0x12b7   :  { %v3463_v52 = vmul.f32 -1.442695, %v2336_v17 }
0x12b8   :  { %3747 = vtanh.f32 %v2337_v22  ;;  %v2472_v34 = vadd.f32 %v2468_v23, %v4765_v0  ;;  %v3467_v58 = vmul.f32 -1.442695, %v2471_v30 }
0x12b9   :  { %3749 = vtanh.f32 %v2471_v30 }
0x12ba   :  { %3751 = vtanh.f32 %v2472_v34 }
0x12bb   :  { %3753 = vpow2.f32 %v3463_v52 }
0x12bc   :  { %3755 = vpow2.f32 %v3467_v58 }
0x12c3   :  { %v3746_v37 = vpop.eup %3745 }
0x12c4   :  { %2355 = vrot.lane.b32.xlu1 %v3746_v37, %s3959_s13 }
0x12c5   :  { %v3748_v31 = vpop.eup %3747 }
0x12c6   :  { %2357 = vrot.lane.b32.xlu0 %v3748_v31, %s3959_s13  ;;  %v3750_v38 = vpop.eup %3749 }
0x12c7   :  { %v3752_v50 = vpop.eup %3751 }
0x12c8   :  { %2493 = vrot.lane.b32.xlu1 %v3750_v38, %s3959_s13  ;;  %v3754_v46 = vpop.eup %3753 }
0x12c9   :  { %v2341_v40 = vadd.f32 1.0, %v3754_v46  ;;  %v3756_v55 = vpop.eup %3755  ;;  %v2488_v46 = vrot.slane %v4782_v54, 6 }
0x12ca   :  { %2495 = vrot.lane.b32.xlu0 %v3752_v50, %s3959_s13  ;;  %v2476_v19 = vadd.f32 1.0, %v3756_v55 }
0x12cb   :  { %3757 = vrcp.f32 %v2341_v40 }
0x12cc   :  { %3759 = vrcp.f32 %v2476_v19 }
0x12d8   :  { %v3758_v23 = vpop.eup %3757 }
0x12d9   :  { %v3760_v17 = vpop.eup %3759  ;;  %v2352_v52 = vmul.f32 %v3758_v23, %v4778_v18  ;;  %v3464_v18 = vmul.f32 -1.442695, %v2337_v22 }
0x12da   :  { %v2490_v55 = vmul.f32 %v3760_v17, %v2488_v46 }
0x1336   :  { %v2356_v8 = vpop.permute.xlu1 %2355 }
0x1338   :  { %v2358_v21 = vpop.permute.xlu0 %2357 }
0x1339   :  { %v2359_v37 = vsel %vm847_vm4, %v2356_v8, %v2358_v21 }
0x133a   :  { %v2361_v31 = vmul.f32 %v3758_v23, %v2359_v37  ;;  %v2494_v60 = vpop.permute.xlu1 %2493  ;;  %v3468_v23 = vmul.f32 -1.442695, %v2472_v34 }
0x133c   :  { %2363 = vrot.lane.b32.xlu1 %v2361_v31, %s3960_s1  ;;  %v2496_v38 = vpop.permute.xlu0 %2495 }
0x133d   :  { %v2497_v30 = vsel %vm847_vm4, %v2494_v60, %v2496_v38 }
0x133e   :  { %v2499_v50 = vmul.f32 %v3760_v17, %v2497_v30 }
0x1340   :  { %2501 = vrot.lane.b32.xlu0 %v2499_v50, %s3960_s1 }
0x13ae   :  { %v2364_v58 = vpop.permute.xlu1 %2363 }
0x13af   :  { %v4932_v40 = vadd.f32 %v2364_v58, %v2352_v52 }
0x13b1   :  { %3761 = vtanh.f32 %v4932_v40 }
0x13b2   :  { %v2502_v19 = vpop.permute.xlu0 %2501 }
0x13b3   :  { %v4935_v8 = vadd.f32 %v2502_v19, %v2490_v55 }
0x13b5   :  { %3763 = vtanh.f32 %v4935_v8 }
0x13b6   :  { %3765 = vpow2.f32 %v3464_v18 }
0x13b7   :  { %3767 = vpow2.f32 %v3468_v23 }
0x13be   :  { %v3762_v21 = vpop.eup %3761 }
0x13bf   :  { %2369 = vrot.lane.b32.xlu1 %v3762_v21, %s3961_s22 }
0x13c2   :  { %v3764_v60 = vpop.eup %3763 }
0x13c3   :  { %2507 = vrot.lane.b32.xlu0 %v3764_v60, %s3961_s22  ;;  %v3766_v54 = vpop.eup %3765 }
0x13c4   :  { %v2349_v37 = vadd.f32 1.0, %v3766_v54  ;;  %v3768_v31 = vpop.eup %3767 }
0x13c5   :  { %v2484_v38 = vadd.f32 1.0, %v3768_v31 }
0x13c6   :  { %3769 = vrcp.f32 %v2349_v37 }
0x13c7   :  { %3771 = vrcp.f32 %v2484_v38 }
0x13d3   :  { %v3770_v17 = vpop.eup %3769 }
0x13d4   :  { %v3772_v52 = vpop.eup %3771 }
0x1431   :  { %v2370_v30 = vpop.permute.xlu1 %2369 }
0x1432   :  { %v4940_v50 = vmul.f32 %v3770_v17, %v2370_v30 }
0x1434   :  { %2512 = vrot.lane.b32.xlu1 %v4940_v50, %s3962_s7 }
0x1435   :  { %v2508_v58 = vpop.permute.xlu0 %2507 }
0x1436   :  { %v2510_v46 = vmul.f32 %v3772_v52, %v2508_v58 }
0x1438   :  { %v2588_v22 = vrot.slane %v2510_v46, 2 }
0x143a   :  { %2589 = vrot.lane.b32.xlu0 %v2588_v22, %s3962_s7 }
0x14a6   :  { %v2513_v34 = vpop.permute.xlu1 %2512 }
0x14a7   :  { %3469 = vmatmul.mubr.msk.f32.vlgmr.msra.gmra.mxu0 %vm186_vm3, %v2513_v34 }
0x14a8   :  { %2743 = vmatpush1.msra.mxu0 %v4696_v53  ;;  %2786 = vmatprep.mubr.f32.mxu0 %v5159_v62 }
0x14a9   :  { %2744 = vmatprep.subr.mxu0 %v4700_v44 }
0x14aa   :  { %2745 = vmatpush1.msra.mxu0 %v4704_v57 }
0x14ab   :  { %2746 = vmatprep.subr.mxu0 %v4708_v3 }
0x14ac   :  { %2747 = vmatpush1.msra.mxu0 %v4712_v5  ;;  %v2590_v55 = vpop.permute.xlu0 %2589 }
0x14ad   :  { %2748 = vmatprep.subr.mxu0 %v4716_v59  ;;  %3470 = vmatmul.mubr.msk.f32.vlgmr.msra.gmra.mxu1 %vm186_vm3, %v2590_v55 }
0x14ae   :  { %2749 = vmatpush1.msra.mxu0 %v4720_v7  ;;  %2865 = vmatpush1.msra.mxu1 %v4806_v39 }
0x14af   :  { %2750 = vmatprep.subr.mxu0 %v4724_v9  ;;  %2866 = vmatprep.subr.mxu1 %v4810_v41 }
0x14b0   :  { %2751 = vmatpush1.msra.mxu0 %v4728_v10  ;;  %2867 = vmatpush1.msra.mxu1 %v4813_v42 }
0x14b1   :  { %2752 = vmatprep.subr.mxu0 %v4732_v14  ;;  %2868 = vmatprep.subr.mxu1 %v4822_v20 }
0x14b2   :  { %2753 = vmatpush1.msra.mxu0 %v4736_v15  ;;  %2869 = vmatpush1.msra.mxu1 %v4831_v56 }
0x14b3   :  { %3474 = vmatmul.mubr.msk.f32.vlgmr.msra.gmra.mxu0 %vm186_vm3, %v2590_v55  ;;  %2870 = vmatprep.subr.mxu1 %v4840_v63 }
0x14b4   :  { %2871 = vmatpush1.msra.mxu1 %v4849_v2  ;;  %2941 = vmatprep.subr.mxu0 %v4819_v28 }
0x14b5   :  { %2872 = vmatprep.subr.mxu1 %v4858_v6  ;;  %2942 = vmatpush1.msra.mxu0 %v4828_v29 }
0x14b6   :  { %2873 = vmatpush1.msra.mxu1 %v4862_v11  ;;  %2943 = vmatprep.subr.mxu0 %v4837_v61 }
0x14b7   :  { %2874 = vmatprep.subr.mxu1 %v4871_v25  ;;  %2944 = vmatpush1.msra.mxu0 %v4846_v1 }
0x14b8   :  { %2875 = vmatpush1.msra.mxu1 %v4880_v12  ;;  %2908 = vmatprep.mubr.f32.mxu1 %v5159_v62 }
0x14b9   :  { %2945 = vmatprep.subr.mxu0 %v4855_v4  ;;  %3070 = vmatprep.subr.mxu1 %v4739_v16 }
0x14ba   :  { %2946 = vmatpush1.msra.mxu0 %v4868_v13  ;;  %2985 = vmatprep.mubr.f32.mxu0 %v5159_v62 }
0x14bb   :  { %2947 = vmatprep.subr.mxu0 %v4877_v49 }
0x14bc   :  { %2948 = vmatpush1.msra.mxu0 %v4886_v47 }
0x14bd   :  { %2949 = vmatprep.subr.mxu0 %v4893_v32 }
0x14be   :  { %2950 = vmatpush1.msra.mxu0 %v4899_v35 }
0x14bf   :  { %2951 = vmatprep.subr.mxu0 %v4906_v51 }
0x14c0   :  { %2952 = vmatpush1.msra.mxu0 %v4912_v27 }
0x14c1   :  { %3192 = vmatprep.subr.mxu0 %v4915_v36 }
0x1567   :  { %v2582_v19 = vpop.f32.mrf.mxu0 }
0x1569   :  { %v2584_v60 = vpop.f32.mrf.mxu0 }
0x156d   :  { %v2659_v16 = vpop.f32.mrf.mxu1 }
0x156e   :  { %v2660_v21 = vadd.f32 %v2659_v16, %v2582_v19 }
0x156f   :  { %v2661_v18 = vpop.f32.mrf.mxu1 }
0x1570   :  { %v2664_v23 = vadd.f32 %v2660_v21, %v4521_v45  ;;  %v2662_v54 = vadd.f32 %v2661_v18, %v2584_v60 }
0x1572   :  { %3773 = vtanh.f32 %v2664_v23  ;;  %v2665_v37 = vadd.f32 %v2662_v54, %v4525_v43  ;;  %v3471_v55 = vmul.f32 -1.442695, %v2664_v23 }
0x1573   :  { %v2788_v31 = vpop.f32.mrf.mxu0 }
0x1574   :  { %v2795_v38 = vrot.slane %v2788_v31, 4  ;;  %3775 = vtanh.f32 %v2665_v37 }
0x1575   :  { %v2790_v17 = vpop.f32.mrf.mxu0 }
0x1576   :  { %v2799_v30 = vadd.f32 %v2795_v38, %v4761_v33  ;;  %v2796_v52 = vrot.slane %v2790_v17, 4 }
0x1578   :  { %3777 = vtanh.f32 %v2799_v30  ;;  %v2800_v36 = vadd.f32 %v2796_v52, %v4765_v0  ;;  %v3475_v19 = vmul.f32 -1.442695, %v2799_v30 }
0x157a   :  { %3779 = vtanh.f32 %v2800_v36 }
0x157b   :  { %3781 = vpow2.f32 %v3471_v55 }
0x157c   :  { %3783 = vpow2.f32 %v3475_v19 }
0x157f   :  { %v3774_v58 = vpop.eup %3773 }
0x1580   :  { %2683 = vrot.lane.b32.xlu1 %v3774_v58, %s3959_s13 }
0x1581   :  { %v3776_v46 = vpop.eup %3775 }
0x1582   :  { %2685 = vrot.lane.b32.xlu0 %v3776_v46, %s3959_s13 }
0x1585   :  { %v3778_v22 = vpop.eup %3777 }
0x1586   :  { %2821 = vrot.lane.b32.xlu1 %v3778_v22, %s3959_s13 }
0x1587   :  { %v3780_v34 = vpop.eup %3779 }
0x1588   :  { %2823 = vrot.lane.b32.xlu0 %v3780_v34, %s3959_s13  ;;  %v3782_v16 = vpop.eup %3781 }
0x1589   :  { %v2669_v21 = vadd.f32 1.0, %v3782_v16  ;;  %v3784_v60 = vpop.eup %3783  ;;  %v2816_v16 = vrot.slane %v4935_v8, 6 }
0x158a   :  { %v2804_v18 = vadd.f32 1.0, %v3784_v60 }
0x158b   :  { %3785 = vrcp.f32 %v2669_v21 }
0x158c   :  { %3787 = vrcp.f32 %v2804_v18 }
0x1598   :  { %v3786_v38 = vpop.eup %3785 }
0x1599   :  { %v3788_v23 = vpop.eup %3787  ;;  %v2680_v34 = vmul.f32 %v3786_v38, %v4932_v40  ;;  %v3472_v40 = vmul.f32 -1.442695, %v2665_v37 }
0x159a   :  { %v2818_v21 = vmul.f32 %v3788_v23, %v2816_v16 }
0x15f2   :  { %v2684_v54 = vpop.permute.xlu1 %2683 }
0x15f4   :  { %v2686_v31 = vpop.permute.xlu0 %2685 }
0x15f5   :  { %v2687_v17 = vsel %vm847_vm4, %v2684_v54, %v2686_v31 }
0x15f6   :  { %v2689_v52 = vmul.f32 %v3786_v38, %v2687_v17  ;;  %v3476_v38 = vmul.f32 -1.442695, %v2800_v36 }
0x15f8   :  { %2691 = vrot.lane.b32.xlu1 %v2689_v52, %s3960_s1  ;;  %v2822_v58 = vpop.permute.xlu1 %2821 }
0x15fa   :  { %v2824_v46 = vpop.permute.xlu0 %2823 }
0x15fb   :  { %v2825_v30 = vsel %vm847_vm4, %v2822_v58, %v2824_v46 }
0x15fc   :  { %v2827_v22 = vmul.f32 %v3788_v23, %v2825_v30 }
0x15fe   :  { %2829 = vrot.lane.b32.xlu0 %v2827_v22, %s3960_s1 }
0x166a   :  { %v2692_v55 = vpop.permute.xlu1 %2691 }
0x166b   :  { %v5000_v19 = vadd.f32 %v2692_v55, %v2680_v34 }
0x166d   :  { %3789 = vtanh.f32 %v5000_v19 }
0x1670   :  { %v2830_v60 = vpop.permute.xlu0 %2829 }
0x1671   :  { %v5004_v18 = vadd.f32 %v2830_v60, %v2818_v21 }
0x1673   :  { %3791 = vtanh.f32 %v5004_v18 }
0x1674   :  { %3793 = vpow2.f32 %v3472_v40 }
0x1675   :  { %3795 = vpow2.f32 %v3476_v38 }
0x167a   :  { %v3790_v54 = vpop.eup %3789 }
0x167b   :  { %2697 = vrot.lane.b32.xlu1 %v3790_v54, %s3961_s22 }
0x1680   :  { %v3792_v31 = vpop.eup %3791 }
0x1681   :  { %2835 = vrot.lane.b32.xlu0 %v3792_v31, %s3961_s22  ;;  %v3794_v17 = vpop.eup %3793 }
0x1682   :  { %v2677_v8 = vadd.f32 1.0, %v3794_v17  ;;  %v3796_v52 = vpop.eup %3795 }
0x1683   :  { %v2812_v58 = vadd.f32 1.0, %v3796_v52 }
0x1684   :  { %3797 = vrcp.f32 %v2677_v8 }
0x1685   :  { %3799 = vrcp.f32 %v2812_v58 }
0x1691   :  { %v3798_v46 = vpop.eup %3797 }
0x1692   :  { %v3800_v22 = vpop.eup %3799 }
0x16ed   :  { %v2698_v23 = vpop.permute.xlu1 %2697 }
0x16ee   :  { %v5009_v30 = vmul.f32 %v3798_v46, %v2698_v23 }
0x16f0   :  { %2840 = vrot.lane.b32.xlu1 %v5009_v30, %s3962_s7 }
0x16f3   :  { %v2836_v34 = vpop.permute.xlu0 %2835 }
0x16f4   :  { %v2838_v55 = vmul.f32 %v3800_v22, %v2836_v34 }
0x16f6   :  { %v2916_v37 = vrot.slane %v2838_v55, 4 }
0x16f8   :  { %2917 = vrot.lane.b32.xlu0 %v2916_v37, %s3962_s7 }
0x1762   :  { %v2841_v36 = vpop.permute.xlu1 %2840 }
0x1763   :  { %3477 = vmatmul.mubr.msk.f32.vlgmr.msra.gmra.mxu1 %vm186_vm3, %v2841_v36 }
0x1764   :  { %3071 = vmatpush1.msra.mxu1 %v4696_v53  ;;  %3114 = vmatprep.mubr.f32.mxu1 %v5159_v62 }
0x1765   :  { %3072 = vmatprep.subr.mxu1 %v4700_v44 }
0x1766   :  { %3073 = vmatpush1.msra.mxu1 %v4704_v57 }
0x1767   :  { %3074 = vmatprep.subr.mxu1 %v4708_v3 }
0x1768   :  { %3075 = vmatpush1.msra.mxu1 %v4712_v5 }
0x1769   :  { %3076 = vmatprep.subr.mxu1 %v4716_v59 }
0x176a   :  { %v2918_v16 = vpop.permute.xlu0 %2917  ;;  %3077 = vmatpush1.msra.mxu1 %v4720_v7 }
0x176b   :  { %3478 = vmatmul.mubr.msk.f32.vlgmr.msra.gmra.mxu0 %vm186_vm3, %v2918_v16  ;;  %3078 = vmatprep.subr.mxu1 %v4724_v9 }
0x176c   :  { %3079 = vmatpush1.msra.mxu1 %v4728_v10  ;;  %3193 = vmatpush1.msra.mxu0 %v4806_v39 }
0x176d   :  { %3080 = vmatprep.subr.mxu1 %v4732_v14  ;;  %3194 = vmatprep.subr.mxu0 %v4810_v41 }
0x176e   :  { %3081 = vmatpush1.msra.mxu1 %v4736_v15  ;;  %3195 = vmatpush1.msra.mxu0 %v4813_v42 }
0x176f   :  { %3482 = vmatmul.mubr.msk.f32.vlgmr.msra.gmra.mxu1 %vm186_vm3, %v2918_v16  ;;  %3269 = vmatprep.subr.mxu1 %v4819_v28 }
0x1770   :  { %3270 = vmatpush1.msra.mxu1 %v4828_v29  ;;  %3196 = vmatprep.subr.mxu0 %v4822_v20 }
0x1771   :  { %3271 = vmatprep.subr.mxu1 %v4837_v61  ;;  %3197 = vmatpush1.msra.mxu0 %v4831_v56 }
0x1772   :  { %3272 = vmatpush1.msra.mxu1 %v4846_v1  ;;  %3198 = vmatprep.subr.mxu0 %v4840_v63 }
0x1773   :  { %3273 = vmatprep.subr.mxu1 %v4855_v4  ;;  %3199 = vmatpush1.msra.mxu0 %v4849_v2 }
0x1774   :  { %3274 = vmatpush1.msra.mxu1 %v4868_v13  ;;  %3200 = vmatprep.subr.mxu0 %v4858_v6 }
0x1775   :  { %3275 = vmatprep.subr.mxu1 %v4877_v49  ;;  %3201 = vmatpush1.msra.mxu0 %v4862_v11 }
0x1776   :  { %3276 = vmatpush1.msra.mxu1 %v4886_v47  ;;  %3313 = vmatprep.mubr.f32.mxu1 %v5159_v62 }
0x1777   :  { %3277 = vmatprep.subr.mxu1 %v4893_v32  ;;  %3202 = vmatprep.subr.mxu0 %v4871_v25 }
0x1778   :  { %3278 = vmatpush1.msra.mxu1 %v4899_v35  ;;  %3203 = vmatpush1.msra.mxu0 %v4880_v12  ;;  %v3144_v35 = vrot.slane %v5004_v18, 6 }
0x1779   :  { %3279 = vmatprep.subr.mxu1 %v4906_v51  ;;  %3236 = vmatprep.mubr.f32.mxu0 %v5159_v62 }
0x177a   :  { %3280 = vmatpush1.msra.mxu1 %v4912_v27 }
0x1823   :  { %v2910_v53 = vpop.f32.mrf.mxu1 }
0x1825   :  { %v2912_v57 = vpop.f32.mrf.mxu1 }
0x182b   :  { %v2987_v44 = vpop.f32.mrf.mxu0 }
0x182c   :  { %v2988_v7 = vadd.f32 %v2987_v44, %v2910_v53 }
0x182d   :  { %v2989_v5 = vpop.f32.mrf.mxu0 }
0x182e   :  { %v2990_v15 = vadd.f32 %v2989_v5, %v2912_v57  ;;  %v2992_v41 = vadd.f32 %v2988_v7, %v4521_v45 }
0x182f   :  { %v3116_v3 = vpop.f32.mrf.mxu1 }
0x1830   :  { %v3123_v59 = vrot.slane %v3116_v3, 2  ;;  %v2993_v62 = vadd.f32 %v2990_v15, %v4525_v43  ;;  %v3479_v29 = vmul.f32 -1.442695, %v2992_v41 }
0x1831   :  { %v3118_v9 = vpop.f32.mrf.mxu1 }
0x1832   :  { %v3127_v10 = vadd.f32 %v3123_v59, %v4761_v33  ;;  %v3124_v14 = vrot.slane %v3118_v9, 2  ;;  %v3480_v8 = vmul.f32 -1.442695, %v2993_v62 }
0x1834   :  { %v3128_v39 = vadd.f32 %v3124_v14, %v4765_v0  ;;  %3801 = vtanh.f32 %v3127_v10  ;;  %v3483_v0 = vmul.f32 -1.442695, %v3127_v10 }
0x1836   :  { %3803 = vtanh.f32 %v3128_v39  ;;  %v3484_v17 = vmul.f32 -1.442695, %v3128_v39  ;;  %v3431_v39 = vld [vmem:[%s5141_s17] ss:$0 sm:$0xff]  ;;  %s3963_s17 = smov 2  }
0x1837   :  { %3805 = vtanh.f32 %v2992_v41 }
0x1838   :  { %3807 = vtanh.f32 %v2993_v62 }
0x1839   :  { %3809 = vpow2.f32 %v3483_v0 }
0x183a   :  { %3811 = vpow2.f32 %v3479_v29 }
0x1841   :  { %v3802_v42 = vpop.eup %3801 }
0x1842   :  { %3149 = vrot.lane.b32.xlu1 %v3802_v42, %s3959_s13 }
0x1843   :  { %v3804_v28 = vpop.eup %3803 }
0x1844   :  { %3151 = vrot.lane.b32.xlu0 %v3804_v28, %s3959_s13  ;;  %v3806_v20 = vpop.eup %3805 }
0x1845   :  { %v3808_v33 = vpop.eup %3807 }
0x1846   :  { %3011 = vrot.lane.b32.xlu1 %v3806_v20, %s3959_s13  ;;  %v3810_v56 = vpop.eup %3809 }
0x1847   :  { %v3132_v61 = vadd.f32 1.0, %v3810_v56  ;;  %v3812_v63 = vpop.eup %3811 }
0x1848   :  { %3013 = vrot.lane.b32.xlu0 %v3808_v33, %s3959_s13  ;;  %v2997_v1 = vadd.f32 1.0, %v3812_v63 }
0x1849   :  { %3813 = vrcp.f32 %v3132_v61 }
0x184a   :  { %3815 = vrcp.f32 %v2997_v1 }
0x1856   :  { %v3814_v6 = vpop.eup %3813 }
0x1857   :  { %v3816_v12 = vpop.eup %3815  ;;  %v3146_v51 = vmul.f32 %v3814_v6, %v3144_v35 }
0x1858   :  { %v3008_v60 = vmul.f32 %v3816_v12, %v5000_v19 }
0x18b4   :  { %v3150_v2 = vpop.permute.xlu1 %3149 }
0x18b6   :  { %v3152_v4 = vpop.permute.xlu0 %3151 }
0x18b7   :  { %v3153_v11 = vsel %vm847_vm4, %v3150_v2, %v3152_v4 }
0x18b8   :  { %v3155_v13 = vmul.f32 %v3814_v6, %v3153_v11  ;;  %v3012_v25 = vpop.permute.xlu1 %3011 }
0x18ba   :  { %3157 = vrot.lane.b32.xlu1 %v3155_v13, %s3960_s1  ;;  %v3014_v49 = vpop.permute.xlu0 %3013 }
0x18bb   :  { %v3015_v47 = vsel %vm847_vm4, %v3012_v25, %v3014_v49 }
0x18bc   :  { %v3017_v32 = vmul.f32 %v3816_v12, %v3015_v47 }
0x18be   :  { %3019 = vrot.lane.b32.xlu0 %v3017_v32, %s3960_s1 }
0x192c   :  { %v3158_v27 = vpop.permute.xlu1 %3157 }
0x192d   :  { %v3160_v21 = vadd.f32 %v3158_v27, %v3146_v51 }
0x192f   :  { %3817 = vtanh.f32 %v3160_v21 }
0x1930   :  { %v3020_v54 = vpop.permute.xlu0 %3019 }
0x1931   :  { %v5068_v31 = vadd.f32 %v3020_v54, %v3008_v60 }
0x1933   :  { %3819 = vtanh.f32 %v5068_v31 }
0x1934   :  { %3821 = vpow2.f32 %v3484_v17 }
0x1935   :  { %3823 = vpow2.f32 %v3480_v8 }
0x193c   :  { %v3818_v40 = vpop.eup %3817 }
0x193d   :  { %3163 = vrot.lane.b32.xlu1 %v3818_v40, %s3961_s22 }
0x1940   :  { %v3820_v38 = vpop.eup %3819 }
0x1941   :  { %3025 = vrot.lane.b32.xlu0 %v3820_v38, %s3961_s22  ;;  %v3822_v18 = vpop.eup %3821 }
0x1942   :  { %v3140_v52 = vadd.f32 1.0, %v3822_v18  ;;  %v3824_v58 = vpop.eup %3823 }
0x1943   :  { %v3005_v46 = vadd.f32 1.0, %v3824_v58 }
0x1944   :  { %3825 = vrcp.f32 %v3140_v52 }
0x1945   :  { %3827 = vrcp.f32 %v3005_v46 }
0x1951   :  { %v3826_v19 = vpop.eup %3825 }
0x1952   :  { %v3828_v55 = vpop.eup %3827 }
0x19af   :  { %v3164_v23 = vpop.permute.xlu1 %3163 }
0x19b0   :  { %v3166_v22 = vmul.f32 %v3826_v19, %v3164_v23  ;;  %v5111_v19 = vld [vmem:[#allocation2] ss:$0 sm:$0xff] }
0x19b2   :  { %v3244_v34 = vrot.slane %v3166_v22, 6 }
0x19b3   :  { %v3026_v37 = vpop.permute.xlu0 %3025 }
0x19b4   :  { %v3028_v36 = vmul.f32 %v3828_v55, %v3026_v37  ;;  %3245 = vrot.lane.b32.xlu0 %v3244_v34, %s3962_s7 }
0x19b6   :  { %3168 = vrot.lane.b32.xlu1 %v3028_v36, %s3962_s7 }
0x1a26   :  { %v3246_v16 = vpop.permute.xlu0 %3245 }
0x1a27   :  { %3486 = vmatmul.mubr.msk.f32.vlgmr.msra.gmra.mxu1 %vm186_vm3, %v3246_v16 }
0x1a28   :  { %v3169_v53 = vpop.permute.xlu1 %3168 }
0x1a29   :  { %3485 = vmatmul.mubr.msk.f32.vlgmr.msra.gmra.mxu0 %vm186_vm3, %v3169_v53 }
0x1ae7   :  { %v3315_v44 = vpop.f32.mrf.mxu1 }
0x1ae9   :  { %v3238_v57 = vpop.f32.mrf.mxu0  ;;  %v3317_v5 = vpop.f32.mrf.mxu1 }
0x1aea   :  { %v3316_v3 = vadd.f32 %v3315_v44, %v3238_v57 }
0x1aeb   :  { %v3240_v59 = vpop.f32.mrf.mxu0 }
0x1aec   :  { %v3320_v7 = vadd.f32 %v3316_v3, %v4521_v45  ;;  %v3318_v9 = vadd.f32 %v3317_v5, %v3240_v59 }
0x1aee   :  { %3829 = vtanh.f32 %v3320_v7  ;;  %v3321_v10 = vadd.f32 %v3318_v9, %v4525_v43  ;;  %v3487_v41 = vmul.f32 -1.442695, %v3320_v7 }
0x1af0   :  { %3831 = vtanh.f32 %v3321_v10  ;;  %v3488_v13 = vmul.f32 -1.442695, %v3321_v10 }
0x1af1   :  { %3833 = vpow2.f32 %v3487_v41 }
0x1afb   :  { %v3830_v14 = vpop.eup %3829 }
0x1afc   :  { %3339 = vrot.lane.b32.xlu1 %v3830_v14, %s3959_s13 }
0x1afd   :  { %v3832_v15 = vpop.eup %3831 }
0x1afe   :  { %3341 = vrot.lane.b32.xlu0 %v3832_v15, %s3959_s13  ;;  %v3834_v45 = vpop.eup %3833  ;;  %s3965_s13 = smov 3  }
0x1aff   :  { %v3325_v62 = vadd.f32 1.0, %v3834_v45 }
0x1b01   :  { %3835 = vrcp.f32 %v3325_v62 }
0x1b02   :  { %1062 = vrot.lane.b32.xlu0 %v3431_v39, %s3957_s2  ;;  %s3964_s2 = smov 1  }
0x1b0e   :  { %v3836_v28 = vpop.eup %3835 }
0x1b0f   :  { %v3336_v63 = vmul.f32 %v3836_v28, %v5068_v31 }
0x1b6e   :  { %v3340_v42 = vpop.permute.xlu1 %3339 }
0x1b70   :  { %v3342_v43 = vpop.permute.xlu0 %3341 }
0x1b71   :  { %v3343_v20 = vsel %vm847_vm4, %v3340_v42, %v3342_v43 }
0x1b72   :  { %v3345_v33 = vmul.f32 %v3836_v28, %v3343_v20 }
0x1b74   :  { %v1063_v0 = vpop.permute.xlu0 %1062  ;;  %3347 = vrot.lane.b32.xlu1 %v3345_v33, %s3960_s1  ;;  %s3966_s1 = smov 4  }
0x1b75   :  { %v1396_v29 = vmul.f32 %v4617_v24, %v1063_v0  ;;  %v2052_v56 = vmul.f32 %v4787_v26, %v1063_v0  ;;  %v2701_v61 = vmul.f32 %v5009_v30, %v1063_v0  ;;  %v1724_v24 = vmul.f32 %v4686_v48, %v1063_v0  ;;  %v5160_v30 = vld [vmem:[#allocation9_spill] sm:$0xff] }
0x1b76   :  { %v2373_v26 = vmul.f32 %v4940_v50, %v1063_v0  ;;  %v3029_v6 = vmul.f32 %v3028_v36, %v1063_v0  ;;  %v1065_v11 = vmul.f32 %v1063_v0, %v5160_v30 }
0x1b77   :  { %1398 = vrot.lane.b32.xlu0 %v1396_v29, %s3962_s7 }
0x1b7b   :  { %2054 = vrot.lane.b32.xlu0 %v2052_v56, %s3962_s7 }
0x1b7f   :  { %2703 = vrot.lane.b32.xlu0 %v2701_v61, %s3962_s7 }
0x1be6   :  { %v3348_v1 = vpop.permute.xlu1 %3347 }
0x1be7   :  { %v3350_v2 = vadd.f32 %v3348_v1, %v3336_v63 }
0x1be9   :  { %3837 = vtanh.f32 %v3350_v2  ;;  %v1399_v31 = vpop.permute.xlu0 %1398 }
0x1bea   :  { %3839 = vpow2.f32 %v3488_v13  ;;  %v1401_v40 = vsel %vm1070_vm5, %v1399_v31, 0.0 }
0x1bed   :  { %v2055_v38 = vpop.permute.xlu0 %2054 }
0x1bee   :  { %v2057_v17 = vsel %vm1070_vm5, %v2055_v38, 0.0 }
0x1bf1   :  { %v2704_v18 = vpop.permute.xlu0 %2703 }
0x1bf2   :  { %v2706_v52 = vsel %vm1070_vm5, %v2704_v18, 0.0 }
0x1bf6   :  { %v3838_v4 = vpop.eup %3837 }
0x1bf7   :  { %3353 = vrot.lane.b32.xlu1 %v3838_v4, %s3961_s22  ;;  %v3840_v25 = vpop.eup %3839  ;;  %s3967_s22 = smov 5  }
0x1bf8   :  { %v3333_v49 = vadd.f32 1.0, %v3840_v25 }
0x1bfa   :  { %3841 = vrcp.f32 %v3333_v49 }
0x1bfb   :  { %1726 = vrot.lane.b32.xlu1 %v1724_v24, %s3962_s7 }
0x1bff   :  { %2375 = vrot.lane.b32.xlu1 %v2373_v26, %s3962_s7 }
0x1c03   :  { %3031 = vrot.lane.b32.xlu1 %v3029_v6, %s3962_s7 }
0x1c07   :  { %1067 = vrot.lane.b32.xlu1 %v1065_v11, %s3962_s7  ;;  %v3842_v12 = vpop.eup %3841 }
0x1c69   :  { %v3354_v48 = vpop.permute.xlu1 %3353 }
0x1c6a   :  { %v3356_v47 = vmul.f32 %v3842_v12, %v3354_v48 }
0x1c6c   :  { %v3357_v32 = vmul.f32 %v3356_v47, %v1063_v0 }
0x1c6d   :  { %v1727_v50 = vpop.permute.xlu1 %1726 }
0x1c6e   :  { %v1729_v35 = vsel %vm1070_vm5, %v1727_v50, 0.0  ;;  %3359 = vrot.lane.b32.xlu0 %v3357_v32, %s3962_s7  ;;  %s3968_s7 = smov 6  }
0x1c6f   :  { %1730 = vadd.xlane.f32.xlu1 %v1729_v35 }
0x1c71   :  { %v2376_v51 = vpop.permute.xlu1 %2375 }
0x1c72   :  { %v2378_v8 = vsel %vm1070_vm5, %v2376_v51, 0.0 }
0x1c75   :  { %v3032_v27 = vpop.permute.xlu1 %3031 }
0x1c76   :  { %v3034_v21 = vsel %vm1070_vm5, %v3032_v27, 0.0 }
0x1c77   :  { %3035 = vadd.xlane.f32.xlu1 %v3034_v21 }
0x1c79   :  { %v1068_v60 = vpop.permute.xlu1 %1067 }
0x1c7a   :  { %v1071_v54 = vsel %vm1070_vm5, %v1068_v60, 0.0 }
0x1c7b   :  { %1072 = vadd.xlane.f32.xlu1 %v1071_v54 }
0x1c8d   :  { %1402 = vadd.xlane.f32.xlu0 %v1401_v40 }
0x1c91   :  { %2058 = vadd.xlane.f32.xlu0 %v2057_v17 }
0x1c95   :  { %2379 = vadd.xlane.f32.xlu0 %v2378_v8 }
0x1c99   :  { %2707 = vadd.xlane.f32.xlu0 %v2706_v52 }
0x1ce0   :  { %v3360_v58 = vpop.permute.xlu0 %3359 }
0x1ce1   :  { %v3362_v46 = vsel %vm1070_vm5, %v3360_v58, 0.0 }
0x1ce2   :  { %3363 = vadd.xlane.f32.xlu0 %v3362_v46 }
0x1cf8   :  { %v1731_v23 = vpop.xlane.xlu1 %1730 }
0x1cf9   :  { %v1732_v22 = vadd.f32 %v5111_v19, %v1731_v23 }
0x1cfb   :  { %v3449_v34 = vmul.f32 -1.442695, %v1732_v22 }
0x1cfd   :  { %3843 = vpow2.f32 %v3449_v34 }
0x1d00   :  { %v3036_v55 = vpop.xlane.xlu1 %3035 }
0x1d01   :  { %v3037_v10 = vadd.f32 %v5111_v19, %v3036_v55 }
0x1d03   :  { %v3481_v41 = vmul.f32 -1.442695, %v3037_v10 }
0x1d04   :  { %v1073_v37 = vpop.xlane.xlu1 %1072 }
0x1d05   :  { %v1080_v36 = vadd.f32 %v5111_v19, %v1073_v37 }
0x1d07   :  { %v3433_v16 = vmul.f32 -1.442695, %v1080_v36 }
0x1d09   :  { %3845 = vpow2.f32 %v3433_v16 }
0x1d0a   :  { %v3844_v53 = vpop.eup %3843 }
0x1d0b   :  { %v1736_v44 = vadd.f32 1.0, %v3844_v53 }
0x1d0d   :  { %3847 = vrcp.f32 %v1736_v44 }
0x1d16   :  { %v3846_v57 = vpop.eup %3845  ;;  %v1403_v3 = vpop.xlane.xlu0 %1402 }
0x1d17   :  { %v1084_v5 = vadd.f32 1.0, %v3846_v57  ;;  %v1404_v59 = vadd.f32 %v5111_v19, %v1403_v3 }
0x1d19   :  { %3849 = vrcp.f32 %v1084_v5  ;;  %v3441_v7 = vmul.f32 -1.442695, %v1404_v59 }
0x1d1a   :  { %v3848_v9 = vpop.eup %3847  ;;  %v2059_v14 = vpop.xlane.xlu0 %2058 }
0x1d1b   :  { %3851 = vpow2.f32 %v3441_v7  ;;  %v2060_v15 = vadd.f32 %v5111_v19, %v2059_v14  ;;  %1740 = vrot.lane.b32.xlu1 %v3848_v9, %s3963_s17 }
0x1d1d   :  { %v3457_v39 = vmul.f32 -1.442695, %v2060_v15 }
0x1d1e   :  { %v2380_v45 = vpop.xlane.xlu0 %2379 }
0x1d1f   :  { %3853 = vpow2.f32 %v3457_v39  ;;  %v2381_v62 = vadd.f32 %v5111_v19, %v2380_v45 }
0x1d20   :  { %3855 = vpow2.f32 %v3481_v41 }
0x1d21   :  { %v3465_v42 = vmul.f32 -1.442695, %v2381_v62 }
0x1d22   :  { %v2708_v43 = vpop.xlane.xlu0 %2707 }
0x1d23   :  { %3857 = vpow2.f32 %v3465_v42  ;;  %v2709_v28 = vadd.f32 %v5111_v19, %v2708_v43 }
0x1d25   :  { %v3473_v20 = vmul.f32 -1.442695, %v2709_v28 }
0x1d26   :  { %v3850_v33 = vpop.eup %3849 }
0x1d27   :  { %3859 = vpow2.f32 %v3473_v20  ;;  %1088 = vst.msk [vmem:[#allocation6] sm:$0x3] %vm1087_vm6, %v3850_v33 }
0x1d28   :  { %v3852_v0 = vpop.eup %3851 }
0x1d29   :  { %v1408_v29 = vadd.f32 1.0, %v3852_v0 }
0x1d2b   :  { %3861 = vrcp.f32 %v1408_v29 }
0x1d2c   :  { %v3854_v56 = vpop.eup %3853 }
0x1d2d   :  { %v2064_v61 = vadd.f32 1.0, %v3854_v56  ;;  %v3856_v63 = vpop.eup %3855 }
0x1d2e   :  { %v3041_v4 = vadd.f32 1.0, %v3856_v63 }
0x1d2f   :  { %3863 = vrcp.f32 %v2064_v61 }
0x1d30   :  { %v3858_v1 = vpop.eup %3857 }
0x1d31   :  { %v2385_v2 = vadd.f32 1.0, %v3858_v1 }
0x1d33   :  { %3865 = vrcp.f32 %v2385_v2 }
0x1d34   :  { %v3860_v24 = vpop.eup %3859  ;;  %3867 = vrcp.f32 %v3041_v4 }
0x1d35   :  { %v2713_v26 = vadd.f32 1.0, %v3860_v24 }
0x1d37   :  { %3869 = vrcp.f32 %v2713_v26 }
0x1d38   :  { %v3862_v6 = vpop.eup %3861 }
0x1d39   :  { %1412 = vrot.lane.b32.xlu0 %v3862_v6, %s3964_s2 }
0x1d3c   :  { %v3864_v30 = vpop.eup %3863 }
0x1d3d   :  { %2068 = vrot.lane.b32.xlu1 %v3864_v30, %s3965_s13 }
0x1d40   :  { %v3866_v11 = vpop.eup %3865 }
0x1d41   :  { %2389 = vrot.lane.b32.xlu1 %v3866_v11, %s3966_s1  ;;  %v3868_v13 = vpop.eup %3867 }
0x1d44   :  { %v3870_v25 = vpop.eup %3869 }
0x1d45   :  { %2717 = vrot.lane.b32.xlu0 %v3870_v25, %s3967_s22  ;;  %3045 = vrot.lane.b32.xlu1 %v3868_v13, %s3968_s7 }
0x1d6b   :  { %v3364_v49 = vpop.xlane.xlu0 %3363 }
0x1d6c   :  { %v3365_v12 = vadd.f32 %v5111_v19, %v3364_v49 }
0x1d6e   :  { %v3489_v48 = vmul.f32 -1.442695, %v3365_v12 }
0x1d70   :  { %3871 = vpow2.f32 %v3489_v48 }
0x1d7d   :  { %v3872_v47 = vpop.eup %3871 }
0x1d7e   :  { %v3369_v32 = vadd.f32 1.0, %v3872_v47 }
0x1d80   :  { %3873 = vrcp.f32 %v3369_v32 }
0x1d8d   :  { %v3874_v50 = vpop.eup %3873  ;;  %v1741_v35 = vpop.permute.xlu1 %1740 }
0x1d8e   :  { %3373 = vrot.lane.b32.xlu0 %v3874_v50, %s3969_s4 }
0x1dab   :  { %v1413_v51 = vpop.permute.xlu0 %1412 }
0x1dac   :  { %1416 = vst.msk [vmem:[#allocation6] sm:$0x3] %vm1415_vm7, %v1413_v51 }
0x1dad   :  { %1744 = vst.msk [vmem:[#allocation6] sm:$0x3] %vm1743_vm8, %v1741_v35 }
0x1daf   :  { %v2069_v27 = vpop.permute.xlu1 %2068 }
0x1db0   :  { %2072 = vst.msk [vmem:[#allocation6] sm:$0x3] %vm2071_vm9, %v2069_v27 }
0x1db3   :  { %v2390_v21 = vpop.permute.xlu1 %2389 }
0x1db4   :  { %2393 = vst.msk [vmem:[#allocation6] sm:$0x3] %vm2392_vm10, %v2390_v21 }
0x1db7   :  { %v2718_v60 = vpop.permute.xlu0 %2717  ;;  %v3046_v54 = vpop.permute.xlu1 %3045 }
0x1db8   :  { %2721 = vst.msk [vmem:[#allocation6] sm:$0x3] %vm2720_vm11, %v2718_v60 }
0x1db9   :  { %3049 = vst.msk [vmem:[#allocation6] sm:$0x3] %vm3048_vm12, %v3046_v54 }
0x1e00   :  { %v3374_v31 = vpop.permute.xlu0 %3373 }
0x1e01   :  { %3377 = vst.msk [vmem:[#allocation6] sm:$0x3] %vm3376_vm13, %v3374_v31 }
0x1e02   :  { %3942 = shalt.err (!%p3939_p9)
}
0x1e03   :  { %3387 = dma.vmem_to_hbm [thread:$0]  %s3385_s5, 32, %s5143_s19, [#allocation5]  }
0x1e04   :  { %3953 = dma.done.wait [#allocation5], 32  }
0x1e05   :  { %3954 = vsyncadd [#allocation5], 4294967264 }
0x1e06   :  { %3391 = vsyncpa [#allocation4], 1 }
0x1e07   :  { %3392 = vsyncpa [#allocation5], 1 }

</bundles_post_ra>
